<compile_context>
chip_gen: v7x
topology: tpu7x:2x2x1
jax: 0.10.0
libtpu: 0.0.40
codegen_flags: <defaults>
</compile_context>

<pallas_src>
import functools

import jax
import jax.numpy as jnp
from jax import lax
from jax.experimental import pallas as pl
from jax.experimental.pallas import tpu as pltpu


# ---------------------------------------------------------------------------
# Model / padding geometry
# ---------------------------------------------------------------------------
L_IN = 64                 # input length
K1, C1 = 8, 128           # conv1: in=1,   out=128, k=8 -> L1 = 57
K2, C2 = 5, 256           # conv2: in=128, out=256, k=5 -> L2 = 53
K3, C3 = 3, 128           # conv3: in=256, out=128, k=3 -> L3 = 51
L1_OUT = L_IN - K1 + 1    # 57
L2_OUT = L1_OUT - K2 + 1  # 53
L3_OUT = L2_OUT - K3 + 1  # 51
# Padded (multiple-of-8) lengths.  Chosen so that
#   L1P >= L2P + K2 - 1,  L2P >= L3P + K3 - 1,  LxP >= true Lx_out,
# which guarantees every *valid* output row only reads *valid* input rows;
# padded/garbage rows stay confined to the pad region and are masked at pooling.
L3P = 56
L2P = 64
L1P = 72
BN_EPS = 1e-5

TILE_N = 8                # batch tile (grid step); batch padded to a multiple
FC_PAD = 128              # FC head padded to full lane width


# ---------------------------------------------------------------------------
# Fused kernel: conv1+BN+ReLU -> conv2+BN+ReLU -> conv3+BN+ReLU -> pool -> FC
# Per grid step (one batch tile of TILE_N items):
#   p1_ref  : (TILE_N*L1P, K1)   layer-1 im2col patches (built in the wrapper)
#   wX_ref  : (Kx*Cin_x, Cx)     flattened conv weights (im2col layout), bf16
#   sX/bX   : (1, Cx)            folded BN scale / (conv-bias + BN shift), f32
#   wfc/bfc : (C3, FC_PAD)/(1, FC_PAD)  zero-padded FC head (wfc bf16)
#   o_ref   : (TILE_N, FC_PAD)
# ---------------------------------------------------------------------------
def fused_convnet_kernel(p1_ref, w1_ref, s1_ref, b1_ref,
                         w2_ref, s2_ref, b2_ref,
                         w3_ref, s3_ref, b3_ref,
                         wfc_ref, bfc_ref, o_ref, *, tn):
    f32 = jnp.float32
    bf16 = jnp.bfloat16

    # ---- layer 1: (tn*L1P, K1) @ (K1, C1), folded BN + ReLU ------------------
    h1 = jnp.dot(p1_ref[...].astype(bf16), w1_ref[...],
                 preferred_element_type=f32)
    h1 = jnp.maximum(h1 * s1_ref[...] + b1_ref[...], 0.0)         # (tn*L1P, C1)
    h1 = h1.astype(bf16).reshape(tn, L1P, C1)

    # ---- layer 2: im2col via shifted slices (bf16), one deep matmul ----------
    p2 = jnp.concatenate([h1[:, k:k + L2P, :] for k in range(K2)], axis=-1)
    p2 = p2.reshape(tn * L2P, K2 * C1)                             # (tn*64, 640)
    h2 = jnp.dot(p2, w2_ref[...], preferred_element_type=f32)
    h2 = jnp.maximum(h2 * s2_ref[...] + b2_ref[...], 0.0)          # (tn*L2P, C2)
    h2 = h2.astype(bf16).reshape(tn, L2P, C2)

    # ---- layer 3 --------------------------------------------------------------
    p3 = jnp.concatenate([h2[:, k:k + L3P, :] for k in range(K3)], axis=-1)
    p3 = p3.reshape(tn * L3P, K3 * C2)                             # (tn*56, 768)
    h3 = jnp.dot(p3, w3_ref[...], preferred_element_type=f32)
    h3 = jnp.maximum(h3 * s3_ref[...] + b3_ref[...], 0.0)          # (tn*L3P, C3)
    h3 = h3.reshape(tn, L3P, C3)

    # ---- global average pool over the TRUE length L3_OUT, then FC head -------
    pos = lax.broadcasted_iota(jnp.int32, (tn, L3P, C3), 1)
    h3 = jnp.where(pos < L3_OUT, h3, 0.0)                          # mask pad rows
    pooled = jnp.sum(h3, axis=1) * (1.0 / L3_OUT)                  # (tn, C3) f32

    o_ref[...] = (
        jnp.dot(pooled.astype(bf16), wfc_ref[...], preferred_element_type=f32)
        + bfc_ref[...]
    ).astype(o_ref.dtype)


def conv_classifier_forward(x_ncl, params):
    """x_ncl: (N, 1, L) like PyTorch NCL input. Returns (N, num_classes)."""
    n, _, l_in = x_ncl.shape
    assert l_in == L_IN, (l_in, L_IN)
    num_classes = params["fc_w"].shape[1]
    bf16 = jnp.bfloat16

    # Pad batch to a multiple of TILE_N (pad rows sliced away at the end).
    n_pad = ((n + TILE_N - 1) // TILE_N) * TILE_N
    x_flat = x_ncl[:, 0, :]                                        # (N, L)
    if n_pad != n:
        x_flat = jnp.pad(x_flat, ((0, n_pad - n), (0, 0)))

    # Layer-1 im2col in the (tiny) wrapper: patches[b, l, k] = x[b, l + k].
    x_pad = jnp.pad(x_flat, ((0, 0), (0, L1P + K1 - 1 - L_IN)))    # (n_pad, 79)
    p1 = jnp.stack([x_pad[:, k:k + L1P] for k in range(K1)], axis=-1)
    p1 = p1.reshape(n_pad * L1P, K1)                               # (n_pad*72, 8)

    # Flatten conv weights for im2col matmuls, ship as bf16 (halves weight DMA).
    w1 = params["l1"]["w"].reshape(K1 * 1, C1).astype(bf16)
    w2 = params["l2"]["w"].reshape(K2 * C1, C2).astype(bf16)
    w3 = params["l3"]["w"].reshape(K3 * C2, C3).astype(bf16)
    # FC head zero-padded to lane width 128.
    wfc = jnp.zeros((C3, FC_PAD), bf16).at[:, :num_classes].set(
        params["fc_w"].astype(bf16))
    bfc = jnp.zeros((1, FC_PAD), jnp.float32).at[:, :num_classes].set(
        params["fc_b"].reshape(1, -1))

    kernel = functools.partial(fused_convnet_kernel, tn=TILE_N)
    grid = (n_pad // TILE_N,)

    def resident(shape):
        nd = len(shape)
        return pl.BlockSpec(shape, lambda i, _nd=nd: (0,) * _nd)

    out = pl.pallas_call(
        kernel,
        out_shape=jax.ShapeDtypeStruct((n_pad, FC_PAD), jnp.float32),
        grid=grid,
        in_specs=[
            pl.BlockSpec((TILE_N * L1P, K1), lambda i: (i, 0)),    # per-tile patches
            resident(w1.shape), resident((1, C1)), resident((1, C1)),
            resident(w2.shape), resident((1, C2)), resident((1, C2)),
            resident(w3.shape), resident((1, C3)), resident((1, C3)),
            resident(wfc.shape), resident(bfc.shape),
        ],
        out_specs=pl.BlockSpec((TILE_N, FC_PAD), lambda i: (i, 0)),
        compiler_params=pltpu.CompilerParams(
            dimension_semantics=("parallel",),          # v7x: split batch over 2 TCs
            vmem_limit_bytes=32 * 1024 * 1024,
        ),
    )(p1,
      w1, params["l1"]["scale"], params["l1"]["bias_eff"],
      w2, params["l2"]["scale"], params["l2"]["bias_eff"],
      w3, params["l3"]["scale"], params["l3"]["bias_eff"],
      wfc, bfc)

    return out[:n, :num_classes]


# ---------------------------------------------------------------------------
# Parameter construction (deterministic, synthetic)
# ---------------------------------------------------------------------------
def make_layer_params(key, c_in, c_out, ksize):
    k_w, k_b, k_g, k_be, k_m, k_v = jax.random.split(key, 6)
    w = jax.random.normal(k_w, (ksize, c_in, c_out), jnp.float32) * 0.05
    b = jax.random.normal(k_b, (c_out,), jnp.float32) * 0.05
    gamma = 1.0 + 0.1 * jax.random.normal(k_g, (c_out,), jnp.float32)
    beta = 0.1 * jax.random.normal(k_be, (c_out,), jnp.float32)
    running_mean = 0.1 * jax.random.normal(k_m, (c_out,), jnp.float32)
    running_var = jax.random.uniform(
        k_v, (c_out,), jnp.float32, minval=0.5, maxval=1.5
    )
    # Fold eval-mode BN (+ conv bias) into per-channel scale/shift.
    scale = gamma / jnp.sqrt(running_var + BN_EPS)
    bias_eff = b * scale + (beta - running_mean * scale)
    return dict(
        w=w, b=b, gamma=gamma, beta=beta,
        running_mean=running_mean, running_var=running_var,
        scale=scale.reshape(1, -1), bias_eff=bias_eff.reshape(1, -1),
    )


# ---------------------------------------------------------------------------
# Pure-JAX reference with PyTorch conventions (NCL conv, eval-mode BN)
# ---------------------------------------------------------------------------
def ref_conv_block(x_ncl, p):
    w_oik = jnp.transpose(p["w"], (2, 1, 0))  # (K,Cin,Cout) -> (Cout,Cin,K)
    z = lax.conv_general_dilated(
        x_ncl, w_oik, window_strides=(1,), padding="VALID",
        dimension_numbers=("NCH", "OIH", "NCH"),
    ) + p["b"][None, :, None]
    z = (z - p["running_mean"][None, :, None]) / jnp.sqrt(
        p["running_var"][None, :, None] + BN_EPS
    ) * p["gamma"][None, :, None] + p["beta"][None, :, None]
    return jnp.maximum(z, 0.0)


def ref_forward(x_ncl, params):
    x = ref_conv_block(x_ncl, params["l1"])
    x = ref_conv_block(x, params["l2"])
    x = ref_conv_block(x, params["l3"])
    pooled = jnp.mean(x, axis=2)                                   # (N, 128)
    return pooled @ params["fc_w"] + params["fc_b"][0]


if __name__ == "__main__":
    num_classes = 10
    N = 2  # input (N, 1, L_IN), matching Conv1d(in_channels=1, ...)

    root = jax.random.PRNGKey(0)
    kx, k1, k2, k3, kw, kb = jax.random.split(root, 6)

    params = {
        "l1": make_layer_params(k1, 1, C1, K1),
        "l2": make_layer_params(k2, C1, C2, K2),
        "l3": make_layer_params(k3, C2, C3, K3),
        "fc_w": jax.random.normal(kw, (C3, num_classes), jnp.float32) * 0.05,
        "fc_b": (jax.random.normal(kb, (num_classes,), jnp.float32) * 0.05
                 ).reshape(1, -1),
    }

    x = jax.random.normal(kx, (N, 1, L_IN), jnp.float32)

    out = jax.block_until_ready(conv_classifier_forward(x, params))
    ref = jax.block_until_ready(ref_forward(x, params))

    assert out.shape == (N, num_classes), out.shape
    max_err = float(jnp.max(jnp.abs(out - ref)))
    # bf16 MXU operands with f32 accumulation: loosened tolerance vs. pure f32.
    assert jnp.allclose(out, ref, atol=1e-2, rtol=2e-2), (
        "mismatch vs reference", max_err)

    print("KERNEL_OK")
</pallas_src>

<mosaic_0001>
module attributes {stable_mosaic.version = 11 : i64} {
  func.func @fused_convnet_kernel(%arg0: i32, %arg1: memref<576x8xf32, #tpu.memory_space<vmem>>, %arg2: memref<8x128xbf16, #tpu.memory_space<vmem>>, %arg3: memref<1x128xf32, #tpu.memory_space<vmem>>, %arg4: memref<1x128xf32, #tpu.memory_space<vmem>>, %arg5: memref<640x256xbf16, #tpu.memory_space<vmem>>, %arg6: memref<1x256xf32, #tpu.memory_space<vmem>>, %arg7: memref<1x256xf32, #tpu.memory_space<vmem>>, %arg8: memref<768x128xbf16, #tpu.memory_space<vmem>>, %arg9: memref<1x128xf32, #tpu.memory_space<vmem>>, %arg10: memref<1x128xf32, #tpu.memory_space<vmem>>, %arg11: memref<128x128xbf16, #tpu.memory_space<vmem>>, %arg12: memref<1x128xf32, #tpu.memory_space<vmem>>, %arg13: memref<8x128xf32, #tpu.memory_space<vmem>>) attributes {dimension_semantics = [#tpu.dimension_semantics<parallel>], iteration_bounds = array<i64: 1>, scalar_prefetch = 0 : i64, scratch_operands = 0 : i64, tpu.core_type = #tpu.core_type<tc>, window_params = [{transform_indices = @transform_0, window_bounds = array<i64: 576, 8>}, {pipeline_mode = #tpu.pipeline_mode<synchronous>, transform_indices = @transform_1, window_bounds = array<i64: 8, 128>}, {pipeline_mode = #tpu.pipeline_mode<synchronous>, transform_indices = @transform_2, window_bounds = array<i64: 1, 128>}, {pipeline_mode = #tpu.pipeline_mode<synchronous>, transform_indices = @transform_3, window_bounds = array<i64: 1, 128>}, {pipeline_mode = #tpu.pipeline_mode<synchronous>, transform_indices = @transform_4, window_bounds = array<i64: 640, 256>}, {pipeline_mode = #tpu.pipeline_mode<synchronous>, transform_indices = @transform_5, window_bounds = array<i64: 1, 256>}, {pipeline_mode = #tpu.pipeline_mode<synchronous>, transform_indices = @transform_6, window_bounds = array<i64: 1, 256>}, {pipeline_mode = #tpu.pipeline_mode<synchronous>, transform_indices = @transform_7, window_bounds = array<i64: 768, 128>}, {pipeline_mode = #tpu.pipeline_mode<synchronous>, transform_indices = @transform_8, window_bounds = array<i64: 1, 128>}, {pipeline_mode = #tpu.pipeline_mode<synchronous>, transform_indices = @transform_9, window_bounds = array<i64: 1, 128>}, {pipeline_mode = #tpu.pipeline_mode<synchronous>, transform_indices = @transform_10, window_bounds = array<i64: 128, 128>}, {pipeline_mode = #tpu.pipeline_mode<synchronous>, transform_indices = @transform_11, window_bounds = array<i64: 1, 128>}, {transform_indices = @transform_12, window_bounds = array<i64: 8, 128>}]} {
    %c0 = arith.constant 0 : index
    %c0_0 = arith.constant 0 : index
    %0 = vector.load %arg1[%c0, %c0_0] : memref<576x8xf32, #tpu.memory_space<vmem>>, vector<576x8xf32>
    %1 = arith.truncf %0 : vector<576x8xf32> to vector<576x8xbf16>
    %c0_1 = arith.constant 0 : index
    %c0_2 = arith.constant 0 : index
    %2 = vector.load %arg2[%c0_1, %c0_2] : memref<8x128xbf16, #tpu.memory_space<vmem>>, vector<8x128xbf16>
    %cst = arith.constant dense<0.000000e+00> : vector<576x128xf32>
    %3 = tpu.matmul %1, %2, %cst {dimension_numbers = #tpu.dot_dimension_numbers<[1], [0], [0], [1], [0, 0, 1, 1], [], []>} : vector<576x8xbf16>, vector<8x128xbf16>, vector<576x128xf32> -> vector<576x128xf32>
    %c0_3 = arith.constant 0 : index
    %c0_4 = arith.constant 0 : index
    %4 = vector.load %arg3[%c0_3, %c0_4] : memref<1x128xf32, #tpu.memory_space<vmem>>, vector<1x128xf32>
    %5 = vector.broadcast %4 : vector<1x128xf32> to vector<576x128xf32>
    %6 = arith.mulf %3, %5 : vector<576x128xf32>
    %c0_5 = arith.constant 0 : index
    %c0_6 = arith.constant 0 : index
    %7 = vector.load %arg4[%c0_5, %c0_6] : memref<1x128xf32, #tpu.memory_space<vmem>>, vector<1x128xf32>
    %8 = vector.broadcast %7 : vector<1x128xf32> to vector<576x128xf32>
    %9 = arith.addf %6, %8 : vector<576x128xf32>
    %cst_7 = arith.constant 0.000000e+00 : f32
    %10 = vector.broadcast %cst_7 : f32 to vector<576x128xf32>
    %11 = arith.maximumf %9, %10 : vector<576x128xf32>
    %12 = arith.truncf %11 : vector<576x128xf32> to vector<576x128xbf16>
    %13 = vector.shape_cast %12 : vector<576x128xbf16> to vector<8x72x128xbf16>
    %14 = vector.extract_strided_slice %13 {offsets = [0, 0, 0], sizes = [8, 64, 128], strides = [1, 1, 1]} : vector<8x72x128xbf16> to vector<8x64x128xbf16>
    %15 = vector.extract_strided_slice %13 {offsets = [0, 1, 0], sizes = [8, 64, 128], strides = [1, 1, 1]} : vector<8x72x128xbf16> to vector<8x64x128xbf16>
    %16 = vector.extract_strided_slice %13 {offsets = [0, 2, 0], sizes = [8, 64, 128], strides = [1, 1, 1]} : vector<8x72x128xbf16> to vector<8x64x128xbf16>
    %17 = vector.extract_strided_slice %13 {offsets = [0, 3, 0], sizes = [8, 64, 128], strides = [1, 1, 1]} : vector<8x72x128xbf16> to vector<8x64x128xbf16>
    %18 = vector.extract_strided_slice %13 {offsets = [0, 4, 0], sizes = [8, 64, 128], strides = [1, 1, 1]} : vector<8x72x128xbf16> to vector<8x64x128xbf16>
    %19 = tpu.concatenate %14, %15, %16, %17, %18 in 2 : vector<8x64x128xbf16>, vector<8x64x128xbf16>, vector<8x64x128xbf16>, vector<8x64x128xbf16>, vector<8x64x128xbf16> -> vector<8x64x640xbf16>
    %20 = vector.shape_cast %19 : vector<8x64x640xbf16> to vector<512x640xbf16>
    %c0_8 = arith.constant 0 : index
    %c0_9 = arith.constant 0 : index
    %21 = vector.load %arg5[%c0_8, %c0_9] : memref<640x256xbf16, #tpu.memory_space<vmem>>, vector<640x256xbf16>
    %cst_10 = arith.constant dense<0.000000e+00> : vector<512x256xf32>
    %22 = tpu.matmul %20, %21, %cst_10 {dimension_numbers = #tpu.dot_dimension_numbers<[1], [0], [0], [1], [0, 0, 1, 1], [], []>} : vector<512x640xbf16>, vector<640x256xbf16>, vector<512x256xf32> -> vector<512x256xf32>
    %c0_11 = arith.constant 0 : index
    %c0_12 = arith.constant 0 : index
    %23 = vector.load %arg6[%c0_11, %c0_12] : memref<1x256xf32, #tpu.memory_space<vmem>>, vector<1x256xf32>
    %24 = vector.broadcast %23 : vector<1x256xf32> to vector<512x256xf32>
    %25 = arith.mulf %22, %24 : vector<512x256xf32>
    %c0_13 = arith.constant 0 : index
    %c0_14 = arith.constant 0 : index
    %26 = vector.load %arg7[%c0_13, %c0_14] : memref<1x256xf32, #tpu.memory_space<vmem>>, vector<1x256xf32>
    %27 = vector.broadcast %26 : vector<1x256xf32> to vector<512x256xf32>
    %28 = arith.addf %25, %27 : vector<512x256xf32>
    %cst_15 = arith.constant 0.000000e+00 : f32
    %29 = vector.broadcast %cst_15 : f32 to vector<512x256xf32>
    %30 = arith.maximumf %28, %29 : vector<512x256xf32>
    %31 = arith.truncf %30 : vector<512x256xf32> to vector<512x256xbf16>
    %32 = vector.shape_cast %31 : vector<512x256xbf16> to vector<8x64x256xbf16>
    %33 = vector.extract_strided_slice %32 {offsets = [0, 0, 0], sizes = [8, 56, 256], strides = [1, 1, 1]} : vector<8x64x256xbf16> to vector<8x56x256xbf16>
    %34 = vector.extract_strided_slice %32 {offsets = [0, 1, 0], sizes = [8, 56, 256], strides = [1, 1, 1]} : vector<8x64x256xbf16> to vector<8x56x256xbf16>
    %35 = vector.extract_strided_slice %32 {offsets = [0, 2, 0], sizes = [8, 56, 256], strides = [1, 1, 1]} : vector<8x64x256xbf16> to vector<8x56x256xbf16>
    %36 = tpu.concatenate %33, %34, %35 in 2 : vector<8x56x256xbf16>, vector<8x56x256xbf16>, vector<8x56x256xbf16> -> vector<8x56x768xbf16>
    %37 = vector.shape_cast %36 : vector<8x56x768xbf16> to vector<448x768xbf16>
    %c0_16 = arith.constant 0 : index
    %c0_17 = arith.constant 0 : index
    %38 = vector.load %arg8[%c0_16, %c0_17] : memref<768x128xbf16, #tpu.memory_space<vmem>>, vector<768x128xbf16>
    %cst_18 = arith.constant dense<0.000000e+00> : vector<448x128xf32>
    %39 = tpu.matmul %37, %38, %cst_18 {dimension_numbers = #tpu.dot_dimension_numbers<[1], [0], [0], [1], [0, 0, 1, 1], [], []>} : vector<448x768xbf16>, vector<768x128xbf16>, vector<448x128xf32> -> vector<448x128xf32>
    %c0_19 = arith.constant 0 : index
    %c0_20 = arith.constant 0 : index
    %40 = vector.load %arg9[%c0_19, %c0_20] : memref<1x128xf32, #tpu.memory_space<vmem>>, vector<1x128xf32>
    %41 = vector.broadcast %40 : vector<1x128xf32> to vector<448x128xf32>
    %42 = arith.mulf %39, %41 : vector<448x128xf32>
    %c0_21 = arith.constant 0 : index
    %c0_22 = arith.constant 0 : index
    %43 = vector.load %arg10[%c0_21, %c0_22] : memref<1x128xf32, #tpu.memory_space<vmem>>, vector<1x128xf32>
    %44 = vector.broadcast %43 : vector<1x128xf32> to vector<448x128xf32>
    %45 = arith.addf %42, %44 : vector<448x128xf32>
    %cst_23 = arith.constant 0.000000e+00 : f32
    %46 = vector.broadcast %cst_23 : f32 to vector<448x128xf32>
    %47 = arith.maximumf %45, %46 : vector<448x128xf32>
    %48 = vector.shape_cast %47 : vector<448x128xf32> to vector<8x56x128xf32>
    %49 = tpu.iota {dimensions = array<i32: 1>} : vector<8x56x128xi32>
    %c51_i32 = arith.constant 51 : i32
    %50 = vector.broadcast %c51_i32 : i32 to vector<8x56x128xi32>
    %51 = arith.cmpi slt, %49, %50 : vector<8x56x128xi32>
    %cst_24 = arith.constant 0.000000e+00 : f32
    %52 = vector.broadcast %cst_24 : f32 to vector<8x56x128xf32>
    %53 = arith.select %51, %48, %52 : vector<8x56x128xi1>, vector<8x56x128xf32>
    %cst_25 = arith.constant dense<0.000000e+00> : vector<8x128xf32>
    %54 = vector.multi_reduction <add>, %53, %cst_25 [1] : vector<8x56x128xf32> to vector<8x128xf32>
    %cst_26 = arith.constant 0.0196078438 : f32
    %55 = vector.broadcast %cst_26 : f32 to vector<8x128xf32>
    %56 = arith.mulf %54, %55 : vector<8x128xf32>
    %57 = arith.truncf %56 : vector<8x128xf32> to vector<8x128xbf16>
    %c0_27 = arith.constant 0 : index
    %c0_28 = arith.constant 0 : index
    %58 = vector.load %arg11[%c0_27, %c0_28] : memref<128x128xbf16, #tpu.memory_space<vmem>>, vector<128x128xbf16>
    %cst_29 = arith.constant dense<0.000000e+00> : vector<8x128xf32>
    %59 = tpu.matmul %57, %58, %cst_29 {dimension_numbers = #tpu.dot_dimension_numbers<[1], [0], [0], [1], [0, 0, 1, 1], [], []>} : vector<8x128xbf16>, vector<128x128xbf16>, vector<8x128xf32> -> vector<8x128xf32>
    %c0_30 = arith.constant 0 : index
    %c0_31 = arith.constant 0 : index
    %60 = vector.load %arg12[%c0_30, %c0_31] : memref<1x128xf32, #tpu.memory_space<vmem>>, vector<1x128xf32>
    %61 = vector.broadcast %60 : vector<1x128xf32> to vector<8x128xf32>
    %62 = arith.addf %59, %61 : vector<8x128xf32>
    %c0_32 = arith.constant 0 : index
    %c0_33 = arith.constant 0 : index
    %63 = vector.load %arg13[%c0_32, %c0_33] : memref<8x128xf32, #tpu.memory_space<vmem>>, vector<8x128xf32>
    tpu.vector_store %arg13[%c0_32, %c0_33], %62 {strides = array<i32>} : memref<8x128xf32, #tpu.memory_space<vmem>>, vector<8x128xf32>,
    return
  }
  func.func @transform_0(%arg0: i32) -> (i32, i32) {
    %c0_i32 = arith.constant 0 : i32
    %c0_i32_0 = arith.constant 0 : i32
    return %arg0, %c0_i32 : i32, i32
  }
  func.func @transform_1(%arg0: i32) -> (i32, i32) {
    %c0_i32 = arith.constant 0 : i32
    %c0_i32_0 = arith.constant 0 : i32
    %c0_i32_1 = arith.constant 0 : i32
    return %c0_i32, %c0_i32_0 : i32, i32
  }
  func.func @transform_2(%arg0: i32) -> (i32, i32) {
    %c0_i32 = arith.constant 0 : i32
    %c0_i32_0 = arith.constant 0 : i32
    %c0_i32_1 = arith.constant 0 : i32
    return %c0_i32, %c0_i32_0 : i32, i32
  }
  func.func @transform_3(%arg0: i32) -> (i32, i32) {
    %c0_i32 = arith.constant 0 : i32
    %c0_i32_0 = arith.constant 0 : i32
    %c0_i32_1 = arith.constant 0 : i32
    return %c0_i32, %c0_i32_0 : i32, i32
  }
  func.func @transform_4(%arg0: i32) -> (i32, i32) {
    %c0_i32 = arith.constant 0 : i32
    %c0_i32_0 = arith.constant 0 : i32
    %c0_i32_1 = arith.constant 0 : i32
    return %c0_i32, %c0_i32_0 : i32, i32
  }
  func.func @transform_5(%arg0: i32) -> (i32, i32) {
    %c0_i32 = arith.constant 0 : i32
    %c0_i32_0 = arith.constant 0 : i32
    %c0_i32_1 = arith.constant 0 : i32
    return %c0_i32, %c0_i32_0 : i32, i32
  }
  func.func @transform_6(%arg0: i32) -> (i32, i32) {
    %c0_i32 = arith.constant 0 : i32
    %c0_i32_0 = arith.constant 0 : i32
    %c0_i32_1 = arith.constant 0 : i32
    return %c0_i32, %c0_i32_0 : i32, i32
  }
  func.func @transform_7(%arg0: i32) -> (i32, i32) {
    %c0_i32 = arith.constant 0 : i32
    %c0_i32_0 = arith.constant 0 : i32
    %c0_i32_1 = arith.constant 0 : i32
    return %c0_i32, %c0_i32_0 : i32, i32
  }
  func.func @transform_8(%arg0: i32) -> (i32, i32) {
    %c0_i32 = arith.constant 0 : i32
    %c0_i32_0 = arith.constant 0 : i32
    %c0_i32_1 = arith.constant 0 : i32
    return %c0_i32, %c0_i32_0 : i32, i32
  }
  func.func @transform_9(%arg0: i32) -> (i32, i32) {
    %c0_i32 = arith.constant 0 : i32
    %c0_i32_0 = arith.constant 0 : i32
    %c0_i32_1 = arith.constant 0 : i32
    return %c0_i32, %c0_i32_0 : i32, i32
  }
  func.func @transform_10(%arg0: i32) -> (i32, i32) {
    %c0_i32 = arith.constant 0 : i32
    %c0_i32_0 = arith.constant 0 : i32
    %c0_i32_1 = arith.constant 0 : i32
    return %c0_i32, %c0_i32_0 : i32, i32
  }
  func.func @transform_11(%arg0: i32) -> (i32, i32) {
    %c0_i32 = arith.constant 0 : i32
    %c0_i32_0 = arith.constant 0 : i32
    %c0_i32_1 = arith.constant 0 : i32
    return %c0_i32, %c0_i32_0 : i32, i32
  }
  func.func @transform_12(%arg0: i32) -> (i32, i32) {
    %c0_i32 = arith.constant 0 : i32
    %c0_i32_0 = arith.constant 0 : i32
    return %arg0, %c0_i32 : i32, i32
  }
}

</mosaic_0001>

<bundles_post_ra>
// kernel: tpu_custom_call.1
= control target key start
LH: loop header
LB: loop body
LE: loop exit
PB: predicated region body
PF: predicated region fallthrough
CT: control target
= control target key end

     0   :  { %17 = vsyncpa [#allocation3], 0  ;;  %s10590_s0 = inlined_call_operand.vmem [shape: f32[576,8], index: 0, kind: input, shape index: {}]   ;;  %s10591_s1 = inlined_call_operand.vmem [shape: bf16[8,128], index: 1, kind: input, shape index: {}]   ;;  %s10592_s2 = inlined_call_operand.vmem [shape: f32[1,128], index: 2, kind: input, shape index: {}]   ;;  %s10593_s3 = inlined_call_operand.vmem [shape: f32[1,128], index: 3, kind: input, shape index: {}]   ;;  %s10594_s4 = inlined_call_operand.hbm [shape: bf16[640,256], index: 4, kind: input, shape index: {}]   ;;  %s10595_s5 = inlined_call_operand.vmem [shape: f32[1,256], index: 5, kind: input, shape index: {}]   ;;  %s10596_s6 = inlined_call_operand.vmem [shape: f32[1,256], index: 6, kind: input, shape index: {}]   ;;  %s10597_s7 = inlined_call_operand.vmem [shape: bf16[768,128], index: 7, kind: input, shape index: {}]   ;;  %s10598_s8 = inlined_call_operand.vmem [shape: f32[1,128], index: 8, kind: input, shape index: {}]   ;;  %s10599_s9 = inlined_call_operand.vmem [shape: f32[1,128], index: 9, kind: input, shape index: {}]   ;;  %s10600_s10 = inlined_call_operand.vmem [shape: bf16[128,128], index: 10, kind: input, shape index: {}]   ;;  %s10601_s11 = inlined_call_operand.vmem [shape: f32[1,128], index: 11, kind: input, shape index: {}]   ;;  %s10602_s12 = inlined_call_operand.hbm [shape: f32[8,128], index: 12, kind: output, shape index: {}]  }
   0x1   :  { %18 = vsyncpa [#allocation4], 0  ;;  %s7891_s21 = smov [#allocation2]   ;;  %s7843_s25 = scalar_lea.hbm %s10594_s4, 10240 }
   0x2   :  { %s32_s22 = sshll.u32 %s7891_s21, 4  ;;  %p7844_p0 = scmp.ne.s32.totalorder %s10594_s4, %s7843_s25  ;;  %s33_s22 = int_to_ptr.vmem [resolvable:$true] %s32_s22 }
   0x3   :  { %p7847_p1 = scmp.lt.u32.totalorder %s7843_s25, %s10594_s4 }
   0x5   :  { %p7849_p2 = pnand %p7847_p1, %p7844_p0 }
   0x7   :  { %7852 = shalt.err (!%p7849_p2)
}
   0x8   :  { %s7853_s30 = scalar_lea.vmem %s33_s22, 10240  ;;  %p7858_p4 = scmp.lt.s32.totalorder %s33_s22, %s33_s22 }
   0x9   :  { %p7854_p3 = scmp.ne.s32.totalorder %s33_s22, %s7853_s30  ;;  %p7859_p5 = scmp.lt.s32.totalorder %s7853_s30, %s7853_s30 }
   0xb   :  { %p7860_p6 = por %p7859_p5, %p7858_p4 }
   0xd   :  { %p7861_p7 = pnand %p7860_p6, %p7854_p3 }
   0xf   :  { %7864 = shalt.err (!%p7861_p7)
}
  0x10   :  { %s7892_s13 = smov 128   ;;  %s7893_s14 = smov 8  }
  0x11   :  { %38 = dma.hbm_to_vmem [thread:$0]  %s10594_s4, 10240, %s33_s22, [#allocation3], %s7892_s13, %s7892_s13, %s7893_s14  }
  0x12   :  { %7887 = dma.done.wait [#allocation3], 10240  }
  0x13   :  { %7888 = vsyncadd [#allocation3], 4294957056  ;;  %vm275_vm0 = vcmask 1043456   ;;  %v165_v0 = vld [vmem:[%s10591_s1] sm:$0xf]  ;;  %v58_v2 = vld [vmem:[%s10590_s0 + $0x8] sm:$0xff] }
  0x14   :  { %v57_v1 = vld [vmem:[%s10590_s0] sm:$0xff]  ;;  %vm166_vm1 = vcmask 64512   ;;  %7657 = vmatprep.subr.msk.bf16.mxu0 %vm275_vm0, %v165_v0  ;;  %v277_v3 = vsel %vm275_vm0, %v165_v0, 0  ;;  %v59_v5 = vld [vmem:[%s10590_s0 + $0x10] sm:$0xff]  ;;  %v60_v6 = vld [vmem:[%s10590_s0 + $0x18] sm:$0xff]  ;;  %vm1367_vm4 = vcmask 1046528  }
  0x15   :  { %v129_v4 = vpack.c.bf16 %v58_v2, %v57_v1  ;;  %v61_v7 = vld [vmem:[%s10590_s0 + $0x20] sm:$0xff]  ;;  %7084 = vmatpush3.bf16.msra.mxu0 %v277_v3  ;;  %v130_v8 = vpack.c.bf16 %v60_v6, %v59_v5  ;;  %v62_v9 = vld [vmem:[%s10590_s0 + $0x28] sm:$0xff]  ;;  %v63_v11 = vld [vmem:[%s10590_s0 + $0x30] sm:$0xff]  ;;  %vm1046_vm2 = vsmask.f32 7424  ;;  %vm1673_vm5 = vcmask 1045504  }
  0x16   :  { %v131_v10 = vpack.c.bf16 %v62_v9, %v61_v7  ;;  %v64_v12 = vld [vmem:[%s10590_s0 + $0x38] sm:$0xff]  ;;  %v65_v13 = vld [vmem:[%s10590_s0 + $0x40] sm:$0xff]  ;;  %v66_v14 = vld [vmem:[%s10590_s0 + $0x48] sm:$0xff]  ;;  %vm1472_vm3 = vsmask.f32 6400  ;;  %vm6692_vm7 = vcmask 1041409  }
  0x17   :  { %7085 = vmatprep.mubr.msk.bf16.mxu0 %vm166_vm1, %v129_v4  ;;  %v132_v15 = vpack.c.bf16 %v64_v12, %v63_v11  ;;  %v133_v16 = vpack.c.bf16 %v66_v14, %v65_v13  ;;  %v67_v17 = vld [vmem:[%s10590_s0 + $0x50] sm:$0xff]  ;;  %v68_v18 = vld [vmem:[%s10590_s0 + $0x58] sm:$0xff]  ;;  %v69_v19 = vld [vmem:[%s10590_s0 + $0x60] sm:$0xff]  ;;  %vm6694_vm8 = vcmask 1042434   ;;  %vm7896_vm9 = vmmov 0   ;;  %s7897_s25 = smov [#allocation5]  }
  0x18   :  { %7086 = vmatmul.mubr.msk.bf16.vlgmr.msra.gmra.mrb[0].mxu0 %vm166_vm1, %v130_v8  ;;  %v70_v20 = vld [vmem:[%s10590_s0 + $0x68] sm:$0xff]  ;;  %v134_v21 = vpack.c.bf16 %v68_v18, %v67_v17  ;;  %v71_v24 = vld [vmem:[%s10590_s0 + $0x70] sm:$0xff]  ;;  %v72_v25 = vld [vmem:[%s10590_s0 + $0x78] sm:$0xff]  ;;  %vm6696_vm10 = vcmask 1043459   ;;  %vm6698_vm11 = vcmask 1044484   ;;  %vm6700_vm12 = vcmask 1045509  }
  0x19   :  { %7089 = vmatprep.mubr.msk.bf16.mxu0 %vm166_vm1, %v131_v10  ;;  %v135_v22 = vpack.c.bf16 %v70_v20, %v69_v19  ;;  %v7665_v23 = vld [vmem:[#allocation2 + $0x4] ss:$8 sps:$4 sm:$0xff]   ;;  %v7667_v26 = vld [vmem:[#allocation2] ss:$8 sps:$4 sm:$0xff]   ;;  %v7668_v27 = vld [vmem:[#allocation2 + $0x14] ss:$8 sps:$4 sm:$0xff]   ;;  %v136_v32 = vpack.c.bf16 %v72_v25, %v71_v24 }
  0x1a   :  { %2258 = vmatprep.subr.bf16.mxu1 %v7665_v23  ;;  %v73_v28 = vld [vmem:[%s10590_s0 + $0x80] sm:$0xff]  ;;  %v74_v29 = vld [vmem:[%s10590_s0 + $0x88] sm:$0xff]  ;;  %v7670_v30 = vld [vmem:[#allocation2 + $0x10] ss:$8 sps:$4 sm:$0xff]   ;;  %vm6702_vm13 = vcmask 1046534   ;;  %vm6704_vm14 = vcmask 1047559  }
  0x1b   :  { %2259 = vmatpush1.bf16.msra.mxu1 %v7667_v26  ;;  %v7671_v31 = vld [vmem:[#allocation2 + $0x24] ss:$8 sps:$4 sm:$0xff]   ;;  %v137_v33 = vpack.c.bf16 %v74_v29, %v73_v28  ;;  %v7673_v34 = vld [vmem:[#allocation2 + $0x20] ss:$8 sps:$4 sm:$0xff]   ;;  %v7674_v35 = vld [vmem:[#allocation2 + $0x34] ss:$8 sps:$4 sm:$0xff]  }
  0x1c   :  { %2260 = vmatprep.subr.bf16.mxu1 %v7668_v27  ;;  %v75_v36 = vld [vmem:[%s10590_s0 + $0x90] sm:$0xff]  ;;  %v76_v37 = vld [vmem:[%s10590_s0 + $0x98] sm:$0xff]  ;;  %v77_v38 = vld [vmem:[%s10590_s0 + $0xa0] sm:$0xff] }
  0x1d   :  { %v78_v39 = vld [vmem:[%s10590_s0 + $0xa8] sm:$0xff]  ;;  %v7676_v40 = vld [vmem:[#allocation2 + $0x30] ss:$8 sps:$4 sm:$0xff]   ;;  %v138_v42 = vpack.c.bf16 %v76_v37, %v75_v36  ;;  %v7680_v45 = vld [vmem:[#allocation2 + $0x54] ss:$8 sps:$4 sm:$0xff]  }
  0x1e   :  { %v7677_v41 = vld [vmem:[#allocation2 + $0x44] ss:$8 sps:$4 sm:$0xff]   ;;  %v139_v43 = vpack.c.bf16 %v78_v39, %v77_v38  ;;  %v7679_v44 = vld [vmem:[#allocation2 + $0x40] ss:$8 sps:$4 sm:$0xff]   ;;  %v79_v46 = vld [vmem:[%s10590_s0 + $0xb0] sm:$0xff] }
  0x1f   :  { %2261 = vmatpush1.bf16.msra.mxu1 %v7670_v30  ;;  %v80_v47 = vld [vmem:[%s10590_s0 + $0xb8] sm:$0xff]  ;;  %v81_v48 = vld [vmem:[%s10590_s0 + $0xc0] sm:$0xff]  ;;  %v82_v49 = vld [vmem:[%s10590_s0 + $0xc8] sm:$0xff] }
  0x20   :  { %7090 = vmatmul.mubr.msk.bf16.gmra.mrb[4].mxu0 %vm166_vm1, %v132_v15  ;;  %2262 = vmatprep.subr.bf16.mxu1 %v7671_v31  ;;  %v7682_v50 = vld [vmem:[#allocation2 + $0x50] ss:$8 sps:$4 sm:$0xff]   ;;  %v7683_v51 = vld [vmem:[#allocation2 + $0x64] ss:$8 sps:$4 sm:$0xff]   ;;  %v7685_v52 = vld [vmem:[#allocation2 + $0x60] ss:$8 sps:$4 sm:$0xff]   ;;  %v140_v53 = vpack.c.bf16 %v80_v47, %v79_v46  ;;  %v141_v55 = vpack.c.bf16 %v82_v49, %v81_v48 }
  0x21   :  { %7093 = vmatprep.mubr.msk.bf16.mxu0 %vm166_vm1, %v133_v16  ;;  %v7686_v54 = vld [vmem:[#allocation2 + $0x74] ss:$8 sps:$4 sm:$0xff]   ;;  %v7688_v58 = vld [vmem:[#allocation2 + $0x70] ss:$8 sps:$4 sm:$0xff]   ;;  %v85_v59 = vld [vmem:[%s10590_s0 + $0xe0] sm:$0xff] }
  0x22   :  { %v83_v56 = vld [vmem:[%s10590_s0 + $0xd0] sm:$0xff]  ;;  %v84_v57 = vld [vmem:[%s10590_s0 + $0xd8] sm:$0xff]  ;;  %v86_v60 = vld [vmem:[%s10590_s0 + $0xe8] sm:$0xff] }
  0x23   :  { %2263 = vmatpush1.bf16.msra.mxu1 %v7673_v34  ;;  %v7689_v61 = vld [vmem:[#allocation2 + $0x84] ss:$8 sps:$4 sm:$0xff]   ;;  %v7691_v62 = vld [vmem:[#allocation2 + $0x80] ss:$8 sps:$4 sm:$0xff]   ;;  %v142_v63 = vpack.c.bf16 %v84_v57, %v83_v56  ;;  %v7692_v0 = vld [vmem:[#allocation2 + $0x94] ss:$8 sps:$4 sm:$0xff]   ;;  %v143_v1 = vpack.c.bf16 %v86_v60, %v85_v59 }
  0x24   :  { %2264 = vmatprep.subr.bf16.mxu1 %v7674_v35  ;;  %v87_v2 = vld [vmem:[%s10590_s0 + $0xf0] sm:$0xff]  ;;  %v88_v3 = vld [vmem:[%s10590_s0 + $0xf8] sm:$0xff]  ;;  %v89_v5 = vld [vmem:[%s10590_s0 + $0x100] sm:$0xff] }
  0x25   :  { %v7694_v4 = vld [vmem:[#allocation2 + $0x90] ss:$8 sps:$4 sm:$0xff]   ;;  %v90_v6 = vld [vmem:[%s10590_s0 + $0x108] sm:$0xff]  ;;  %v144_v9 = vpack.c.bf16 %v88_v3, %v87_v2  ;;  %v7698_v10 = vld [vmem:[#allocation2 + $0xb4] ss:$8 sps:$4 sm:$0xff]  }
  0x26   :  { %v7695_v7 = vld [vmem:[#allocation2 + $0xa4] ss:$8 sps:$4 sm:$0xff]   ;;  %v7697_v8 = vld [vmem:[#allocation2 + $0xa0] ss:$8 sps:$4 sm:$0xff]   ;;  %v145_v11 = vpack.c.bf16 %v90_v6, %v89_v5  ;;  %v91_v12 = vld [vmem:[%s10590_s0 + $0x110] sm:$0xff] }
  0x27   :  { %2265 = vmatpush1.bf16.msra.mxu1 %v7676_v40  ;;  %v92_v13 = vld [vmem:[%s10590_s0 + $0x118] sm:$0xff]  ;;  %v93_v14 = vld [vmem:[%s10590_s0 + $0x120] sm:$0xff]  ;;  %v94_v15 = vld [vmem:[%s10590_s0 + $0x128] sm:$0xff] }
  0x28   :  { %7094 = vmatmul.mubr.msk.bf16.gmra.mrb[8].mxu0 %vm166_vm1, %v134_v21  ;;  %2266 = vmatprep.subr.bf16.mxu1 %v7677_v41  ;;  %v146_v16 = vpack.c.bf16 %v92_v13, %v91_v12  ;;  %v147_v17 = vpack.c.bf16 %v94_v15, %v93_v14  ;;  %v95_v18 = vld [vmem:[%s10590_s0 + $0x130] sm:$0xff]  ;;  %v96_v19 = vld [vmem:[%s10590_s0 + $0x138] sm:$0xff]  ;;  %v97_v20 = vld [vmem:[%s10590_s0 + $0x140] sm:$0xff] }
  0x29   :  { %7097 = vmatprep.mubr.msk.bf16.mxu0 %vm166_vm1, %v135_v22  ;;  %v98_v21 = vld [vmem:[%s10590_s0 + $0x148] sm:$0xff]  ;;  %v148_v22 = vpack.c.bf16 %v96_v19, %v95_v18  ;;  %v99_v24 = vld [vmem:[%s10590_s0 + $0x150] sm:$0xff]  ;;  %v100_v25 = vld [vmem:[%s10590_s0 + $0x158] sm:$0xff] }
  0x2a   :  { %v149_v23 = vpack.c.bf16 %v98_v21, %v97_v20  ;;  %v101_v26 = vld [vmem:[%s10590_s0 + $0x160] sm:$0xff]  ;;  %v102_v27 = vld [vmem:[%s10590_s0 + $0x168] sm:$0xff]  ;;  %v150_v28 = vpack.c.bf16 %v100_v25, %v99_v24  ;;  %v103_v30 = vld [vmem:[%s10590_s0 + $0x170] sm:$0xff] }
  0x2b   :  { %2267 = vmatpush1.bf16.msra.mxu1 %v7679_v44  ;;  %v151_v29 = vpack.c.bf16 %v102_v27, %v101_v26  ;;  %v104_v31 = vld [vmem:[%s10590_s0 + $0x178] sm:$0xff]  ;;  %v7701_v37 = vld [vmem:[#allocation2 + $0xc4] ss:$8 sps:$4 sm:$0xff]   ;;  %v7703_v38 = vld [vmem:[#allocation2 + $0xc0] ss:$8 sps:$4 sm:$0xff]  }
  0x2c   :  { %2268 = vmatprep.subr.bf16.mxu1 %v7680_v45  ;;  %v7700_v34 = vld [vmem:[#allocation2 + $0xb0] ss:$8 sps:$4 sm:$0xff]   ;;  %v152_v35 = vpack.c.bf16 %v104_v31, %v103_v30  ;;  %v109_v41 = vld [vmem:[%s10590_s0 + $0x1a0] sm:$0xff]  ;;  %v118_v60 = vld [vmem:[%s10590_s0 + $0x1e8] sm:$0xff] }
  0x2d   :  { %v107_v39 = vld [vmem:[%s10590_s0 + $0x190] sm:$0xff]  ;;  %v108_v40 = vld [vmem:[%s10590_s0 + $0x198] sm:$0xff]  ;;  %v7707_v47 = vld [vmem:[#allocation2 + $0xe4] ss:$8 sps:$4 sm:$0xff]  }
  0x2e   :  { %v7706_v44 = vld [vmem:[#allocation2 + $0xd0] ss:$8 sps:$4 sm:$0xff]   ;;  %v154_v45 = vpack.c.bf16 %v108_v40, %v107_v39  ;;  %v7709_v48 = vld [vmem:[#allocation2 + $0xe0] ss:$8 sps:$4 sm:$0xff]  }
  0x2f   :  { %2269 = vmatpush1.bf16.msra.mxu1 %v7682_v50  ;;  %v111_v49 = vld [vmem:[%s10590_s0 + $0x1b0] sm:$0xff]  ;;  %v112_v50 = vld [vmem:[%s10590_s0 + $0x1b8] sm:$0xff]  ;;  %v117_v59 = vld [vmem:[%s10590_s0 + $0x1e0] sm:$0xff] }
  0x30   :  { %7098 = vmatmul.mubr.msk.bf16.gmra.mrb[12].mxu0 %vm166_vm1, %v136_v32  ;;  %2270 = vmatprep.subr.bf16.mxu1 %v7683_v51  ;;  %v105_v32 = vld [vmem:[%s10590_s0 + $0x180] sm:$0xff]  ;;  %v7710_v51 = vld [vmem:[#allocation2 + $0xf4] ss:$8 sps:$4 sm:$0xff]   ;;  %v122_v3 = vld [vmem:[%s10590_s0 + $0x208] sm:$0xff] }
  0x31   :  { %7101 = vmatprep.mubr.msk.bf16.mxu0 %vm166_vm1, %v137_v33  ;;  %v106_v33 = vld [vmem:[%s10590_s0 + $0x188] sm:$0xff]  ;;  %v115_v57 = vld [vmem:[%s10590_s0 + $0x1d0] sm:$0xff]  ;;  %v121_v2 = vld [vmem:[%s10590_s0 + $0x200] sm:$0xff] }
  0x32   :  { %v153_v36 = vpack.c.bf16 %v106_v33, %v105_v32  ;;  %v161_v5 = vpack.c.bf16 %v122_v3, %v121_v2  ;;  %v123_v6 = vld [vmem:[%s10590_s0 + $0x210] sm:$0xff]  ;;  %v128_v13 = vld [vmem:[%s10590_s0 + $0x238] sm:$0xff]  ;;  %v8233_v15 = vld [vmem:[%s10592_s2] ss:$0 sm:$0xff] }
  0x33   :  { %2271 = vmatpush1.bf16.msra.mxu1 %v7685_v52  ;;  %v113_v52 = vld [vmem:[%s10590_s0 + $0x1c0] sm:$0xff]  ;;  %v127_v12 = vld [vmem:[%s10590_s0 + $0x230] sm:$0xff] }
  0x34   :  { %2272 = vmatprep.subr.bf16.mxu1 %v7686_v54  ;;  %v7712_v54 = vld [vmem:[#allocation2 + $0xf0] ss:$8 sps:$4 sm:$0xff]   ;;  %v164_v14 = vpack.c.bf16 %v128_v13, %v127_v12  ;;  %v7713_v2 = vld [vmem:[#allocation2 + $0x100] ss:$8 sps:$4 sm:$0xff]  }
  0x37   :  { %2273 = vmatpush1.bf16.msra.mxu1 %v7688_v58  ;;  %v116_v58 = vld [vmem:[%s10590_s0 + $0x1d8] sm:$0xff] }
  0x38   :  { %7102 = vmatmul.mubr.msk.bf16.gmra.mrb[16].mxu0 %vm166_vm1, %v138_v42  ;;  %2274 = vmatprep.subr.bf16.mxu1 %v7689_v61  ;;  %v110_v42 = vld [vmem:[%s10590_s0 + $0x1a8] sm:$0xff]  ;;  %v158_v61 = vpack.c.bf16 %v116_v58, %v115_v57 }
  0x39   :  { %7105 = vmatprep.mubr.msk.bf16.mxu0 %vm166_vm1, %v139_v43  ;;  %v7704_v43 = vld [vmem:[#allocation2 + $0xd4] ss:$8 sps:$4 sm:$0xff]   ;;  %v155_v46 = vpack.c.bf16 %v110_v42, %v109_v41 }
  0x3b   :  { %2275 = vmatpush1.bf16.msra.mxu1 %v7691_v62  ;;  %v159_v62 = vpack.c.bf16 %v118_v60, %v117_v59 }
  0x3c   :  { %2276 = vmatprep.subr.bf16.mxu1 %v7692_v0  ;;  %v119_v0 = vld [vmem:[%s10590_s0 + $0x1f0] sm:$0xff] }
  0x3f   :  { %2277 = vmatpush1.bf16.msra.mxu1 %v7694_v4 }
  0x40   :  { %7106 = vmatmul.mubr.msk.bf16.gmra.mrb[20].mxu0 %vm166_vm1, %v140_v53  ;;  %2278 = vmatprep.subr.bf16.mxu1 %v7695_v7  ;;  %v114_v53 = vld [vmem:[%s10590_s0 + $0x1c8] sm:$0xff]  ;;  %v124_v7 = vld [vmem:[%s10590_s0 + $0x218] sm:$0xff] }
  0x41   :  { %7109 = vmatprep.mubr.msk.bf16.mxu0 %vm166_vm1, %v141_v55  ;;  %v156_v55 = vpack.c.bf16 %v112_v50, %v111_v49  ;;  %v157_v56 = vpack.c.bf16 %v114_v53, %v113_v52 }
  0x43   :  { %2279 = vmatpush1.bf16.msra.mxu1 %v7697_v8  ;;  %v125_v8 = vld [vmem:[%s10590_s0 + $0x220] sm:$0xff] }
  0x44   :  { %2280 = vmatprep.subr.bf16.mxu1 %v7698_v10  ;;  %v162_v10 = vpack.c.bf16 %v124_v7, %v123_v6 }
  0x47   :  { %2281 = vmatpush1.bf16.msra.mxu1 %v7700_v34 }
  0x48   :  { %7110 = vmatmul.mubr.msk.bf16.gmra.mrb[24].mxu0 %vm166_vm1, %v142_v63  ;;  %2282 = vmatprep.subr.bf16.mxu1 %v7701_v37  ;;  %v7715_v63 = vld [vmem:[#allocation2 + $0x104] ss:$8 sps:$4 sm:$0xff]  }
  0x49   :  { %7113 = vmatprep.mubr.msk.bf16.mxu0 %vm166_vm1, %v143_v1  ;;  %v120_v1 = vld [vmem:[%s10590_s0 + $0x1f8] sm:$0xff] }
  0x4a   :  { %v160_v4 = vpack.c.bf16 %v120_v1, %v119_v0 }
  0x4b   :  { %2283 = vmatpush1.bf16.msra.mxu1 %v7703_v38 }
  0x4c   :  { %2284 = vmatprep.subr.bf16.mxu1 %v7704_v43 }
  0x4f   :  { %2285 = vmatpush1.bf16.msra.mxu1 %v7706_v44 }
  0x50   :  { %7114 = vmatmul.mubr.msk.bf16.gmra.mrb[28].mxu0 %vm166_vm1, %v144_v9  ;;  %2286 = vmatprep.subr.bf16.mxu1 %v7707_v47  ;;  %v126_v9 = vld [vmem:[%s10590_s0 + $0x228] sm:$0xff]  ;;  %s6803_s0 = sshll.u32 %s7897_s25, 4  ;;  %s6804_s0 = int_to_ptr.vmem [resolvable:$true] %s6803_s0 }
  0x51   :  { %7117 = vmatprep.mubr.msk.bf16.mxu0 %vm166_vm1, %v145_v11  ;;  %v163_v11 = vpack.c.bf16 %v126_v9, %v125_v8  ;;  %v7718_v8 = vld [vmem:[#allocation2 + $0x114] ss:$8 sps:$4 sm:$0xff]   ;;  %s7865_s1 = scalar_lea.vmem %s6804_s0, 128  ;;  %p7870_p9 = scmp.lt.s32.totalorder %s6804_s0, %s6804_s0 }
  0x52   :  { %p7866_p8 = scmp.ne.s32.totalorder %s6804_s0, %s7865_s1  ;;  %p7871_p10 = scmp.lt.s32.totalorder %s7865_s1, %s7865_s1 }
  0x53   :  { %2287 = vmatpush1.bf16.msra.mxu1 %v7709_v48 }
  0x54   :  { %2288 = vmatprep.subr.bf16.mxu1 %v7710_v51  ;;  %p7872_p11 = por %p7871_p10, %p7870_p9 }
  0x56   :  { %p7873_p12 = pnand %p7872_p11, %p7866_p8 }
  0x57   :  { %2289 = vmatpush1.bf16.msra.mxu1 %v7712_v54 }
  0x58   :  { %7118 = vmatmul.mubr.msk.bf16.gmra.mrb[32].mxu0 %vm166_vm1, %v146_v16  ;;  %2611 = vmatprep.subr.bf16.mxu1 %v7715_v63 }
  0x59   :  { %7121 = vmatprep.mubr.msk.bf16.mxu0 %vm166_vm1, %v147_v17  ;;  %v8238_v17 = vld [vmem:[%s10593_s3] ss:$0 sm:$0xff] }
  0x60   :  { %7122 = vmatmul.mubr.msk.bf16.gmra.mrb[36].mxu0 %vm166_vm1, %v148_v22 }
  0x61   :  { %7125 = vmatprep.mubr.msk.bf16.mxu0 %vm166_vm1, %v149_v23 }
  0x68   :  { %7126 = vmatmul.mubr.msk.bf16.gmra.mrb[40].mxu0 %vm166_vm1, %v150_v28 }
  0x69   :  { %7129 = vmatprep.mubr.msk.bf16.mxu0 %vm166_vm1, %v151_v29 }
  0x70   :  { %7130 = vmatmul.mubr.msk.bf16.gmra.mrb[44].mxu0 %vm166_vm1, %v152_v35 }
  0x71   :  { %7133 = vmatprep.mubr.msk.bf16.mxu0 %vm166_vm1, %v153_v36 }
  0x78   :  { %7134 = vmatmul.mubr.msk.bf16.gmra.mrb[48].mxu0 %vm166_vm1, %v154_v45 }
  0x79   :  { %7137 = vmatprep.mubr.msk.bf16.mxu0 %vm166_vm1, %v155_v46 }
  0x80   :  { %7138 = vmatmul.mubr.msk.bf16.gmra.mrb[52].mxu0 %vm166_vm1, %v156_v55 }
  0x81   :  { %7141 = vmatprep.mubr.msk.bf16.mxu0 %vm166_vm1, %v157_v56 }
  0x88   :  { %7142 = vmatmul.mubr.msk.bf16.gmra.mrb[56].mxu0 %vm166_vm1, %v158_v61 }
  0x89   :  { %7145 = vmatprep.mubr.msk.bf16.mxu0 %vm166_vm1, %v159_v62 }
  0x90   :  { %7146 = vmatmul.mubr.msk.bf16.gmra.mrb[60].mxu0 %vm166_vm1, %v160_v4 }
  0x91   :  { %7149 = vmatprep.mubr.msk.bf16.mxu0 %vm166_vm1, %v161_v5 }
  0x98   :  { %7150 = vmatmul.mubr.msk.bf16.gmra.mrb[64].mxu0 %vm166_vm1, %v162_v10 }
  0x99   :  { %7153 = vmatprep.mubr.msk.bf16.mxu0 %vm166_vm1, %v163_v11 }
  0xa0   :  { %7154 = vmatmul.mubr.msk.bf16.gmra.mrb[68].mxu0 %vm166_vm1, %v164_v14 }
  0xeb   :  { %v7087_v16 = vpop.f32.mrb[0].mxu0 }
  0xec   :  { %v609_v18 = vmul.f32 %v7087_v16, %v8233_v15  ;;  %v313_v19 = vpop.f32.mrb[1].mxu0 }
  0xed   :  { %v607_v20 = vmul.f32 %v8233_v15, %v313_v19  ;;  %v7088_v21 = vpop.f32.mrb[2].mxu0 }
  0xee   :  { %v688_v22 = vadd.f32 %v8238_v17, %v609_v18  ;;  %v610_v23 = vmul.f32 %v7088_v21, %v8233_v15  ;;  %v316_v24 = vpop.f32.mrb[3].mxu0 }
  0xef   :  { %v686_v25 = vadd.f32 %v8238_v17, %v607_v20  ;;  %v608_v26 = vmul.f32 %v8233_v15, %v316_v24 }
  0xf0   :  { %v689_v27 = vadd.f32 %v8238_v17, %v610_v23  ;;  %v760_v29 = vmax.f32 %v688_v22, 0.0  ;;  %v7716_v22 = vld [vmem:[#allocation2 + $0x110] ss:$8 sps:$4 sm:$0xff]  }
  0xf1   :  { %v687_v28 = vadd.f32 %v8238_v17, %v608_v26  ;;  %v758_v31 = vmax.f32 %v686_v25, 0.0 }
  0xf2   :  { %v761_v30 = vmax.f32 %v689_v27, 0.0 }
  0xf3   :  { %v759_v32 = vmax.f32 %v687_v28, 0.0  ;;  %v7091_v33 = vpop.f32.mrb[4].mxu0  ;;  %v7721_v28 = vld [vmem:[#allocation2 + $0x124] ss:$8 sps:$4 sm:$0xff]  }
  0xf4   :  { %v8248_v34 = vpack.c.bf16 %v761_v30, %v760_v29  ;;  %v613_v35 = vmul.f32 %v7091_v33, %v8233_v15  ;;  %v329_v36 = vpop.f32.mrb[5].mxu0 }
  0xf5   :  { %v8251_v37 = vpack.c.bf16 %v759_v32, %v758_v31  ;;  %v611_v38 = vmul.f32 %v8233_v15, %v329_v36  ;;  %v7092_v39 = vpop.f32.mrb[6].mxu0 }
  0xf6   :  { %v692_v40 = vadd.f32 %v8238_v17, %v613_v35  ;;  %v614_v41 = vmul.f32 %v7092_v39, %v8233_v15  ;;  %v332_v42 = vpop.f32.mrb[7].mxu0  ;;  %v1055_v43 = vshll.u32 %v8248_v34, 16  ;;  %v1059_v44 = vshrl.u32 %v8248_v34, 16 }
  0xf7   :  { %v690_v45 = vadd.f32 %v8238_v17, %v611_v38  ;;  %v612_v46 = vmul.f32 %v8233_v15, %v332_v42  ;;  %v1048_v47 = vshrl.u32 %v8251_v37, 16  ;;  %v1050_v48 = vshll.u32 %v8251_v37, 16  ;;  %v7719_v42 = vld [vmem:[#allocation2 + $0x120] ss:$8 sps:$4 sm:$0xff]  }
  0xf8   :  { %v764_v49 = vmax.f32 %v692_v40, 0.0  ;;  %v693_v50 = vadd.f32 %v8238_v17, %v614_v41  ;;  %v1476_v57 = vrot.slane %v1059_v44, 1  ;;  %v1057_v61 = vrot.slane %v1055_v43, 1 }
  0xf9   :  { %v762_v51 = vmax.f32 %v690_v45, 0.0  ;;  %v691_v52 = vadd.f32 %v8238_v17, %v612_v46  ;;  %v1052_v53 = vrot.slane %v1050_v48, 1  ;;  %v1473_v54 = vrot.slane %v1048_v47, 1 }
  0xfa   :  { %v765_v55 = vmax.f32 %v693_v50, 0.0  ;;  %v1474_v56 = vrot.slane %v1050_v48, 2  ;;  %v1477_v62 = vrot.slane %v1055_v43, 2  ;;  %v1061_v21 = vor.u32 %v1059_v44, %v1057_v61 }
  0xfb   :  { %v763_v58 = vmax.f32 %v691_v52, 0.0  ;;  %v7095_v59 = vpop.f32.mrb[8].mxu0  ;;  %v1053_v60 = vor.u32 %v1052_v53, %v1048_v47 }
  0xfc   :  { %v8264_v63 = vpack.c.bf16 %v765_v55, %v764_v49  ;;  %v617_v0 = vmul.f32 %v7095_v59, %v8233_v15  ;;  %v345_v1 = vpop.f32.mrb[9].mxu0  ;;  %v1475_v3 = vor.u32 %v1474_v56, %v1473_v54  ;;  %v1478_v9 = vor.u32 %v1477_v62, %v1476_v57  ;;  %v7724_v49 = vld [vmem:[#allocation2 + $0x134] ss:$8 sps:$4 sm:$0xff]  }
  0xfd   :  { %v8267_v4 = vpack.c.bf16 %v763_v58, %v762_v51  ;;  %v615_v5 = vmul.f32 %v8233_v15, %v345_v1  ;;  %v7096_v6 = vpop.f32.mrb[10].mxu0  ;;  %v1058_v7 = vsel %vm1046_vm2, %v1053_v60, %v1057_v61  ;;  %v7722_v61 = vld [vmem:[#allocation2 + $0x130] ss:$8 sps:$4 sm:$0xff]  }
  0xfe   :  { %v696_v10 = vadd.f32 %v8238_v17, %v617_v0  ;;  %v618_v11 = vmul.f32 %v7096_v6, %v8233_v15  ;;  %2290 = vmatprep.mubr.bf16.mxu1 %v1058_v7  ;;  %v348_v12 = vpop.f32.mrb[11].mxu0  ;;  %v8280_v23 = vsel %vm1472_vm3, %v1475_v3, %v1478_v9  ;;  %v1071_v27 = vshll.u32 %v8264_v63, 16 }
  0xff   :  { %v694_v13 = vadd.f32 %v8238_v17, %v615_v5  ;;  %v616_v14 = vmul.f32 %v8233_v15, %v348_v12  ;;  %2291 = vmatmul.mubr.bf16.vlgmr.msra.gmra.mrb[0].mxu1 %v8251_v37  ;;  %v1063_v16 = vshll.u32 %v8267_v4, 16  ;;  %v1067_v18 = vshrl.u32 %v8267_v4, 16  ;;  %v7727_v5 = vld [vmem:[#allocation2 + $0x144] ss:$8 sps:$4 sm:$0xff]  }
 0x100   :  { %v768_v19 = vmax.f32 %v696_v10, 0.0  ;;  %v697_v20 = vadd.f32 %v8238_v17, %v618_v11  ;;  %2612 = vmatpush1.bf16.msra.mxu1 %v7713_v2  ;;  %v1073_v47 = vrot.slane %v1071_v27, 1  ;;  %v1075_v54 = vshrl.u32 %v8264_v63, 16 }
 0x101   :  { %v766_v24 = vmax.f32 %v694_v13, 0.0  ;;  %v695_v25 = vadd.f32 %v8238_v17, %v616_v14  ;;  %v1065_v26 = vrot.slane %v1063_v16, 1  ;;  %2613 = vmatprep.subr.bf16.mxu1 %v7718_v8  ;;  %v1480_v30 = vrot.slane %v1067_v18, 1 }
 0x102   :  { %v769_v29 = vmax.f32 %v697_v20, 0.0  ;;  %v1481_v31 = vrot.slane %v1063_v16, 2  ;;  %v1484_v7 = vrot.slane %v1075_v54, 1  ;;  %v1485_v8 = vrot.slane %v1071_v27, 2  ;;  %v7730_v27 = vld [vmem:[#allocation2 + $0x154] ss:$8 sps:$4 sm:$0xff]  }
 0x103   :  { %v8284_v32 = vpack.c.bf16 %v766_v24, %v766_v24  ;;  %v767_v33 = vmax.f32 %v695_v25, 0.0  ;;  %v7099_v35 = vpop.f32.mrb[12].mxu0  ;;  %v1066_v36 = vsel %vm1046_vm2, %v1061_v21, %v1065_v26  ;;  %v1069_v38 = vor.u32 %v1067_v18, %v1065_v26 }
 0x104   :  { %v8287_v39 = vpack.c.bf16 %v769_v29, %v768_v19  ;;  %v621_v40 = vmul.f32 %v7099_v35, %v8233_v15  ;;  %v361_v41 = vpop.f32.mrb[13].mxu0  ;;  %2300 = vmatprep.mubr.bf16.mxu1 %v1066_v36  ;;  %2614 = vmatpush1.bf16.msra.mxu1 %v7716_v22  ;;  %v8290_v43 = vor.u32 %v1481_v31, %v1480_v30  ;;  %v7725_v19 = vld [vmem:[#allocation2 + $0x140] ss:$8 sps:$4 sm:$0xff]  }
 0x105   :  { %v834_v44 = vpack.c.bf16 %v767_v33, %v766_v24  ;;  %v619_v45 = vmul.f32 %v8233_v15, %v361_v41  ;;  %v7100_v46 = vpop.f32.mrb[14].mxu0  ;;  %v1079_v48 = vshll.u32 %v8284_v32, 16  ;;  %2615 = vmatprep.subr.bf16.mxu1 %v7721_v28  ;;  %v1074_v58 = vsel %vm1046_vm2, %v1069_v38, %v1073_v47 }
 0x106   :  { %v912_v50 = vunpack.c.l.b16 %v8287_v39  ;;  %v700_v51 = vadd.f32 %v8238_v17, %v621_v40  ;;  %v622_v52 = vmul.f32 %v7100_v46, %v8233_v15  ;;  %v364_v53 = vpop.f32.mrb[15].mxu0  ;;  %v8305_v62 = vsel %vm1472_vm3, %v1478_v9, %v8290_v43 }
 0x107   :  { %v911_v55 = vunpack.c.h.b16 %v834_v44  ;;  %v698_v56 = vadd.f32 %v8238_v17, %v619_v45  ;;  %v620_v57 = vmul.f32 %v8233_v15, %v364_v53  ;;  %2301 = vmatmul.mubr.bf16.gmra.mrb[4].mxu1 %v8248_v34  ;;  %v1081_v3 = vrot.slane %v1079_v48, 1  ;;  %v7728_v44 = vld [vmem:[#allocation2 + $0x150] ss:$8 sps:$4 sm:$0xff]  }
 0x108   :  { %v772_v59 = vmax.f32 %v700_v51, 0.0  ;;  %v701_v60 = vadd.f32 %v8238_v17, %v622_v52  ;;  %2310 = vmatprep.mubr.bf16.mxu1 %v1074_v58  ;;  %2616 = vmatpush1.bf16.msra.mxu1 %v7719_v42  ;;  %v913_v10 = vunpack.c.h.b16 %v8287_v39  ;;  %v1077_v13 = vor.u32 %v1075_v54, %v1073_v47  ;;  %v7733_v51 = vld [vmem:[#allocation2 + $0x164] ss:$8 sps:$4 sm:$0xff]  }
 0x109   :  { %v8307_v0 = vpack.c.b16 %v912_v50, %v911_v55  ;;  %v770_v1 = vmax.f32 %v698_v56, 0.0  ;;  %v699_v2 = vadd.f32 %v8238_v17, %v620_v57  ;;  %2617 = vmatprep.subr.bf16.mxu1 %v7724_v49  ;;  %v8317_v20 = vor.u32 %v1485_v8, %v1484_v7 }
 0x10a   :  { %v773_v6 = vmax.f32 %v701_v60, 0.0  ;;  %v1082_v25 = vsel %vm1046_vm2, %v1077_v13, %v1081_v3  ;;  %v1488_v33 = vshrl.u32 %v8284_v32, 16  ;;  %v1491_v54 = vrot.slane %v1079_v48, 2 }
 0x10b   :  { %v771_v11 = vmax.f32 %v699_v2, 0.0  ;;  %v7103_v12 = vpop.f32.mrb[16].mxu0  ;;  %v1086_v18 = vshll.u32 %v8307_v0, 16  ;;  %v1084_v26 = vshrl.u32 %v8307_v0, 16  ;;  %v8335_v45 = vsel %vm1472_vm3, %v8290_v43, %v8317_v20 }
 0x10c   :  { %v8313_v9 = vpack.c.bf16 %v773_v6, %v772_v59  ;;  %v625_v14 = vmul.f32 %v7103_v12, %v8233_v15  ;;  %v377_v16 = vpop.f32.mrb[17].mxu0  ;;  %2618 = vmatpush1.bf16.msra.mxu1 %v7722_v61  ;;  %v1490_v53 = vrot.slane %v1488_v33, 1  ;;  %v7731_v61 = vld [vmem:[#allocation2 + $0x160] ss:$8 sps:$4 sm:$0xff]   ;;  %v7736_v6 = vld [vmem:[#allocation2 + $0x174] ss:$8 sps:$4 sm:$0xff]  }
 0x10d   :  { %v836_v21 = vpack.c.bf16 %v771_v11, %v770_v1  ;;  %v623_v22 = vmul.f32 %v8233_v15, %v377_v16  ;;  %v7104_v24 = vpop.f32.mrb[18].mxu0  ;;  %2619 = vmatprep.subr.bf16.mxu1 %v7727_v5  ;;  %v1088_v42 = vrot.slane %v1086_v18, 1 }
 0x10e   :  { %v916_v28 = vunpack.c.l.b16 %v8313_v9  ;;  %v704_v29 = vadd.f32 %v8238_v17, %v625_v14  ;;  %v626_v30 = vmul.f32 %v7104_v24, %v8233_v15  ;;  %v380_v31 = vpop.f32.mrb[19].mxu0  ;;  %v917_v57 = vunpack.c.h.b16 %v8313_v9  ;;  %v7734_v24 = vld [vmem:[#allocation2 + $0x170] ss:$8 sps:$4 sm:$0xff]  }
 0x10f   :  { %v914_v35 = vunpack.c.l.b16 %v836_v21  ;;  %v915_v36 = vunpack.c.h.b16 %v836_v21  ;;  %v702_v38 = vadd.f32 %v8238_v17, %v623_v22  ;;  %v624_v39 = vmul.f32 %v8233_v15, %v380_v31  ;;  %2311 = vmatmul.mubr.bf16.gmra.mrb[8].mxu1 %v8267_v4 }
 0x110   :  { %v776_v40 = vmax.f32 %v704_v29, 0.0  ;;  %v705_v41 = vadd.f32 %v8238_v17, %v626_v30  ;;  %2320 = vmatprep.mubr.bf16.mxu1 %v1082_v25  ;;  %2620 = vmatpush1.bf16.msra.mxu1 %v7725_v19  ;;  %v1089_v48 = vor.u32 %v1088_v42, %v1084_v26  ;;  %v1492_v12 = vor.u32 %v1491_v54, %v1490_v53  ;;  %v7739_v29 = vld [vmem:[#allocation2 + $0x184] ss:$8 sps:$4 sm:$0xff]   ;;  %v7737_v42 = vld [vmem:[#allocation2 + $0x180] ss:$8 sps:$4 sm:$0xff]  }
 0x111   :  { %v8337_v46 = vpack.c.b16 %v914_v35, %v913_v10  ;;  %v8339_v47 = vpack.c.b16 %v916_v28, %v915_v36  ;;  %v774_v49 = vmax.f32 %v702_v38, 0.0  ;;  %v703_v50 = vadd.f32 %v8238_v17, %v624_v39  ;;  %2621 = vmatprep.subr.bf16.mxu1 %v7730_v27 }
 0x112   :  { %v777_v52 = vmax.f32 %v705_v41, 0.0  ;;  %v8373_v35 = vsel %vm1472_vm3, %v8317_v20, %v1492_v12 }
 0x113   :  { %v8344_v55 = vmax.f32 %v703_v50, 0.0  ;;  %v7107_v56 = vpop.f32.mrb[20].mxu0  ;;  %v1091_v43 = vshll.u32 %v8337_v46, 16  ;;  %v1099_v11 = vshll.u32 %v8339_v47, 16  ;;  %v1095_v22 = vshrl.u32 %v8337_v46, 16 }
 0x114   :  { %v8348_v58 = vpack.c.bf16 %v777_v52, %v776_v40  ;;  %v629_v59 = vmul.f32 %v7107_v56, %v8233_v15  ;;  %v393_v60 = vpop.f32.mrb[21].mxu0  ;;  %2622 = vmatpush1.bf16.msra.mxu1 %v7728_v44  ;;  %v1494_v56 = vrot.slane %v1084_v26, 1 }
 0x115   :  { %v838_v1 = vpack.c.bf16 %v8344_v55, %v774_v49  ;;  %v627_v2 = vmul.f32 %v8233_v15, %v393_v60  ;;  %v7108_v3 = vpop.f32.mrb[22].mxu0  ;;  %v1093_v5 = vrot.slane %v1091_v43, 1  ;;  %2623 = vmatprep.subr.bf16.mxu1 %v7733_v51  ;;  %v1101_v33 = vrot.slane %v1099_v11, 1  ;;  %v7742_v51 = vld [vmem:[#allocation2 + $0x194] ss:$8 sps:$4 sm:$0xff]  }
 0x116   :  { %v708_v7 = vadd.f32 %v8238_v17, %v629_v59  ;;  %v630_v8 = vmul.f32 %v7108_v3, %v8233_v15  ;;  %v396_v10 = vpop.f32.mrb[23].mxu0  ;;  %v7740_v3 = vld [vmem:[#allocation2 + $0x190] ss:$8 sps:$4 sm:$0xff]  }
 0x117   :  { %v918_v13 = vunpack.c.l.b16 %v838_v1  ;;  %v706_v9 = vadd.f32 %v8238_v17, %v627_v2  ;;  %2321 = vmatmul.mubr.bf16.gmra.mrb[12].mxu1 %v8264_v63  ;;  %v1094_v14 = vsel %vm1046_vm2, %v1089_v48, %v1093_v5  ;;  %v628_v16 = vmul.f32 %v8233_v15, %v396_v10 }
 0x118   :  { %v780_v19 = vmax.f32 %v708_v7, 0.0  ;;  %v709_v21 = vadd.f32 %v8238_v17, %v630_v8  ;;  %2330 = vmatprep.mubr.bf16.mxu1 %v1094_v14  ;;  %2624 = vmatpush1.bf16.msra.mxu1 %v7731_v61  ;;  %v1097_v31 = vor.u32 %v1095_v22, %v1093_v5  ;;  %v1495_v61 = vrot.slane %v1086_v18, 2  ;;  %v7745_v5 = vld [vmem:[#allocation2 + $0x1a4] ss:$8 sps:$4 sm:$0xff]  }
 0x119   :  { %v8366_v25 = vpack.c.b16 %v918_v13, %v917_v57  ;;  %v778_v27 = vmax.f32 %v706_v9, 0.0  ;;  %v707_v28 = vadd.f32 %v8238_v17, %v628_v16  ;;  %2625 = vmatprep.subr.bf16.mxu1 %v7736_v6  ;;  %v8398_v6 = vpack.c.bf16 %v8344_v55, %v8344_v55 }
 0x11a   :  { %v781_v30 = vmax.f32 %v709_v21, 0.0  ;;  %v1102_v52 = vsel %vm1046_vm2, %v1097_v31, %v1101_v33  ;;  %v1103_v8 = vshrl.u32 %v8339_v47, 16  ;;  %v1496_v13 = vor.u32 %v1495_v61, %v1494_v56 }
 0x11b   :  { %v779_v36 = vmax.f32 %v707_v28, 0.0  ;;  %v7111_v38 = vpop.f32.mrb[24].mxu0  ;;  %v1107_v57 = vshll.u32 %v8366_v25, 16  ;;  %v1497_v21 = vrot.slane %v1095_v22, 1  ;;  %v1498_v55 = vrot.slane %v1091_v43, 2 }
 0x11c   :  { %v8375_v39 = vpack.c.bf16 %v781_v30, %v780_v19  ;;  %v633_v40 = vmul.f32 %v7111_v38, %v8233_v15  ;;  %v409_v41 = vpop.f32.mrb[25].mxu0  ;;  %2626 = vmatpush1.bf16.msra.mxu1 %v7734_v24  ;;  %v7743_v19 = vld [vmem:[#allocation2 + $0x1a0] ss:$8 sps:$4 sm:$0xff]   ;;  %v1105_v24 = vor.u32 %v1103_v8, %v1101_v33  ;;  %v1115_v30 = vshll.u32 %v8398_v6, 16 }
 0x11d   :  { %v8378_v44 = vpack.c.bf16 %v779_v36, %v778_v27  ;;  %v631_v49 = vmul.f32 %v8233_v15, %v409_v41  ;;  %v7112_v50 = vpop.f32.mrb[26].mxu0  ;;  %2627 = vmatprep.subr.bf16.mxu1 %v7739_v29  ;;  %v1109_v18 = vrot.slane %v1107_v57, 1  ;;  %v1122_v43 = vshll.u32 %v8348_v58, 16 }
 0x11e   :  { %10726 = vst [vmem:[#allocation8_spill] sm:$0xff] %v8375_v39  ;;  %v712_v20 = vadd.f32 %v8238_v17, %v633_v40  ;;  %v634_v53 = vmul.f32 %v7112_v50, %v8233_v15  ;;  %v412_v54 = vpop.f32.mrb[27].mxu0  ;;  %v1111_v41 = vshrl.u32 %v8366_v25, 16  ;;  %v7746_v50 = vld [vmem:[#allocation2 + $0x1b0] ss:$8 sps:$4 sm:$0xff]   ;;  %v1501_v61 = vrot.slane %v1103_v8, 1 }
 0x11f   :  { %2331 = vmatmul.mubr.bf16.gmra.mrb[16].mxu1 %v8307_v0  ;;  %v710_v59 = vadd.f32 %v8238_v17, %v631_v49  ;;  %v632_v60 = vmul.f32 %v8233_v15, %v412_v54  ;;  %v1110_v22 = vsel %vm1046_vm2, %v1105_v24, %v1109_v18 }
 0x120   :  { %2340 = vmatprep.mubr.bf16.mxu1 %v1102_v52  ;;  %v8392_v1 = vmax.f32 %v712_v20, 0.0  ;;  %v713_v2 = vadd.f32 %v8238_v17, %v634_v53  ;;  %2628 = vmatpush1.bf16.msra.mxu1 %v7737_v42  ;;  %v1499_v52 = vor.u32 %v1498_v55, %v1497_v21  ;;  %v1117_v20 = vrot.slane %v1115_v30, 1 }
 0x121   :  { %v782_v48 = vmax.f32 %v710_v59, 0.0  ;;  %v711_v26 = vadd.f32 %v8238_v17, %v632_v60  ;;  %2629 = vmatprep.subr.bf16.mxu1 %v7742_v51  ;;  %v7748_v51 = vld [vmem:[#allocation2 + $0x1b4] ss:$8 sps:$4 sm:$0xff]   ;;  %v1113_v56 = vor.u32 %v1111_v41, %v1109_v18 }
 0x122   :  { %v785_v7 = vmax.f32 %v713_v2, 0.0  ;;  %v8426_v60 = vsel %vm1472_vm3, %v1496_v13, %v1499_v52  ;;  %v1120_v2 = vshrl.u32 %v8348_v58, 16 }
 0x123   :  { %v783_v10 = vmax.f32 %v711_v26, 0.0  ;;  %v7115_v12 = vpop.f32.mrb[28].mxu0  ;;  %v1502_v26 = vrot.slane %v1099_v11, 2  ;;  %v1118_v11 = vsel %vm1046_vm2, %v1113_v56, %v1117_v20 }
 0x124   :  { %v8404_v9 = vpack.c.bf16 %v785_v7, %v8392_v1  ;;  %v637_v14 = vmul.f32 %v7115_v12, %v8233_v15  ;;  %v425_v16 = vpop.f32.mrb[29].mxu0  ;;  %2630 = vmatpush1.bf16.msra.mxu1 %v7740_v3  ;;  %v1127_v7 = vshll.u32 %v8378_v44, 16 }
 0x125   :  { %v8409_v27 = vpack.c.bf16 %v783_v10, %v782_v48  ;;  %v635_v28 = vmul.f32 %v8233_v15, %v425_v16  ;;  %v7116_v29 = vpop.f32.mrb[30].mxu0  ;;  %2631 = vmatprep.subr.bf16.mxu1 %v7745_v5  ;;  %v1124_v5 = vrot.slane %v1122_v43, 1 }
 0x126   :  { %v716_v31 = vadd.f32 %v8238_v17, %v637_v14  ;;  %v638_v36 = vmul.f32 %v7116_v29, %v8233_v15  ;;  %v428_v38 = vpop.f32.mrb[31].mxu0  ;;  %v929_v13 = vunpack.c.h.b16 %v8404_v9 }
 0x127   :  { %10727 = vst [vmem:[#allocation9_spill] sm:$0xff] %v8409_v27  ;;  %2341 = vmatmul.mubr.bf16.gmra.mrb[20].mxu1 %v8337_v46  ;;  %v714_v33 = vadd.f32 %v8238_v17, %v635_v28  ;;  %v636_v40 = vmul.f32 %v8233_v15, %v428_v38  ;;  %v1125_v20 = vor.u32 %v1124_v5, %v1120_v2 }
 0x128   :  { %2350 = vmatprep.mubr.bf16.mxu1 %v1110_v22  ;;  %v788_v42 = vmax.f32 %v716_v31, 0.0  ;;  %v717_v49 = vadd.f32 %v8238_v17, %v638_v36  ;;  %2632 = vmatpush1.bf16.msra.mxu1 %v7743_v19  ;;  %v8437_v19 = vor.u32 %v1502_v26, %v1501_v61 }
 0x129   :  { %v786_v53 = vmax.f32 %v714_v33, 0.0  ;;  %v715_v54 = vadd.f32 %v8238_v17, %v636_v40  ;;  %2633 = vmatprep.subr.bf16.mxu1 %v7748_v51 }
 0x12a   :  { %v789_v59 = vmax.f32 %v717_v49, 0.0  ;;  %v8448_v33 = vsel %vm1472_vm3, %v1499_v52, %v8437_v19 }
 0x12b   :  { %v787_v3 = vmax.f32 %v715_v54, 0.0  ;;  %v7119_v48 = vpop.f32.mrb[32].mxu0 }
 0x12c   :  { %v845_v10 = vpack.c.bf16 %v789_v59, %v788_v42  ;;  %v641_v18 = vmul.f32 %v7119_v48, %v8233_v15  ;;  %v441_v12 = vpop.f32.mrb[33].mxu0  ;;  %2634 = vmatpush1.bf16.msra.mxu1 %v7746_v50 }
 0x12d   :  { %v844_v8 = vpack.c.bf16 %v787_v3, %v786_v53  ;;  %v639_v14 = vmul.f32 %v8233_v15, %v441_v12  ;;  %v7120_v16 = vpop.f32.mrb[34].mxu0  ;;  %v1129_v53 = vrot.slane %v1127_v7, 1  ;;  %v1505_v12 = vrot.slane %v1111_v41, 1 }
 0x12e   :  { %v932_v21 = vunpack.c.l.b16 %v845_v10  ;;  %v720_v55 = vadd.f32 %v8238_v17, %v641_v18  ;;  %v642_v24 = vmul.f32 %v7120_v16, %v8233_v15  ;;  %v444_v28 = vpop.f32.mrb[35].mxu0  ;;  %v933_v3 = vunpack.c.h.b16 %v845_v10 }
 0x12f   :  { %2351 = vmatmul.mubr.bf16.gmra.mrb[24].mxu1 %v8339_v47  ;;  %v930_v29 = vunpack.c.l.b16 %v844_v8  ;;  %v931_v31 = vunpack.c.h.b16 %v844_v8  ;;  %v718_v9 = vadd.f32 %v8238_v17, %v639_v14  ;;  %v640_v36 = vmul.f32 %v8233_v15, %v444_v28 }
 0x130   :  { %2360 = vmatprep.mubr.bf16.mxu1 %v1118_v11  ;;  %v792_v38 = vmax.f32 %v720_v55, 0.0  ;;  %v721_v22 = vadd.f32 %v8238_v17, %v642_v24  ;;  %v1506_v16 = vrot.slane %v1107_v57, 2  ;;  %v1130_v11 = vsel %vm1046_vm2, %v1125_v20, %v1129_v53 }
 0x131   :  { %v8450_v40 = vpack.c.b16 %v930_v29, %v929_v13  ;;  %v8452_v42 = vpack.c.b16 %v932_v21, %v931_v31  ;;  %v790_v49 = vmax.f32 %v718_v9, 0.0  ;;  %v719_v50 = vadd.f32 %v8238_v17, %v640_v36  ;;  %v7749_v29 = vld [vmem:[#allocation2 + $0x1c0] ss:$8 sps:$4 sm:$0xff]   ;;  %v7751_v31 = vld [vmem:[#allocation2 + $0x1c4] ss:$8 sps:$4 sm:$0xff]  }
 0x132   :  { %v8455_v51 = vmax.f32 %v721_v22, 0.0  ;;  %v1131_v9 = vshrl.u32 %v8378_v44, 16  ;;  %v1135_v57 = vshll.u32 %v8375_v39, 16  ;;  %2635 = vmatprep.subr.bf16.mxu1 %v7751_v31  ;;  %v8480_v20 = vor.u32 %v1506_v16, %v1505_v12 }
 0x133   :  { %10728 = vst [vmem:[#allocation10_spill] sm:$0xff] %v8450_v40  ;;  %10729 = vst [vmem:[#allocation11_spill] sm:$0xff] %v8452_v42  ;;  %v791_v54 = vmax.f32 %v719_v50, 0.0  ;;  %v7123_v56 = vpop.f32.mrb[36].mxu0  ;;  %2636 = vmatpush1.bf16.msra.mxu1 %v7749_v29  ;;  %v10606_v16 = vshll.u32 %v8409_v27, 16 }
 0x134   :  { %v847_v52 = vpack.c.bf16 %v8455_v51, %v792_v38  ;;  %v645_v59 = vmul.f32 %v7123_v56, %v8233_v15  ;;  %v457_v61 = vpop.f32.mrb[37].mxu0 }
 0x135   :  { %v846_v48 = vpack.c.bf16 %v791_v54, %v790_v49  ;;  %v643_v26 = vmul.f32 %v8233_v15, %v457_v61  ;;  %v7124_v18 = vpop.f32.mrb[38].mxu0  ;;  %v1133_v54 = vor.u32 %v1131_v9, %v1129_v53  ;;  %v1139_v53 = vshrl.u32 %v8375_v39, 16 }
 0x136   :  { %v936_v13 = vunpack.c.l.b16 %v847_v52  ;;  %v724_v8 = vadd.f32 %v8238_v17, %v645_v59  ;;  %v646_v5 = vmul.f32 %v7124_v18, %v8233_v15  ;;  %v460_v14 = vpop.f32.mrb[39].mxu0 }
 0x137   :  { %2361 = vmatmul.mubr.bf16.gmra.mrb[28].mxu1 %v8366_v25  ;;  %v934_v21 = vunpack.c.l.b16 %v846_v48  ;;  %v935_v10 = vunpack.c.h.b16 %v846_v48  ;;  %v722_v24 = vadd.f32 %v8238_v17, %v643_v26  ;;  %v644_v28 = vmul.f32 %v8233_v15, %v460_v14 }
 0x138   :  { %2370 = vmatprep.mubr.bf16.mxu1 %v1130_v11  ;;  %v796_v55 = vmax.f32 %v724_v8, 0.0  ;;  %v725_v41 = vadd.f32 %v8238_v17, %v646_v5  ;;  %v8490_v48 = vsel %vm1472_vm3, %v8437_v19, %v8480_v20  ;;  %v1137_v26 = vrot.slane %v1135_v57, 1 }
 0x139   :  { %v8475_v36 = vpack.c.b16 %v934_v21, %v933_v3  ;;  %v8477_v38 = vpack.c.b16 %v936_v13, %v935_v10  ;;  %v794_v22 = vmax.f32 %v722_v24, 0.0  ;;  %v723_v50 = vadd.f32 %v8238_v17, %v644_v28 }
 0x13a   :  { %v797_v49 = vmax.f32 %v725_v41, 0.0  ;;  %v1138_v19 = vsel %vm1046_vm2, %v1133_v54, %v1137_v26  ;;  %v8507_v10 = vpack.c.bf16 %v8392_v1, %v8392_v1  ;;  %v1141_v31 = vor.u32 %v1139_v53, %v1137_v26 }
 0x13b   :  { %10730 = vst [vmem:[#allocation12_spill] sm:$0xff] %v8477_v38  ;;  %v7127_v56 = vpop.f32.mrb[40].mxu0  ;;  %v795_v59 = vmax.f32 %v723_v50, 0.0  ;;  %v1509_v54 = vshrl.u32 %v8398_v6, 16 }
 0x13c   :  { %v8484_v52 = vpack.c.bf16 %v797_v49, %v796_v55  ;;  %v649_v61 = vmul.f32 %v7127_v56, %v8233_v15  ;;  %v473_v3 = vpop.f32.mrb[41].mxu0  ;;  %10733 = vst [vmem:[#allocation15_spill] sm:$0xff] %v8507_v10  ;;  %v10603_v1 = vshll.u32 %v8507_v10, 16 }
 0x13d   :  { %v647_v18 = vmul.f32 %v8233_v15, %v473_v3  ;;  %v7128_v12 = vpop.f32.mrb[42].mxu0  ;;  %v8496_v13 = vpack.c.bf16 %v795_v59, %v794_v22  ;;  %v1145_v22 = vrot.slane %v10606_v16, 1  ;;  %v1511_v26 = vrot.slane %v1509_v54, 1 }
 0x13e   :  { %10731 = vst [vmem:[#allocation13_spill] sm:$0xff] %v8484_v52  ;;  %v728_v8 = vadd.f32 %v8238_v17, %v649_v61  ;;  %v650_v5 = vmul.f32 %v7128_v12, %v8233_v15  ;;  %v476_v14 = vpop.f32.mrb[43].mxu0 }
 0x13f   :  { %10732 = vst [vmem:[#allocation14_spill] sm:$0xff] %v8496_v13  ;;  %2371 = vmatmul.mubr.bf16.gmra.mrb[32].mxu1 %v8348_v58  ;;  %v726_v11 = vadd.f32 %v8238_v17, %v647_v18  ;;  %v648_v21 = vmul.f32 %v8233_v15, %v476_v14  ;;  %v10741_v10 = vshll.u32 %v8496_v13, 16 }
 0x140   :  { %2380 = vmatprep.mubr.bf16.mxu1 %v1138_v19  ;;  %v800_v55 = vmax.f32 %v728_v8, 0.0  ;;  %v729_v24 = vadd.f32 %v8238_v17, %v650_v5  ;;  %v1512_v8 = vrot.slane %v1115_v30, 2  ;;  %v10607_v5 = vshrl.u32 %v8409_v27, 16 }
 0x141   :  { %v798_v41 = vmax.f32 %v726_v11, 0.0  ;;  %v727_v28 = vadd.f32 %v8238_v17, %v648_v21  ;;  %v1146_v21 = vsel %vm1046_vm2, %v1141_v31, %v1145_v22  ;;  %v7754_v31 = vld [vmem:[#allocation2 + $0x1d4] ss:$8 sps:$4 sm:$0xff]  }
 0x142   :  { %v801_v29 = vmax.f32 %v729_v24, 0.0  ;;  %2637 = vmatprep.subr.bf16.mxu1 %v7754_v31 }
 0x143   :  { %v799_v49 = vmax.f32 %v727_v28, 0.0  ;;  %v7131_v50 = vpop.f32.mrb[44].mxu0 }
 0x144   :  { %v8517_v56 = vpack.c.bf16 %v801_v29, %v800_v55  ;;  %v653_v59 = vmul.f32 %v7131_v50, %v8233_v15  ;;  %v489_v61 = vpop.f32.mrb[45].mxu0  ;;  %v10604_v55 = vshll.u32 %v8450_v40, 16  ;;  %v7752_v29 = vld [vmem:[#allocation2 + $0x1d0] ss:$8 sps:$4 sm:$0xff]   ;;  %v1153_v50 = vrot.slane %v10603_v1, 1 }
 0x145   :  { %v8520_v3 = vpack.c.bf16 %v799_v49, %v798_v41  ;;  %v651_v18 = vmul.f32 %v8233_v15, %v489_v61  ;;  %v7132_v12 = vpop.f32.mrb[46].mxu0  ;;  %v1149_v49 = vor.u32 %v10607_v5, %v1145_v22  ;;  %v10608_v61 = vshrl.u32 %v8450_v40, 16  ;;  %2638 = vmatpush1.bf16.msra.mxu1 %v7752_v29 }
 0x146   :  { %v732_v14 = vadd.f32 %v8238_v17, %v653_v59  ;;  %v654_v19 = vmul.f32 %v7132_v12, %v8233_v15  ;;  %v492_v11 = vpop.f32.mrb[47].mxu0  ;;  %v1513_v59 = vor.u32 %v1512_v8, %v1511_v26  ;;  %v1515_v22 = vrot.slane %v1120_v2, 1 }
 0x147   :  { %10734 = vst [vmem:[#allocation16_spill] sm:$0xff] %v8520_v3  ;;  %2381 = vmatmul.mubr.bf16.gmra.mrb[36].mxu1 %v8378_v44  ;;  %v730_v24 = vadd.f32 %v8238_v17, %v651_v18  ;;  %v652_v41 = vmul.f32 %v8233_v15, %v492_v11  ;;  %v10605_v18 = vshll.u32 %v8452_v42, 16 }
 0x148   :  { %2390 = vmatprep.mubr.bf16.mxu1 %v1146_v21  ;;  %v804_v28 = vmax.f32 %v732_v14, 0.0  ;;  %v733_v30 = vadd.f32 %v8238_v17, %v654_v19  ;;  %v1160_v14 = vrot.slane %v10604_v55, 1  ;;  %v8550_v8 = vsel %vm1472_vm3, %v8480_v20, %v1513_v59 }
 0x149   :  { %v731_v54 = vadd.f32 %v8238_v17, %v652_v41  ;;  %v8543_v19 = vmax.f32 %v730_v24, 0.0  ;;  %v1154_v24 = vsel %vm1046_vm2, %v1149_v49, %v1153_v50  ;;  %v1165_v2 = vrot.slane %v10605_v18, 1 }
 0x14a   :  { %v805_v12 = vmax.f32 %v733_v30, 0.0  ;;  %v1516_v30 = vrot.slane %v1122_v43, 2  ;;  %v1161_v43 = vor.u32 %v1160_v14, %v10608_v61  ;;  %v1519_v14 = vrot.slane %v1127_v7, 2 }
 0x14b   :  { %v803_v11 = vmax.f32 %v731_v54, 0.0  ;;  %v7135_v21 = vpop.f32.mrb[48].mxu0 }
 0x14c   :  { %v853_v1 = vpack.c.bf16 %v805_v12, %v804_v28  ;;  %v657_v41 = vmul.f32 %v7135_v21, %v8233_v15  ;;  %v505_v26 = vpop.f32.mrb[49].mxu0 }
 0x14d   :  { %v852_v54 = vpack.c.bf16 %v803_v11, %v8543_v19  ;;  %v655_v31 = vmul.f32 %v8233_v15, %v505_v26  ;;  %v7136_v55 = vpop.f32.mrb[50].mxu0  ;;  %v1517_v26 = vor.u32 %v1516_v30, %v1515_v22 }
 0x14e   :  { %v948_v28 = vunpack.c.l.b16 %v853_v1  ;;  %v736_v29 = vadd.f32 %v8238_v17, %v657_v41  ;;  %v658_v12 = vmul.f32 %v7136_v55, %v8233_v15  ;;  %v508_v20 = vpop.f32.mrb[51].mxu0  ;;  %v1518_v41 = vrot.slane %v1131_v9, 1 }
 0x14f   :  { %2391 = vmatmul.mubr.bf16.gmra.mrb[40].mxu1 %v8375_v39  ;;  %v947_v49 = vunpack.c.h.b16 %v852_v54  ;;  %v734_v50 = vadd.f32 %v8238_v17, %v655_v31  ;;  %v656_v59 = vmul.f32 %v8233_v15, %v508_v20  ;;  %v10609_v54 = vshrl.u32 %v8452_v42, 16 }
 0x150   :  { %2400 = vmatprep.mubr.bf16.mxu1 %v1154_v24  ;;  %v808_v11 = vmax.f32 %v736_v29, 0.0  ;;  %v737_v21 = vadd.f32 %v8238_v17, %v658_v12  ;;  %v1166_v29 = vsel %vm1046_vm2, %v1161_v43, %v1165_v2  ;;  %v1520_v9 = vor.u32 %v1519_v14, %v1518_v41 }
 0x151   :  { %v8569_v55 = vpack.c.b16 %v948_v28, %v947_v49  ;;  %v806_v18 = vmax.f32 %v734_v50, 0.0  ;;  %v735_v16 = vadd.f32 %v8238_v17, %v656_v59  ;;  %v949_v28 = vunpack.c.h.b16 %v853_v1 }
 0x152   :  { %v809_v5 = vmax.f32 %v737_v21, 0.0  ;;  %v1522_v59 = vrot.slane %v1139_v53, 1  ;;  %v10610_v53 = vshll.u32 %v8475_v36, 16 }
 0x153   :  { %10735 = vst [vmem:[#allocation17_spill] sm:$0xff] %v8569_v55  ;;  %v807_v31 = vmax.f32 %v735_v16, 0.0  ;;  %v7139_v24 = vpop.f32.mrb[52].mxu0 }
 0x154   :  { %v855_v12 = vpack.c.bf16 %v809_v5, %v808_v11  ;;  %v661_v22 = vmul.f32 %v7139_v24, %v8233_v15  ;;  %v521_v30 = vpop.f32.mrb[53].mxu0  ;;  %v1523_v5 = vrot.slane %v1135_v57, 2  ;;  %v7757_v24 = vld [vmem:[#allocation2 + $0x1e4] ss:$8 sps:$4 sm:$0xff]  }
 0x155   :  { %v854_v20 = vpack.c.bf16 %v807_v31, %v806_v18  ;;  %v659_v49 = vmul.f32 %v8233_v15, %v521_v30  ;;  %v7140_v50 = vpop.f32.mrb[54].mxu0  ;;  %v7755_v31 = vld [vmem:[#allocation2 + $0x1e0] ss:$8 sps:$4 sm:$0xff]   ;;  %2639 = vmatprep.subr.bf16.mxu1 %v7757_v24 }
 0x156   :  { %v952_v7 = vunpack.c.l.b16 %v855_v12  ;;  %v740_v21 = vadd.f32 %v8238_v17, %v661_v22  ;;  %v662_v16 = vmul.f32 %v7140_v50, %v8233_v15  ;;  %v524_v61 = vpop.f32.mrb[55].mxu0  ;;  %v8590_v22 = vsel %vm1472_vm3, %v1517_v26, %v1520_v9  ;;  %2640 = vmatpush1.bf16.msra.mxu1 %v7755_v31 }
 0x157   :  { %2401 = vmatmul.mubr.bf16.gmra.mrb[44].mxu1 %v8409_v27  ;;  %v950_v43 = vunpack.c.l.b16 %v854_v20  ;;  %v951_v1 = vunpack.c.h.b16 %v854_v20  ;;  %v738_v18 = vadd.f32 %v8238_v17, %v659_v49  ;;  %v660_v11 = vmul.f32 %v8233_v15, %v524_v61 }
 0x158   :  { %2410 = vmatprep.mubr.bf16.mxu1 %v1166_v29  ;;  %v812_v41 = vmax.f32 %v740_v21, 0.0  ;;  %v741_v14 = vadd.f32 %v8238_v17, %v662_v16  ;;  %v8597_v61 = vor.u32 %v1523_v5, %v1522_v59  ;;  %v1169_v29 = vor.u32 %v10609_v54, %v1165_v2 }
 0x159   :  { %v8592_v57 = vpack.c.b16 %v950_v43, %v949_v28  ;;  %v8594_v30 = vpack.c.b16 %v952_v7, %v951_v1  ;;  %v810_v20 = vmax.f32 %v738_v18, 0.0  ;;  %v739_v49 = vadd.f32 %v8238_v17, %v660_v11 }
 0x15a   :  { %v813_v50 = vmax.f32 %v741_v14, 0.0  ;;  %v8608_v43 = vsel %vm1472_vm3, %v1520_v9, %v8597_v61  ;;  %v1173_v59 = vrot.slane %v10610_v53, 1  ;;  %v953_v5 = vunpack.c.h.b16 %v855_v12  ;;  %v8620_v9 = vld [vmem:[%s10592_s2] ss:$0 sm:$0xff] }
 0x15b   :  { %v8601_v21 = vmax.f32 %v739_v49, 0.0  ;;  %v7143_v16 = vpop.f32.mrb[56].mxu0  ;;  %v10612_v11 = vshrl.u32 %v8475_v36, 16 }
 0x15c   :  { %v8603_v26 = vpack.c.bf16 %v813_v50, %v812_v41  ;;  %v665_v28 = vmul.f32 %v7143_v16, %v8233_v15  ;;  %v537_v7 = vpop.f32.mrb[57].mxu0  ;;  %v10611_v41 = vshll.u32 %v8477_v38, 16  ;;  %v1174_v12 = vsel %vm1046_vm2, %v1169_v29, %v1173_v59 }
 0x15d   :  { %v856_v1 = vpack.c.bf16 %v8601_v21, %v810_v20  ;;  %v663_v2 = vmul.f32 %v8233_v15, %v537_v7  ;;  %v7144_v18 = vpop.f32.mrb[58].mxu0  ;;  %v8628_v20 = vld [vmem:[%s10593_s3] ss:$0 sm:$0xff]  ;;  %v8638_v29 = vpack.c.bf16 %v8455_v51, %v8455_v51 }
 0x15e   :  { %v744_v14 = vadd.f32 %v8238_v17, %v665_v28  ;;  %v666_v31 = vmul.f32 %v8620_v9, %v7144_v18  ;;  %v540_v24 = vpop.f32.mrb[59].mxu0 }
 0x15f   :  { %2411 = vmatmul.mubr.bf16.gmra.mrb[48].mxu1 %v8450_v40  ;;  %v954_v15 = vunpack.c.l.b16 %v856_v1  ;;  %v742_v17 = vadd.f32 %v8628_v20, %v663_v2  ;;  %v664_v49 = vmul.f32 %v8620_v9, %v540_v24  ;;  %10736 = vst [vmem:[#allocation18_spill] sm:$0xff] %v8638_v29  ;;  %v1177_v1 = vor.u32 %v10612_v11, %v1173_v59 }
 0x160   :  { %2420 = vmatprep.mubr.bf16.mxu1 %v1174_v12  ;;  %v816_v50 = vmax.f32 %v744_v14, 0.0  ;;  %v745_v16 = vadd.f32 %v8628_v20, %v666_v31  ;;  %v1181_v2 = vrot.slane %v10611_v41, 1  ;;  %v10621_v11 = vshrl.u32 %v8477_v38, 16 }
 0x161   :  { %v8633_v28 = vpack.c.b16 %v954_v15, %v953_v5  ;;  %v814_v7 = vmax.f32 %v742_v17, 0.0  ;;  %v743_v18 = vadd.f32 %v8628_v20, %v664_v49 }
 0x162   :  { %v817_v24 = vmax.f32 %v745_v16, 0.0  ;;  %v1182_v49 = vsel %vm1046_vm2, %v1177_v1, %v1181_v2 }
 0x163   :  { %v815_v12 = vmax.f32 %v743_v18, 0.0  ;;  %v7147_v14 = vpop.f32.mrb[60].mxu0 }
 0x164   :  { %v8644_v54 = vpack.c.bf16 %v817_v24, %v816_v50  ;;  %v669_v5 = vmul.f32 %v8620_v9, %v7147_v14  ;;  %v553_v31 = vpop.f32.mrb[61].mxu0  ;;  %v10738_v14 = vshll.u32 %v8409_v27, 16 }
 0x165   :  { %v8647_v15 = vpack.c.bf16 %v815_v12, %v814_v7  ;;  %v667_v17 = vmul.f32 %v8620_v9, %v553_v31  ;;  %v7148_v51 = vpop.f32.mrb[62].mxu0  ;;  %v10737_v7 = vshrl.u32 %v8409_v27, 16 }
 0x166   :  { %v748_v53 = vadd.f32 %v8628_v20, %v669_v5  ;;  %v670_v16 = vmul.f32 %v8620_v9, %v7148_v51  ;;  %v556_v18 = vpop.f32.mrb[63].mxu0  ;;  %v1527_v31 = vrot.slane %v10738_v14, 2  ;;  %v7758_v51 = vld [vmem:[#allocation2 + $0x1f0] ss:$8 sps:$4 sm:$0xff]   ;;  %v10739_v14 = vshll.u32 %v8638_v29, 16 }
 0x167   :  { %2421 = vmatmul.mubr.bf16.gmra.mrb[52].mxu1 %v8452_v42  ;;  %v746_v50 = vadd.f32 %v8628_v20, %v667_v17  ;;  %v668_v24 = vmul.f32 %v8620_v9, %v556_v18  ;;  %v1526_v12 = vrot.slane %v10737_v7, 1  ;;  %v7760_v18 = vld [vmem:[#allocation2 + $0x1f4] ss:$8 sps:$4 sm:$0xff]   ;;  %v1185_v7 = vor.u32 %v10621_v11, %v1181_v2 }
 0x168   :  { %2430 = vmatprep.mubr.bf16.mxu1 %v1182_v49  ;;  %v8662_v41 = vmax.f32 %v748_v53, 0.0  ;;  %v749_v5 = vadd.f32 %v8628_v20, %v670_v16  ;;  %v1189_v49 = vrot.slane %v10739_v14, 1  ;;  %2641 = vmatprep.subr.bf16.mxu1 %v7760_v18  ;;  %v10622_v16 = vshrl.u32 %v8496_v13, 16 }
 0x169   :  { %v818_v59 = vmax.f32 %v746_v50, 0.0  ;;  %v747_v17 = vadd.f32 %v8628_v20, %v668_v24  ;;  %v8671_v53 = vor.u32 %v1527_v31, %v1526_v12  ;;  %v1196_v50 = vrot.slane %v10741_v10, 1  ;;  %2642 = vmatpush1.bf16.msra.mxu1 %v7758_v51 }
 0x16a   :  { %v821_v42 = vmax.f32 %v749_v5, 0.0  ;;  %v10625_v18 = vshll.u32 %v8484_v52, 16 }
 0x16b   :  { %v819_v27 = vmax.f32 %v747_v17, 0.0  ;;  %v7151_v1 = vpop.f32.mrb[64].mxu0  ;;  %10740 = vst [vmem:[#allocation19_spill] sm:$0xff] %v8671_v53  ;;  %v8694_v51 = vsel %vm1472_vm3, %v8597_v61, %v8671_v53 }
 0x16c   :  { %v861_v24 = vpack.c.bf16 %v821_v42, %v8662_v41  ;;  %v673_v5 = vmul.f32 %v8620_v9, %v7151_v1  ;;  %v569_v39 = vpop.f32.mrb[65].mxu0  ;;  %v1190_v42 = vsel %vm1046_vm2, %v1185_v7, %v1189_v49  ;;  %10742 = vst [vmem:[#allocation20_spill] sm:$0xff] %v8694_v51  ;;  %v1201_v7 = vrot.slane %v10625_v18, 1 }
 0x16d   :  { %v8678_v2 = vpack.c.bf16 %v819_v27, %v818_v59  ;;  %v671_v14 = vmul.f32 %v8620_v9, %v569_v39  ;;  %v7152_v17 = vpop.f32.mrb[66].mxu0  ;;  %v1197_v39 = vor.u32 %v1196_v50, %v10622_v16 }
 0x16e   :  { %v752_v12 = vadd.f32 %v8628_v20, %v673_v5  ;;  %v674_v31 = vmul.f32 %v8620_v9, %v7152_v17  ;;  %v572_v11 = vpop.f32.mrb[67].mxu0  ;;  %v965_v18 = vunpack.c.h.b16 %v861_v24 }
 0x16f   :  { %2431 = vmatmul.mubr.bf16.gmra.mrb[56].mxu1 %v8475_v36  ;;  %v750_v10 = vadd.f32 %v8628_v20, %v671_v14  ;;  %v672_v1 = vmul.f32 %v8620_v9, %v572_v11  ;;  %v10743_v11 = vshrl.u32 %v8450_v40, 16  ;;  %v1202_v61 = vsel %vm1046_vm2, %v1197_v39, %v1201_v7 }
 0x170   :  { %2440 = vmatprep.mubr.bf16.mxu1 %v1190_v42  ;;  %v824_v27 = vmax.f32 %v752_v12, 0.0  ;;  %v753_v59 = vadd.f32 %v8628_v20, %v674_v31  ;;  %v10745_v31 = vshll.u32 %v8450_v40, 16 }
 0x171   :  { %v822_v5 = vmax.f32 %v750_v10, 0.0  ;;  %v751_v17 = vadd.f32 %v8628_v20, %v672_v1  ;;  %v8701_v14 = vrot.slane %v10743_v11, 1 }
 0x172   :  { %v825_v49 = vmax.f32 %v753_v59, 0.0  ;;  %v8705_v42 = vrot.slane %v10745_v31, 2 }
 0x173   :  { %10744 = vst [vmem:[#allocation21_spill] sm:$0xff] %v8701_v14  ;;  %v823_v50 = vmax.f32 %v751_v17, 0.0  ;;  %v7155_v12 = vpop.f32.mrb[68].mxu0 }
 0x174   :  { %v863_v16 = vpack.c.bf16 %v825_v49, %v824_v27  ;;  %v677_v1 = vmul.f32 %v8620_v9, %v7155_v12  ;;  %v585_v29 = vpop.f32.mrb[69].mxu0  ;;  %v7763_v12 = vld [vmem:[#allocation2 + $0x204] ss:$8 sps:$4 sm:$0xff]  }
 0x175   :  { %v862_v59 = vpack.c.bf16 %v823_v50, %v822_v5  ;;  %v675_v53 = vmul.f32 %v8620_v9, %v585_v29  ;;  %v7156_v11 = vpop.f32.mrb[70].mxu0  ;;  %2964 = vmatprep.subr.bf16.mxu1 %v7763_v12  ;;  %v10749_v12 = vshll.u32 %v8475_v36, 16 }
 0x176   :  { %v968_v31 = vunpack.c.l.b16 %v863_v16  ;;  %v756_v51 = vadd.f32 %v8628_v20, %v677_v1  ;;  %v678_v39 = vmul.f32 %v8620_v9, %v7156_v11  ;;  %v588_v10 = vpop.f32.mrb[71].mxu0 }
 0x177   :  { %2441 = vmatmul.mubr.bf16.gmra.mrb[60].mxu1 %v8477_v38  ;;  %v966_v27 = vunpack.c.l.b16 %v862_v59  ;;  %v967_v49 = vunpack.c.h.b16 %v862_v59  ;;  %v754_v24 = vadd.f32 %v8628_v20, %v675_v53  ;;  %v676_v29 = vmul.f32 %v8620_v9, %v588_v10 }
 0x178   :  { %2450 = vmatprep.mubr.bf16.mxu1 %v1202_v61  ;;  %v828_v5 = vmax.f32 %v756_v51, 0.0  ;;  %v757_v50 = vadd.f32 %v8628_v20, %v678_v39  ;;  %v10746_v59 = vshrl.u32 %v8484_v52, 16  ;;  %v10747_v9 = vshll.u32 %v8520_v3, 16 }
 0x179   :  { %v8720_v17 = vpack.c.b16 %v966_v27, %v965_v18  ;;  %v8722_v40 = vpack.c.b16 %v968_v31, %v967_v49  ;;  %v826_v1 = vmax.f32 %v754_v24, 0.0  ;;  %v755_v11 = vadd.f32 %v8628_v20, %v676_v29 }
 0x17a   :  { %v8725_v14 = vmax.f32 %v757_v50, 0.0  ;;  %v1205_v53 = vor.u32 %v10746_v59, %v1201_v7  ;;  %v1209_v61 = vrot.slane %v10747_v9, 1  ;;  %v969_v39 = vunpack.c.h.b16 %v863_v16 }
 0x17b   :  { %v827_v51 = vmax.f32 %v755_v11, 0.0  ;;  %v10748_v31 = vshrl.u32 %v8475_v36, 16  ;;  %v10631_v7 = vshrl.u32 %v8520_v3, 16  ;;  %v10630_v50 = vshll.u32 %v8517_v56, 16 }
 0x17c   :  { %v865_v10 = vpack.c.bf16 %v8725_v14, %v828_v5  ;;  %v1210_v20 = vsel %vm1046_vm2, %v1205_v53, %v1209_v61  ;;  %v1544_v5 = vrot.slane %v10749_v12, 2  ;;  %v10750_v16 = vshrl.u32 %v8477_v38, 16 }
 0x17d   :  { %v864_v18 = vpack.c.bf16 %v827_v51, %v826_v1  ;;  %v1543_v49 = vrot.slane %v10748_v31, 1  ;;  %v8744_v11 = vpack.c.bf16 %v8543_v19, %v8543_v19  ;;  %v10752_v9 = vshll.u32 %v8477_v38, 16 }
 0x17e   :  { %v972_v27 = vunpack.c.l.b16 %v865_v10  ;;  %v1547_v1 = vrot.slane %v10750_v16, 1  ;;  %v1230_v31 = vshll.u32 %v8569_v55, 16  ;;  %v1217_v19 = vrot.slane %v10630_v50, 1 }
 0x17f   :  { %2451 = vmatmul.mubr.bf16.gmra.mrb[64].mxu1 %v8496_v13  ;;  %v970_v24 = vunpack.c.l.b16 %v864_v18  ;;  %v971_v29 = vunpack.c.h.b16 %v864_v18  ;;  %10751 = vst [vmem:[#allocation22_spill] sm:$0xff] %v8744_v11  ;;  %v1548_v51 = vrot.slane %v10752_v9, 2  ;;  %v8752_v10 = vor.u32 %v1544_v5, %v1543_v49 }
 0x180   :  { %2460 = vmatprep.mubr.bf16.mxu1 %v1210_v20  ;;  %v1213_v18 = vor.u32 %v10631_v7, %v1209_v61  ;;  %v1228_v49 = vshrl.u32 %v8569_v55, 16  ;;  %v1235_v12 = vshll.u32 %v8592_v57, 16  ;;  %v10647_v38 = vshll.u32 %v8603_v26, 16 }
 0x181   :  { %v8746_v59 = vpack.c.b16 %v970_v24, %v969_v39  ;;  %v8748_v53 = vpack.c.b16 %v972_v27, %v971_v29  ;;  %v8757_v20 = vor.u32 %v1548_v51, %v1547_v1  ;;  %v10634_v39 = vshrl.u32 %v8517_v56, 16 }
 0x182   :  { %v10635_v27 = vshll.u32 %v8744_v11, 16  ;;  %v1218_v61 = vsel %vm1046_vm2, %v1213_v18, %v1217_v19  ;;  %v1232_v29 = vrot.slane %v1230_v31, 1  ;;  %v1243_v1 = vshll.u32 %v8594_v30, 16 }
 0x183   :  { %10753 = vst [vmem:[#allocation23_spill] sm:$0xff] %v8757_v20  ;;  %v8766_v24 = vsel %vm1472_vm3, %v8752_v10, %v8757_v20  ;;  %v1221_v5 = vor.u32 %v10634_v39, %v1217_v19  ;;  %v1239_v51 = vshrl.u32 %v8592_v57, 16  ;;  %v8780_v18 = vpack.c.bf16 %v8601_v21, %v8601_v21 }
 0x184   :  { %v1225_v16 = vrot.slane %v10635_v27, 1  ;;  %v1233_v9 = vor.u32 %v1232_v29, %v1228_v49  ;;  %v1237_v50 = vrot.slane %v1235_v12, 1  ;;  %v1578_v39 = vrot.slane %v1228_v49, 1 }
 0x185   :  { %v1579_v27 = vrot.slane %v1230_v31, 2  ;;  %v1581_v20 = vrot.slane %v1239_v51, 1  ;;  %v1582_v21 = vrot.slane %v1235_v12, 2  ;;  %v10754_v31 = vshrl.u32 %v8594_v30, 16 }
 0x186   :  { %v1238_v29 = vsel %vm1046_vm2, %v1233_v9, %v1237_v50  ;;  %v1241_v13 = vor.u32 %v1239_v51, %v1237_v50  ;;  %v10648_v9 = vshrl.u32 %v8647_v15, 16  ;;  %v10755_v12 = vshrl.u32 %v8633_v28, 16 }
 0x187   :  { %2461 = vmatmul.mubr.bf16.gmra.mrb[68].mxu1 %v8484_v52  ;;  %v8784_v52 = vrot.slane %v1243_v1, 1  ;;  %v1580_v7 = vor.u32 %v1579_v27, %v1578_v39  ;;  %v1583_v19 = vor.u32 %v1582_v21, %v1581_v20  ;;  %v1585_v49 = vrot.slane %v10754_v31, 1 }
 0x188   :  { %2470 = vmatprep.mubr.bf16.mxu1 %v1218_v61  ;;  %v1226_v61 = vsel %vm1046_vm2, %v1221_v5, %v1225_v16  ;;  %v10645_v5 = vshll.u32 %v8633_v28, 16  ;;  %v10646_v16 = vshll.u32 %v8780_v18, 16  ;;  %v8803_v39 = vpack.c.bf16 %v8662_v41, %v8662_v41 }
 0x189   :  { %v8807_v27 = vsel %vm1472_vm3, %v1580_v7, %v1583_v19  ;;  %v1593_v31 = vshrl.u32 %v8780_v18, 16  ;;  %v10758_v41 = vshrl.u32 %v8603_v26, 16  ;;  %v1600_v7 = vrot.slane %v10647_v38, 2 }
 0x18a   :  { %v1590_v50 = vrot.slane %v10645_v5, 2  ;;  %10756 = vst [vmem:[#allocation24_spill] sm:$0xff] %v8807_v27  ;;  %v10650_v38 = vshll.u32 %v8720_v17, 16 }
 0x18b   :  { %v1599_v20 = vrot.slane %v10758_v41, 1  ;;  %v10760_v41 = vshll.u32 %v8647_v15, 16 }
 0x18d   :  { %v1601_v5 = vor.u32 %v1600_v7, %v1599_v20  ;;  %v1603_v51 = vrot.slane %v10760_v41, 2  ;;  %v10763_v20 = vshrl.u32 %v8678_v2, 16  ;;  %v10765_v41 = vshll.u32 %v8678_v2, 16 }
 0x18f   :  { %2471 = vmatmul.mubr.bf16.gmra.mrb[72].mxu1 %v8520_v3  ;;  %v1586_v3 = vrot.slane %v1243_v1, 2  ;;  %v1610_v7 = vrot.slane %v10763_v20, 1 }
 0x190   :  { %2480 = vmatprep.mubr.bf16.mxu1 %v1226_v61  ;;  %v1589_v61 = vrot.slane %v10755_v12, 1  ;;  %v1596_v12 = vrot.slane %v10646_v16, 2  ;;  %v10649_v16 = vshrl.u32 %v8720_v17, 16 }
 0x191   :  { %v1587_v1 = vor.u32 %v1586_v3, %v1585_v49 }
 0x192   :  { %v1591_v21 = vor.u32 %v1590_v50, %v1589_v61  ;;  %v1595_v61 = vrot.slane %v1593_v31, 1  ;;  %v1602_v50 = vrot.slane %v10648_v9, 1 }
 0x193   :  { %v8815_v11 = vsel %vm1472_vm3, %v1583_v19, %v1587_v1 }
 0x194   :  { %10757 = vst [vmem:[#allocation25_spill] sm:$0xff] %v8815_v11  ;;  %v8823_v49 = vsel %vm1472_vm3, %v1587_v1, %v1591_v21  ;;  %v1597_v3 = vor.u32 %v1596_v12, %v1595_v61  ;;  %v10761_v1 = vshrl.u32 %v8644_v54, 16  ;;  %v1604_v27 = vor.u32 %v1603_v51, %v1602_v50 }
 0x195   :  { %10759 = vst [vmem:[#allocation26_spill] sm:$0xff] %v8823_v49  ;;  %v10762_v49 = vshll.u32 %v8644_v54, 16  ;;  %v1614_v51 = vshrl.u32 %v8803_v39, 16  ;;  %v10767_v50 = vshll.u32 %v8803_v39, 16 }
 0x196   :  { %v1606_v31 = vrot.slane %v10761_v1, 1  ;;  %v8846_v12 = vsel %vm1472_vm3, %v1591_v21, %v1597_v3  ;;  %v1611_v1 = vrot.slane %v10765_v41, 2  ;;  %v8852_v11 = vsel %vm1472_vm3, %v1601_v5, %v1604_v27 }
 0x197   :  { %2481 = vmatmul.mubr.bf16.gmra.mrb[76].mxu1 %v8517_v56  ;;  %v1607_v9 = vrot.slane %v10762_v49, 2  ;;  %10764 = vst [vmem:[#allocation27_spill] sm:$0xff] %v8846_v12  ;;  %10766 = vst [vmem:[#allocation28_spill] sm:$0xff] %v8852_v11  ;;  %v1617_v20 = vrot.slane %v10767_v50, 2  ;;  %v1616_v3 = vrot.slane %v1614_v51, 1  ;;  %v1621_v5 = vrot.slane %v10650_v38, 2 }
 0x198   :  { %2490 = vmatprep.mubr.bf16.mxu1 %v1238_v29  ;;  %v8843_v29 = vpack.c.bf16 %v8725_v14, %v8725_v14  ;;  %v10769_v41 = vshrl.u32 %v8722_v40, 16  ;;  %v1246_v50 = vsel %vm1046_vm2, %v1241_v13, %v8784_v52  ;;  %v1315_v14 = vshll.u32 %v8746_v59, 16 }
 0x199   :  { %v1608_v61 = vor.u32 %v1607_v9, %v1606_v31  ;;  %v1612_v9 = vor.u32 %v1611_v1, %v1610_v7  ;;  %v1620_v31 = vrot.slane %v10649_v16, 1  ;;  %v1618_v51 = vor.u32 %v1617_v20, %v1616_v3 }
 0x19a   :  { %v1623_v49 = vrot.slane %v10769_v41, 1  ;;  %v1331_v1 = vshll.u32 %v8843_v29, 16  ;;  %v10772_v38 = vshrl.u32 %v8746_v59, 16  ;;  %v1628_v13 = vrot.slane %v1315_v14, 2 }
 0x19b   :  { %v8860_v21 = vsel %vm1472_vm3, %v1604_v27, %v1608_v61  ;;  %v8872_v19 = vsel %vm1472_vm3, %v1608_v61, %v1612_v9  ;;  %v10771_v27 = vshll.u32 %v8722_v40, 16  ;;  %v1622_v16 = vor.u32 %v1621_v5, %v1620_v31 }
 0x19c   :  { %10768 = vst [vmem:[#allocation29_spill] sm:$0xff] %v8860_v21  ;;  %10770 = vst [vmem:[#allocation30_spill] sm:$0xff] %v8872_v19  ;;  %v1627_v41 = vrot.slane %v10772_v38, 1  ;;  %v10773_v11 = vshrl.u32 %v8748_v53, 16  ;;  %v8883_v61 = vsel %vm1472_vm3, %v1612_v9, %v1618_v51  ;;  %v1635_v3 = vshrl.u32 %v8843_v29, 16 }
 0x19d   :  { %v1624_v7 = vrot.slane %v10771_v27, 2  ;;  %v10774_v27 = vshll.u32 %v8748_v53, 16  ;;  %v10775_v38 = vshrl.u32 %v8594_v30, 16 }
 0x19e   :  { %v1631_v12 = vrot.slane %v10773_v11, 1  ;;  %v1629_v20 = vor.u32 %v1628_v13, %v1627_v41  ;;  %v1638_v11 = vrot.slane %v1331_v1, 2  ;;  %v1637_v5 = vrot.slane %v1635_v3, 1 }
 0x19f   :  { %2491 = vmatmul.mubr.bf16.gmra.mrb[80].mxu1 %v8569_v55  ;;  %v1625_v21 = vor.u32 %v1624_v7, %v1623_v49  ;;  %v1632_v19 = vrot.slane %v10774_v27, 2  ;;  %v1249_v49 = vor.u32 %v10775_v38, %v8784_v52  ;;  %v10780_v38 = vshrl.u32 %v8603_v26, 16 }
 0x1a0   :  { %2500 = vmatprep.mubr.bf16.mxu1 %v1246_v50  ;;  %v10776_v50 = vshll.u32 %v8633_v28, 16  ;;  %v1639_v51 = vor.u32 %v1638_v11, %v1637_v5 }
 0x1a1   :  { %v8888_v55 = vsel %vm1472_vm3, %v1622_v16, %v1625_v21  ;;  %v1633_v31 = vor.u32 %v1632_v19, %v1631_v12  ;;  %v8897_v9 = vsel %vm1472_vm3, %v1625_v21, %v1629_v20  ;;  %v10777_v19 = vshrl.u32 %v8633_v28, 16 }
 0x1a2   :  { %v1253_v7 = vrot.slane %v10776_v50, 1  ;;  %v10778_v21 = vshll.u32 %v8780_v18, 16  ;;  %v10782_v50 = vshrl.u32 %v8647_v15, 16 }
 0x1a3   :  { %v8902_v16 = vsel %vm1472_vm3, %v1629_v20, %v1633_v31  ;;  %v8907_v52 = vsel %vm1472_vm3, %v1633_v31, %v1639_v51  ;;  %v10779_v20 = vshll.u32 %v8603_v26, 16  ;;  %v10781_v31 = vshll.u32 %v8647_v15, 16 }
 0x1a4   :  { %v1254_v41 = vsel %vm1046_vm2, %v1249_v49, %v1253_v7  ;;  %v1257_v12 = vor.u32 %v10777_v19, %v1253_v7  ;;  %v1261_v13 = vrot.slane %v10778_v21, 1  ;;  %v10783_v51 = vshll.u32 %v8644_v54, 16 }
 0x1a5   :  { %v1268_v3 = vrot.slane %v10779_v20, 1  ;;  %v1273_v11 = vrot.slane %v10781_v31, 1 }
 0x1a6   :  { %v1262_v27 = vsel %vm1046_vm2, %v1257_v12, %v1261_v13  ;;  %v10784_v12 = vshrl.u32 %v8644_v54, 16  ;;  %v10785_v13 = vshll.u32 %v8678_v2, 16 }
 0x1a7   :  { %2501 = vmatmul.mubr.bf16.gmra.mrb[84].mxu1 %v8592_v57  ;;  %v1269_v49 = vor.u32 %v1268_v3, %v10780_v38  ;;  %v1277_v7 = vor.u32 %v10782_v50, %v1273_v11  ;;  %v10786_v3 = vshrl.u32 %v8678_v2, 16 }
 0x1a8   :  { %2510 = vmatprep.mubr.bf16.mxu1 %v1254_v41  ;;  %v1281_v41 = vrot.slane %v10783_v51, 1 }
 0x1a9   :  { %v1274_v5 = vsel %vm1046_vm2, %v1269_v49, %v1273_v11  ;;  %v10787_v49 = vshll.u32 %v8803_v39, 16 }
 0x1aa   :  { %v1282_v19 = vsel %vm1046_vm2, %v1277_v7, %v1281_v41  ;;  %v1285_v21 = vor.u32 %v10784_v12, %v1281_v41  ;;  %v10789_v7 = vshrl.u32 %v8720_v17, 16  ;;  %v10790_v41 = vshll.u32 %v8722_v40, 16 }
 0x1ab   :  { %v1297_v31 = vrot.slane %v10787_v49, 1  ;;  %v10793_v49 = vshll.u32 %v8748_v53, 16 }
 0x1af   :  { %2511 = vmatmul.mubr.bf16.gmra.mrb[88].mxu1 %v8594_v30 }
 0x1b0   :  { %2520 = vmatprep.mubr.bf16.mxu1 %v1262_v27  ;;  %v1289_v27 = vrot.slane %v10785_v13, 1 }
 0x1b2   :  { %v1290_v20 = vsel %vm1046_vm2, %v1285_v21, %v1289_v27  ;;  %v1293_v38 = vor.u32 %v10786_v3, %v1289_v27  ;;  %v10791_v21 = vshrl.u32 %v8722_v40, 16  ;;  %v1317_v27 = vrot.slane %v1315_v14, 1 }
 0x1b3   :  { %v10792_v3 = vshrl.u32 %v8746_v59, 16  ;;  %v1333_v14 = vrot.slane %v1331_v1, 1  ;;  %v7764_v1 = vld [vmem:[#allocation2 + $0x210] ss:$8 sps:$4 sm:$0xff]  }
 0x1b4   :  { %v1298_v11 = vsel %vm1046_vm2, %v1293_v38, %v1297_v31  ;;  %v1325_v31 = vrot.slane %v10793_v49, 1  ;;  %v7775_v49 = vld [vmem:[#allocation2 + $0x244] ss:$8 sps:$4 sm:$0xff]  }
 0x1b5   :  { %v1321_v38 = vor.u32 %v10792_v3, %v1317_v27 }
 0x1b7   :  { %2521 = vmatmul.mubr.bf16.gmra.mrb[92].mxu1 %v8633_v28 }
 0x1b8   :  { %2530 = vmatprep.mubr.bf16.mxu1 %v1274_v5  ;;  %v10788_v5 = vshll.u32 %v8720_v17, 16 }
 0x1ba   :  { %v1304_v50 = vrot.slane %v10788_v5, 1  ;;  %v10794_v5 = vshrl.u32 %v8748_v53, 16 }
 0x1bc   :  { %v1305_v51 = vor.u32 %v1304_v50, %v10789_v7  ;;  %v1329_v50 = vor.u32 %v10794_v5, %v1325_v31  ;;  %v1375_v5 = vrot.slane %v8284_v32, 1 }
 0x1be   :  { %v1334_v7 = vsel %vm1046_vm2, %v1329_v50, %v1333_v14  ;;  %v7778_v14 = vld [vmem:[#allocation2 + $0x254] ss:$8 sps:$4 sm:$0xff]  }
 0x1bf   :  { %2531 = vmatmul.mubr.bf16.gmra.mrb[96].mxu1 %v8603_v26 }
 0x1c0   :  { %2540 = vmatprep.mubr.bf16.mxu1 %v1282_v19  ;;  %v1309_v19 = vrot.slane %v10790_v41, 1  ;;  %v1369_v41 = vrot.slane %v8248_v34, 1 }
 0x1c2   :  { %v1310_v12 = vsel %vm1046_vm2, %v1305_v51, %v1309_v19  ;;  %v1313_v13 = vor.u32 %v10791_v21, %v1309_v19  ;;  %v1368_v51 = vrot.slane %v8251_v37, 1  ;;  %v7761_v19 = vld [vmem:[#allocation2 + $0x200] ss:$8 sps:$4 sm:$0xff]  }
 0x1c4   :  { %v1370_v21 = vsel %vm1367_vm4, %v1368_v51, %v1369_v41  ;;  %v1377_v51 = vrot.slane %v8307_v0, 1 }
 0x1c7   :  { %2541 = vmatmul.mubr.bf16.gmra.mrb[100].mxu1 %v8647_v15 }
 0x1c8   :  { %2550 = vmatprep.mubr.bf16.mxu1 %v1290_v20  ;;  %v1318_v20 = vsel %vm1046_vm2, %v1313_v13, %v1317_v27  ;;  %v7769_v13 = vld [vmem:[#allocation2 + $0x224] ss:$8 sps:$4 sm:$0xff]   ;;  %v1371_v27 = vrot.slane %v8267_v4, 1 }
 0x1ca   :  { %v1372_v3 = vsel %vm1367_vm4, %v1369_v41, %v1371_v27 }
 0x1cf   :  { %2551 = vmatmul.mubr.bf16.gmra.mrb[104].mxu1 %v8644_v54 }
 0x1d0   :  { %2560 = vmatprep.mubr.bf16.mxu1 %v1298_v11  ;;  %v1326_v11 = vsel %vm1046_vm2, %v1321_v38, %v1325_v31  ;;  %v7770_v38 = vld [vmem:[#allocation2 + $0x230] ss:$8 sps:$4 sm:$0xff]   ;;  %v7773_v31 = vld [vmem:[#allocation2 + $0x240] ss:$8 sps:$4 sm:$0xff]  }
 0x1d7   :  { %2561 = vmatmul.mubr.bf16.gmra.mrb[108].mxu1 %v8678_v2 }
 0x1d8   :  { %2570 = vmatprep.mubr.bf16.mxu1 %v1310_v12  ;;  %v7766_v12 = vld [vmem:[#allocation2 + $0x214] ss:$8 sps:$4 sm:$0xff]  }
 0x1df   :  { %2571 = vmatmul.mubr.bf16.gmra.mrb[112].mxu1 %v8720_v17 }
 0x1e0   :  { %2580 = vmatprep.mubr.bf16.mxu1 %v1318_v20  ;;  %v7772_v20 = vld [vmem:[#allocation2 + $0x234] ss:$8 sps:$4 sm:$0xff]  }
 0x1e7   :  { %2581 = vmatmul.mubr.bf16.gmra.mrb[116].mxu1 %v8722_v40 }
 0x1e8   :  { %2590 = vmatprep.mubr.bf16.mxu1 %v1326_v11 }
 0x1ef   :  { %2591 = vmatmul.mubr.bf16.gmra.mrb[120].mxu1 %v8746_v59 }
 0x1f0   :  { %2600 = vmatprep.mubr.bf16.mxu1 %v1334_v7  ;;  %v1378_v7 = vrot.slane %v8337_v46, 1 }
 0x1f2   :  { %v1379_v41 = vsel %vm1367_vm4, %v1377_v51, %v1378_v7  ;;  %v10801_v51 = vld [vmem:[#allocation11_spill] sm:$0xff] }
 0x1f7   :  { %2601 = vmatmul.mubr.bf16.gmra.mrb[124].mxu1 %v8748_v53 }
 0x1f8   :  { %2643 = vmatprep.mubr.bf16.mxu1 %v8280_v23  ;;  %v7767_v23 = vld [vmem:[#allocation2 + $0x220] ss:$8 sps:$4 sm:$0xff]  }
 0x1ff   :  { %2644 = vmatmul.mubr.bf16.vlgmr.msra.gmra.mrb[0].mxu1 %v1370_v21  ;;  %v1384_v21 = vrot.slane %v8398_v6, 1 }
 0x200   :  { %2965 = vmatpush1.bf16.msra.mxu1 %v7761_v19  ;;  %2653 = vmatprep.mubr.bf16.mxu1 %v8305_v62  ;;  %v1373_v62 = vrot.slane %v8264_v63, 1 }
 0x201   :  { %2966 = vmatprep.subr.bf16.mxu1 %v7766_v12 }
 0x202   :  { %v1374_v11 = vsel %vm1367_vm4, %v1371_v27, %v1373_v62  ;;  %v1376_v50 = vsel %vm1367_vm4, %v1373_v62, %v1375_v5  ;;  %v1386_v27 = vrot.slane %v8348_v58, 1  ;;  %v10799_v5 = vld [vmem:[#allocation9_spill] sm:$0xff] }
 0x204   :  { %2967 = vmatpush1.bf16.msra.mxu1 %v7764_v1 }
 0x205   :  { %2968 = vmatprep.subr.bf16.mxu1 %v7769_v13  ;;  %v7781_v13 = vld [vmem:[#allocation2 + $0x264] ss:$8 sps:$4 sm:$0xff]  }
 0x207   :  { %2654 = vmatmul.mubr.bf16.gmra.mrb[4].mxu1 %v1372_v3  ;;  %v10796_v3 = vld [vmem:[#allocation15_spill] sm:$0xff] }
 0x208   :  { %2663 = vmatprep.mubr.bf16.mxu1 %v8335_v45  ;;  %2969 = vmatpush1.bf16.msra.mxu1 %v7767_v23  ;;  %v7776_v45 = vld [vmem:[#allocation2 + $0x250] ss:$8 sps:$4 sm:$0xff]   ;;  %v10797_v62 = vshll.u32 %v10796_v3, 16 }
 0x209   :  { %2970 = vmatprep.subr.bf16.mxu1 %v7772_v20 }
 0x20c   :  { %2971 = vmatpush1.bf16.msra.mxu1 %v7770_v38  ;;  %v1530_v38 = vshrl.u32 %v10796_v3, 16 }
 0x20d   :  { %2972 = vmatprep.subr.bf16.mxu1 %v7775_v49 }
 0x20f   :  { %2664 = vmatmul.mubr.bf16.gmra.mrb[8].mxu1 %v1374_v11  ;;  %v10798_v11 = vld [vmem:[#allocation20_spill] sm:$0xff] }
 0x210   :  { %2673 = vmatprep.mubr.bf16.mxu1 %v8373_v35  ;;  %2973 = vmatpush1.bf16.msra.mxu1 %v7773_v31  ;;  %v1380_v35 = vrot.slane %v8339_v47, 1  ;;  %v1533_v31 = vrot.slane %v10797_v62, 2 }
 0x211   :  { %2974 = vmatprep.subr.bf16.mxu1 %v7778_v14 }
 0x212   :  { %v1381_v19 = vsel %vm1367_vm4, %v1378_v7, %v1380_v35 }
 0x214   :  { %2975 = vmatpush1.bf16.msra.mxu1 %v7776_v45 }
 0x215   :  { %2976 = vmatprep.subr.bf16.mxu1 %v7781_v13 }
 0x217   :  { %2674 = vmatmul.mubr.bf16.gmra.mrb[12].mxu1 %v1376_v50  ;;  %v1391_v50 = vrot.slane %v10799_v5, 1 }
 0x218   :  { %2683 = vmatprep.mubr.bf16.mxu1 %v8426_v60  ;;  %v1382_v60 = vrot.slane %v8366_v25, 1 }
 0x21a   :  { %v1383_v12 = vsel %vm1367_vm4, %v1380_v35, %v1382_v60  ;;  %v1385_v1 = vsel %vm1367_vm4, %v1382_v60, %v1384_v21 }
 0x21f   :  { %2684 = vmatmul.mubr.bf16.gmra.mrb[16].mxu1 %v1379_v41  ;;  %v10802_v41 = vshrl.u32 %v10801_v51, 16 }
 0x220   :  { %2693 = vmatprep.mubr.bf16.mxu1 %v8448_v33  ;;  %v7779_v33 = vld [vmem:[#allocation2 + $0x260] ss:$8 sps:$4 sm:$0xff]  }
 0x221   :  { %2977 = vmatpush1.bf16.msra.mxu1 %v7779_v33  ;;  %v1539_v35 = vrot.slane %v10802_v41, 1  ;;  %v10804_v33 = vld [vmem:[#allocation21_spill] sm:$0xff] }
 0x222   :  { %v10805_v13 = vor.u32 %v8705_v42, %v10804_v33  ;;  %v1398_v42 = vrot.slane %v8475_v36, 1 }
 0x227   :  { %2694 = vmatmul.mubr.bf16.gmra.mrb[20].mxu1 %v1381_v19  ;;  %v10803_v19 = vshll.u32 %v10801_v51, 16 }
 0x228   :  { %2703 = vmatprep.mubr.bf16.mxu1 %v8490_v48  ;;  %v1387_v48 = vrot.slane %v8378_v44, 1 }
 0x229   :  { %v1540_v60 = vrot.slane %v10803_v19, 2 }
 0x22a   :  { %v1388_v23 = vsel %vm1367_vm4, %v1386_v27, %v1387_v48 }
 0x22b   :  { %v1541_v21 = vor.u32 %v1540_v60, %v1539_v35 }
 0x22d   :  { %v1542_v27 = vsel %vm1472_vm3, %v10805_v13, %v1541_v21  ;;  %v1546_v62 = vsel %vm1472_vm3, %v1541_v21, %v8752_v10  ;;  %v10810_v10 = vld [vmem:[#allocation14_spill] sm:$0xff]  ;;  %v10812_v21 = vld [vmem:[#allocation23_spill] sm:$0xff] }
 0x22e   :  { %v10811_v60 = vshrl.u32 %v10810_v10, 16  ;;  %v10813_v33 = vshll.u32 %v10810_v10, 16 }
 0x22f   :  { %2704 = vmatmul.mubr.bf16.gmra.mrb[24].mxu1 %v1383_v12  ;;  %v1393_v12 = vrot.slane %v10796_v3, 1 }
 0x230   :  { %2713 = vmatprep.mubr.bf16.mxu1 %v8550_v8  ;;  %v10795_v8 = vld [vmem:[#allocation8_spill] sm:$0xff]  ;;  %v1558_v13 = vrot.slane %v10813_v33, 2  ;;  %v10820_v33 = vshrl.u32 %v8517_v56, 16 }
 0x231   :  { %v1389_v20 = vrot.slane %v10795_v8, 1 }
 0x233   :  { %v1390_v49 = vsel %vm1367_vm4, %v1387_v48, %v1389_v20  ;;  %v1392_v14 = vsel %vm1367_vm4, %v1389_v20, %v1391_v50  ;;  %v7782_v48 = vld [vmem:[#allocation2 + $0x270] ss:$8 sps:$4 sm:$0xff]  }
 0x234   :  { %v10806_v20 = vld [vmem:[#allocation10_spill] sm:$0xff] }
 0x237   :  { %2714 = vmatmul.mubr.bf16.gmra.mrb[28].mxu1 %v1385_v1  ;;  %v1394_v1 = vsel %vm1367_vm4, %v1391_v50, %v1393_v12  ;;  %v1557_v12 = vrot.slane %v10811_v60, 1  ;;  %v1404_v60 = vrot.slane %v10810_v10, 1 }
 0x238   :  { %2723 = vmatprep.mubr.bf16.mxu1 %v8590_v22  ;;  %v1532_v22 = vrot.slane %v1530_v38, 1  ;;  %v1395_v38 = vrot.slane %v10806_v20, 1 }
 0x23a   :  { %v1534_v45 = vor.u32 %v1533_v31, %v1532_v22  ;;  %v10807_v31 = vld [vmem:[#allocation18_spill] sm:$0xff] }
 0x23f   :  { %2724 = vmatmul.mubr.bf16.gmra.mrb[32].mxu1 %v1388_v23  ;;  %v7784_v23 = vld [vmem:[#allocation2 + $0x274] ss:$8 sps:$4 sm:$0xff]  }
 0x240   :  { %2733 = vmatprep.mubr.bf16.mxu1 %v8608_v43  ;;  %v10800_v43 = vld [vmem:[#allocation19_spill] sm:$0xff]  ;;  %2978 = vmatprep.subr.bf16.mxu1 %v7784_v23 }
 0x241   :  { %v1535_v7 = vsel %vm1472_vm3, %v10800_v43, %v1534_v45  ;;  %2979 = vmatpush1.bf16.msra.mxu1 %v7782_v48 }
 0x247   :  { %2734 = vmatmul.mubr.bf16.gmra.mrb[36].mxu1 %v1390_v49  ;;  %v1396_v49 = vrot.slane %v10801_v51, 1 }
 0x248   :  { %2743 = vmatprep.mubr.bf16.mxu1 %v10798_v11  ;;  %v1551_v11 = vshrl.u32 %v10807_v31, 16 }
 0x249   :  { %v1397_v22 = vsel %vm1367_vm4, %v1395_v38, %v1396_v49  ;;  %v1399_v50 = vsel %vm1367_vm4, %v1396_v49, %v1398_v42  ;;  %v1402_v49 = vrot.slane %v10807_v31, 1 }
 0x24a   :  { %v1553_v45 = vrot.slane %v1551_v11, 1 }
 0x24f   :  { %2744 = vmatmul.mubr.bf16.gmra.mrb[40].mxu1 %v1392_v14  ;;  %v10808_v14 = vshll.u32 %v10807_v31, 16 }
 0x250   :  { %2753 = vmatprep.mubr.bf16.mxu1 %v1535_v7  ;;  %v10809_v7 = vld [vmem:[#allocation12_spill] sm:$0xff] }
 0x251   :  { %v1554_v43 = vrot.slane %v10808_v14, 2  ;;  %v1400_v41 = vrot.slane %v10809_v7, 1 }
 0x253   :  { %v1555_v35 = vor.u32 %v1554_v43, %v1553_v45  ;;  %v1401_v19 = vsel %vm1367_vm4, %v1398_v42, %v1400_v41  ;;  %v1403_v42 = vsel %vm1367_vm4, %v1400_v41, %v1402_v49  ;;  %v10822_v49 = vld [vmem:[#allocation22_spill] sm:$0xff] }
 0x257   :  { %2754 = vmatmul.mubr.bf16.gmra.mrb[44].mxu1 %v1394_v1  ;;  %v1556_v1 = vsel %vm1472_vm3, %v10812_v21, %v1555_v35 }
 0x258   :  { %2763 = vmatprep.mubr.bf16.mxu1 %v1542_v27  ;;  %v10814_v27 = vld [vmem:[#allocation13_spill] sm:$0xff] }
 0x259   :  { %v10815_v48 = vshrl.u32 %v10814_v27, 16 }
 0x25b   :  { %v1560_v23 = vrot.slane %v10815_v48, 1  ;;  %v10821_v48 = vshll.u32 %v8517_v56, 16 }
 0x25f   :  { %2764 = vmatmul.mubr.bf16.gmra.mrb[48].mxu1 %v1397_v22  ;;  %v1559_v22 = vor.u32 %v1558_v13, %v1557_v12  ;;  %v1405_v12 = vrot.slane %v10814_v27, 1  ;;  %v1568_v13 = vrot.slane %v10820_v33, 1  ;;  %v10825_v33 = vld [vmem:[#allocation17_spill] sm:$0xff] }
 0x260   :  { %2773 = vmatprep.mubr.bf16.mxu1 %v1546_v62 }
 0x261   :  { %v1406_v41 = vsel %vm1367_vm4, %v1404_v60, %v1405_v12 }
 0x267   :  { %2774 = vmatmul.mubr.bf16.gmra.mrb[52].mxu1 %v1399_v50  ;;  %v10817_v50 = vld [vmem:[#allocation16_spill] sm:$0xff] }
 0x268   :  { %2783 = vmatprep.mubr.bf16.mxu1 %v8766_v24  ;;  %v10816_v24 = vshll.u32 %v10814_v27, 16  ;;  %v10818_v45 = vshrl.u32 %v10817_v50, 16  ;;  %v10819_v43 = vshll.u32 %v10817_v50, 16 }
 0x26a   :  { %v1561_v38 = vrot.slane %v10816_v24, 2  ;;  %v1564_v14 = vrot.slane %v10818_v45, 1  ;;  %v1565_v35 = vrot.slane %v10819_v43, 2  ;;  %v1407_v24 = vrot.slane %v10817_v50, 1 }
 0x26b   :  { %v1409_v43 = vrot.slane %v8517_v56, 1 }
 0x26c   :  { %v1562_v62 = vor.u32 %v1561_v38, %v1560_v23  ;;  %v1566_v21 = vor.u32 %v1565_v35, %v1564_v14  ;;  %v1569_v23 = vrot.slane %v10821_v48, 2  ;;  %v1414_v48 = vrot.slane %v8592_v57, 1 }
 0x26d   :  { %v1410_v60 = vsel %vm1367_vm4, %v1407_v24, %v1409_v43 }
 0x26e   :  { %v1563_v11 = vsel %vm1472_vm3, %v1559_v22, %v1562_v62  ;;  %v1570_v38 = vor.u32 %v1569_v23, %v1568_v13  ;;  %v1572_v22 = vshrl.u32 %v10822_v49, 16  ;;  %v1413_v13 = vrot.slane %v10825_v33, 1 }
 0x26f   :  { %2784 = vmatmul.mubr.bf16.gmra.mrb[56].mxu1 %v1401_v19  ;;  %v10655_v19 = vmov 0  }
 0x270   :  { %2793 = vmatprep.mubr.bf16.mxu1 %v1556_v1  ;;  %5517 = vmatprep.subr.bf16.mxu0 %v10655_v19  ;;  %v1567_v1 = vsel %vm1472_vm3, %v1562_v62, %v1566_v21  ;;  %v1574_v45 = vrot.slane %v1572_v22, 1  ;;  %v10823_v62 = vshll.u32 %v10822_v49, 16  ;;  %v1415_v23 = vsel %vm1367_vm4, %v1413_v13, %v1414_v48  ;;  %v10826_v22 = vld [vmem:[#allocation25_spill] sm:$0xff] }
 0x272   :  { %v1575_v14 = vrot.slane %v10823_v62, 2  ;;  %v10828_v62 = vld [vmem:[#allocation27_spill] sm:$0xff] }
 0x274   :  { %v1576_v35 = vor.u32 %v1575_v14, %v1574_v45  ;;  %v1420_v14 = vrot.slane %v8780_v18, 1 }
 0x277   :  { %2794 = vmatmul.mubr.bf16.gmra.mrb[60].mxu1 %v1403_v42  ;;  %v1408_v42 = vsel %vm1367_vm4, %v1405_v12, %v1407_v24  ;;  %v1416_v24 = vrot.slane %v8594_v30, 1 }
 0x278   :  { %2803 = vmatprep.mubr.bf16.mxu1 %v1563_v11  ;;  %v1571_v11 = vsel %vm1472_vm3, %v1566_v21, %v1570_v38  ;;  %v10824_v21 = vld [vmem:[#allocation24_spill] sm:$0xff] }
 0x27f   :  { %2804 = vmatmul.mubr.bf16.gmra.mrb[64].mxu1 %v1406_v41  ;;  %v1577_v41 = vsel %vm1472_vm3, %v1570_v38, %v1576_v35  ;;  %v1417_v38 = vsel %vm1367_vm4, %v1414_v48, %v1416_v24  ;;  %v10829_v35 = vld [vmem:[#allocation28_spill] sm:$0xff]  ;;  %v10831_v48 = vld [vmem:[#allocation30_spill] sm:$0xff] }
 0x280   :  { %2813 = vmatprep.mubr.bf16.mxu1 %v1567_v1  ;;  %v1411_v1 = vrot.slane %v10822_v49, 1 }
 0x282   :  { %v1412_v12 = vsel %vm1367_vm4, %v1409_v43, %v1411_v1 }
 0x287   :  { %2814 = vmatmul.mubr.bf16.gmra.mrb[68].mxu1 %v1408_v42  ;;  %v10827_v42 = vld [vmem:[#allocation26_spill] sm:$0xff] }
 0x288   :  { %2823 = vmatprep.mubr.bf16.mxu1 %v1571_v11  ;;  %v1418_v11 = vrot.slane %v8633_v28, 1 }
 0x28a   :  { %v1419_v45 = vsel %vm1367_vm4, %v1416_v24, %v1418_v11  ;;  %v1421_v43 = vsel %vm1367_vm4, %v1418_v11, %v1420_v14  ;;  %v1429_v24 = vrot.slane %v8803_v39, 1  ;;  %v1432_v11 = vrot.slane %v8722_v40, 1 }
 0x28b   :  { %v1436_v14 = vrot.slane %v8748_v53, 1 }
 0x28f   :  { %2824 = vmatmul.mubr.bf16.gmra.mrb[72].mxu1 %v1410_v60  ;;  %v1422_v60 = vrot.slane %v8603_v26, 1 }
 0x290   :  { %2833 = vmatprep.mubr.bf16.mxu1 %v1577_v41  ;;  %v1423_v41 = vrot.slane %v8647_v15, 1 }
 0x292   :  { %v1424_v1 = vsel %vm1367_vm4, %v1422_v60, %v1423_v41  ;;  %v1674_v60 = vrot.slane %v8251_v37, 2 }
 0x297   :  { %2834 = vmatmul.mubr.bf16.gmra.mrb[76].mxu1 %v1412_v12  ;;  %v10830_v12 = vld [vmem:[#allocation29_spill] sm:$0xff] }
 0x298   :  { %2843 = vmatprep.mubr.bf16.mxu1 %v10824_v21  ;;  %v1425_v21 = vrot.slane %v8644_v54, 1 }
 0x29a   :  { %v1426_v13 = vsel %vm1367_vm4, %v1423_v41, %v1425_v21  ;;  %v1675_v41 = vrot.slane %v8248_v34, 2  ;;  %v7788_v34 = vld [vmem:[%s10597_s7 + $0x18] sm:$0xff]  }
 0x29f   :  { %2844 = vmatmul.mubr.bf16.gmra.mrb[80].mxu1 %v1415_v23  ;;  %v1427_v23 = vrot.slane %v8678_v2, 1 }
 0x2a0   :  { %2853 = vmatprep.mubr.bf16.mxu1 %v10826_v22 }
 0x2a1   :  { %v1428_v22 = vsel %vm1367_vm4, %v1425_v21, %v1427_v23  ;;  %v1679_v21 = vrot.slane %v8264_v63, 2  ;;  %v1684_v63 = vrot.slane %v8337_v46, 2 }
 0x2a7   :  { %2854 = vmatmul.mubr.bf16.gmra.mrb[84].mxu1 %v1417_v38  ;;  %v1430_v38 = vsel %vm1367_vm4, %v1427_v23, %v1429_v24  ;;  %v7789_v23 = vld [vmem:[%s10597_s7 + $0x20] sm:$0xff]  }
 0x2a8   :  { %2863 = vmatprep.mubr.bf16.mxu1 %v10827_v42  ;;  %v1431_v42 = vrot.slane %v8720_v17, 1 }
 0x2af   :  { %2864 = vmatmul.mubr.bf16.gmra.mrb[88].mxu1 %v1419_v45  ;;  %v1433_v45 = vsel %vm1367_vm4, %v1431_v42, %v1432_v11  ;;  %v1688_v42 = vrot.slane %v8366_v25, 2  ;;  %v7793_v25 = vld [vmem:[%s10597_s7 + $0x40] sm:$0xff]  }
 0x2b0   :  { %2873 = vmatprep.mubr.bf16.mxu1 %v10828_v62  ;;  %v1434_v62 = vrot.slane %v8746_v59, 1 }
 0x2b7   :  { %2874 = vmatmul.mubr.bf16.gmra.mrb[92].mxu1 %v1421_v43  ;;  %v7785_v43 = vld [vmem:[%s10597_s7] sm:$0xff]  }
 0x2b8   :  { %2883 = vmatprep.mubr.bf16.mxu1 %v10829_v35  ;;  %5518 = vmatpush1.bf16.msra.mxu0 %v7785_v43  ;;  %v1695_v43 = vrot.slane %v10795_v8, 2 }
 0x2b9   :  { %5519 = vmatprep.subr.bf16.mxu0 %v10655_v19 }
 0x2bf   :  { %2884 = vmatmul.mubr.bf16.gmra.mrb[96].mxu1 %v1424_v1  ;;  %v7787_v1 = vld [vmem:[%s10597_s7 + $0x10] sm:$0xff]  }
 0x2c0   :  { %2893 = vmatprep.mubr.bf16.mxu1 %v10830_v12  ;;  %v1677_v12 = vrot.slane %v8267_v4, 2  ;;  %v1681_v4 = vrot.slane %v8284_v32, 2  ;;  %v7790_v32 = vld [vmem:[%s10597_s7 + $0x28] sm:$0xff]  }
 0x2c2   :  { %v1678_v37 = vsel %vm1673_vm5, %v1675_v41, %v1677_v12 }
 0x2c7   :  { %2894 = vmatmul.mubr.bf16.gmra.mrb[100].mxu1 %v1426_v13  ;;  %v1680_v13 = vsel %vm1673_vm5, %v1677_v12, %v1679_v21 }
 0x2c8   :  { %2903 = vmatprep.mubr.bf16.mxu1 %v10831_v48  ;;  %v1682_v48 = vsel %vm1673_vm5, %v1679_v21, %v1681_v4  ;;  %v1710_v4 = vrot.slane %v10810_v10, 2  ;;  %v1717_v10 = vrot.slane %v10822_v49, 2  ;;  %v1724_v49 = vrot.slane %v8633_v28, 2 }
 0x2c9   :  { %v1731_v28 = vrot.slane %v8644_v54, 2 }
 0x2cf   :  { %2904 = vmatmul.mubr.bf16.gmra.mrb[104].mxu1 %v1428_v22  ;;  %v1683_v22 = vrot.slane %v8307_v0, 2  ;;  %v7791_v0 = vld [vmem:[%s10597_s7 + $0x30] sm:$0xff]  }
 0x2d0   :  { %2913 = vmatprep.mubr.bf16.mxu1 %v8883_v61  ;;  %v1435_v61 = vsel %vm1367_vm4, %v1432_v11, %v1434_v62 }
 0x2d1   :  { %v1685_v24 = vsel %vm1673_vm5, %v1683_v22, %v1684_v63 }
 0x2d7   :  { %2914 = vmatmul.mubr.bf16.gmra.mrb[108].mxu1 %v1430_v38  ;;  %v1686_v38 = vrot.slane %v8339_v47, 2  ;;  %v7792_v47 = vld [vmem:[%s10597_s7 + $0x38] sm:$0xff]  }
 0x2d8   :  { %2923 = vmatprep.mubr.bf16.mxu1 %v8888_v55  ;;  %v1437_v55 = vsel %vm1367_vm4, %v1434_v62, %v1436_v14 }
 0x2d9   :  { %v1687_v46 = vsel %vm1673_vm5, %v1684_v63, %v1686_v38  ;;  %v1689_v11 = vsel %vm1673_vm5, %v1686_v38, %v1688_v42 }
 0x2df   :  { %2924 = vmatmul.mubr.bf16.gmra.mrb[112].mxu1 %v1433_v45  ;;  %v1690_v45 = vrot.slane %v8398_v6, 2 }
 0x2e0   :  { %2933 = vmatprep.mubr.bf16.mxu1 %v8897_v9  ;;  %v1438_v9 = vrot.slane %v8843_v29, 1 }
 0x2e1   :  { %v1691_v62 = vsel %vm1673_vm5, %v1688_v42, %v1690_v45  ;;  %v1733_v45 = vrot.slane %v8678_v2, 2 }
 0x2e2   :  { %v1439_v35 = vsel %vm1367_vm4, %v1436_v14, %v1438_v9  ;;  %v1693_v14 = vrot.slane %v8378_v44, 2  ;;  %v7795_v44 = vld [vmem:[%s10597_s7 + $0x50] sm:$0xff]   ;;  %v7796_v9 = vld [vmem:[%s10597_s7 + $0x58] sm:$0xff]  }
 0x2e3   :  { %v1734_v54 = vsel %vm1673_vm5, %v1731_v28, %v1733_v45 }
 0x2e7   :  { %2934 = vmatmul.mubr.bf16.gmra.mrb[116].mxu1 %v1435_v61  ;;  %v1692_v61 = vrot.slane %v8348_v58, 2  ;;  %v1696_v58 = vsel %vm1673_vm5, %v1693_v14, %v1695_v43 }
 0x2e8   :  { %2943 = vmatprep.mubr.bf16.mxu1 %v8902_v16  ;;  %v7786_v16 = vld [vmem:[%s10597_s7 + $0x8] sm:$0xff]  }
 0x2e9   :  { %5520 = vmatpush1.bf16.msra.mxu0 %v7786_v16  ;;  %v1694_v6 = vsel %vm1673_vm5, %v1692_v61, %v1693_v14  ;;  %v7797_v16 = vld [vmem:[%s10597_s7 + $0x60] sm:$0xff]  }
 0x2ea   :  { %5521 = vmatprep.subr.bf16.mxu0 %v10655_v19 }
 0x2ed   :  { %5522 = vmatpush1.bf16.msra.mxu0 %v7787_v1  ;;  %v7798_v1 = vld [vmem:[%s10597_s7 + $0x68] sm:$0xff]  }
 0x2ee   :  { %5523 = vmatprep.subr.bf16.mxu0 %v10655_v19 }
 0x2ef   :  { %2944 = vmatmul.mubr.bf16.gmra.mrb[120].mxu1 %v1437_v55  ;;  %v7794_v55 = vld [vmem:[%s10597_s7 + $0x48] sm:$0xff]  }
 0x2f0   :  { %2953 = vmatprep.mubr.bf16.mxu1 %v8907_v52  ;;  %v1676_v52 = vsel %vm1673_vm5, %v1674_v60, %v1675_v41  ;;  %v1699_v60 = vrot.slane %v10796_v3, 2  ;;  %v1701_v41 = vrot.slane %v10806_v20, 2  ;;  %v7799_v3 = vld [vmem:[%s10597_s7 + $0x70] sm:$0xff]   ;;  %v1704_v20 = vrot.slane %v8475_v36, 2 }
 0x2f1   :  { %5524 = vmatpush1.bf16.msra.mxu0 %v7788_v34  ;;  %v1706_v34 = vrot.slane %v10809_v7, 2  ;;  %v1708_v36 = vrot.slane %v10807_v31, 2  ;;  %v1713_v7 = vrot.slane %v10817_v50, 2  ;;  %v1715_v31 = vrot.slane %v8517_v56, 2 }
 0x2f2   :  { %5525 = vmatprep.subr.bf16.mxu0 %v10655_v19  ;;  %v1719_v50 = vrot.slane %v10825_v33, 2  ;;  %v1722_v56 = vrot.slane %v8594_v30, 2  ;;  %v1728_v30 = vrot.slane %v8603_v26, 2 }
 0x2f3   :  { %v1707_v21 = vsel %vm1673_vm5, %v1704_v20, %v1706_v34  ;;  %v1716_v22 = vsel %vm1673_vm5, %v1713_v7, %v1715_v31 }
 0x2f5   :  { %5526 = vmatpush1.bf16.msra.mxu0 %v7789_v23 }
 0x2f6   :  { %5527 = vmatprep.subr.bf16.mxu0 %v10655_v19 }
 0x2f7   :  { %2954 = vmatmul.mubr.bf16.gmra.mrb[124].mxu1 %v1439_v35  ;;  %v1697_v35 = vrot.slane %v10799_v5, 2 }
 0x2f8   :  { %2996 = vmatprep.mubr.bf16.mxu1 %v10655_v19 }
 0x2f9   :  { %5528 = vmatpush1.bf16.msra.mxu0 %v7790_v32  ;;  %v1698_v8 = vsel %vm1673_vm5, %v1695_v43, %v1697_v35  ;;  %v1700_v5 = vsel %vm1673_vm5, %v1697_v35, %v1699_v60  ;;  %v1735_v43 = vrot.slane %v8803_v39, 2 }
 0x2fa   :  { %5529 = vmatprep.subr.bf16.mxu0 %v10655_v19 }
 0x2fd   :  { %5530 = vmatpush1.bf16.msra.mxu0 %v7791_v0  ;;  %v1729_v0 = vrot.slane %v8647_v15, 2  ;;  %v3317_v15 = vld [vmem:[%s10595_s5] sm:$0x3] }
 0x2fe   :  { %5531 = vmatprep.subr.bf16.mxu0 %v10655_v19 }
 0x2ff   :  { %2997 = vmatmul.mubr.bf16.vlgmr.msra.gmra.mrb[0].mxu1 %v1676_v52  ;;  %v1702_v52 = vrot.slane %v10801_v51, 2  ;;  %v7800_v51 = vld [vmem:[%s10597_s7 + $0x78] sm:$0xff]   ;;  %v1730_v42 = vsel %vm1673_vm5, %v1728_v30, %v1729_v0 }
 0x300   :  { %3006 = vmatprep.mubr.bf16.mxu1 %v10655_v19 }
 0x301   :  { %5532 = vmatpush1.bf16.msra.mxu0 %v7792_v47  ;;  %v1703_v12 = vsel %vm1673_vm5, %v1701_v41, %v1702_v52  ;;  %v1732_v47 = vsel %vm1673_vm5, %v1729_v0, %v1731_v28 }
 0x302   :  { %5533 = vmatprep.subr.bf16.mxu0 %v10655_v19 }
 0x305   :  { %5534 = vmatpush1.bf16.msra.mxu0 %v7793_v25  ;;  %v3457_v25 = vld [vmem:[%s10596_s6] sm:$0x3] }
 0x306   :  { %5535 = vmatprep.subr.bf16.mxu0 %v10655_v19 }
 0x307   :  { %3007 = vmatmul.mubr.bf16.gmra.mrb[4].mxu1 %v1678_v37  ;;  %v1705_v37 = vsel %vm1673_vm5, %v1702_v52, %v1704_v20  ;;  %v1736_v52 = vsel %vm1673_vm5, %v1733_v45, %v1735_v43  ;;  %v7803_v45 = vld [vmem:[%s10597_s7 + $0x90] sm:$0xff]  }
 0x308   :  { %3016 = vmatprep.mubr.bf16.mxu1 %v10655_v19 }
 0x309   :  { %5536 = vmatpush1.bf16.msra.mxu0 %v7794_v55 }
 0x30a   :  { %5537 = vmatprep.subr.bf16.mxu0 %v10655_v19 }
 0x30d   :  { %5538 = vmatpush1.bf16.msra.mxu0 %v7795_v44 }
 0x30e   :  { %5539 = vmatprep.subr.bf16.mxu0 %v10655_v19 }
 0x30f   :  { %3017 = vmatmul.mubr.bf16.gmra.mrb[8].mxu1 %v1680_v13  ;;  %v1709_v13 = vsel %vm1673_vm5, %v1706_v34, %v1708_v36  ;;  %v1737_v34 = vrot.slane %v8720_v17, 2 }
 0x310   :  { %3026 = vmatprep.mubr.bf16.mxu1 %v10655_v19 }
 0x311   :  { %5540 = vmatpush1.bf16.msra.mxu0 %v7796_v9 }
 0x312   :  { %5541 = vmatprep.subr.bf16.mxu0 %v10655_v19 }
 0x315   :  { %5542 = vmatpush1.bf16.msra.mxu0 %v7797_v16 }
 0x316   :  { %5543 = vmatprep.subr.bf16.mxu0 %v10655_v19 }
 0x317   :  { %3027 = vmatmul.mubr.bf16.gmra.mrb[12].mxu1 %v1682_v48  ;;  %v1711_v48 = vrot.slane %v10814_v27, 2  ;;  %v1718_v27 = vsel %vm1673_vm5, %v1715_v31, %v1717_v10 }
 0x318   :  { %3036 = vmatprep.mubr.bf16.mxu1 %v10655_v19 }
 0x319   :  { %5544 = vmatpush1.bf16.msra.mxu0 %v7798_v1  ;;  %v1712_v23 = vsel %vm1673_vm5, %v1710_v4, %v1711_v48  ;;  %v1714_v63 = vsel %vm1673_vm5, %v1711_v48, %v1713_v7 }
 0x31a   :  { %5545 = vmatprep.subr.bf16.mxu0 %v10655_v19 }
 0x31d   :  { %5546 = vmatpush1.bf16.msra.mxu0 %v7799_v3 }
 0x31e   :  { %5547 = vmatprep.subr.bf16.mxu0 %v10655_v19 }
 0x31f   :  { %3037 = vmatmul.mubr.bf16.gmra.mrb[16].mxu1 %v1685_v24  ;;  %v1720_v24 = vrot.slane %v8592_v57, 2  ;;  %v1726_v57 = vrot.slane %v8780_v18, 2 }
 0x320   :  { %3046 = vmatprep.mubr.bf16.mxu1 %v10655_v19 }
 0x321   :  { %5548 = vmatpush1.bf16.msra.mxu0 %v7800_v51  ;;  %v1721_v32 = vsel %vm1673_vm5, %v1719_v50, %v1720_v24  ;;  %v1723_v38 = vsel %vm1673_vm5, %v1720_v24, %v1722_v56  ;;  %v1727_v33 = vsel %vm1673_vm5, %v1724_v49, %v1726_v57 }
 0x322   :  { %5774 = vmatprep.subr.bf16.mxu0 %v10655_v19 }
 0x327   :  { %3047 = vmatmul.mubr.bf16.gmra.mrb[20].mxu1 %v1687_v46  ;;  %v1725_v46 = vsel %vm1673_vm5, %v1722_v56, %v1724_v49 }
 0x328   :  { %3056 = vmatprep.mubr.bf16.mxu1 %v10655_v19 }
 0x32f   :  { %3057 = vmatmul.mubr.bf16.gmra.mrb[24].mxu1 %v1689_v11  ;;  %v3319_v11 = vlaneseq }
 0x330   :  { %3066 = vmatprep.mubr.bf16.mxu1 %v10655_v19 }
 0x331   :  { %v9255_v18 = vshrl.u32 %v3319_v11, 7 }
 0x333   :  { %10832 = vst [vmem:[#allocation8_spill] sm:$0xff] %v9255_v18  ;;  %v3321_v26 = vsub.s32 0, %v9255_v18 }
 0x335   :  { %v9268_v61 = vrot.slane %v3317_v15, %v3321_v26  ;;  %v9273_v2 = vrot.slane %v3457_v25, %v3321_v26 }
 0x337   :  { %3067 = vmatmul.mubr.bf16.gmra.mrb[28].mxu1 %v1691_v62  ;;  %v3325_v62 = vsub.s32 1, %v9255_v18 }
 0x338   :  { %3076 = vmatprep.mubr.bf16.mxu1 %v10655_v19 }
 0x339   :  { %v9270_v14 = vrot.slane %v3317_v15, %v3325_v62  ;;  %v9275_v55 = vrot.slane %v3457_v25, %v3325_v62 }
 0x33f   :  { %3077 = vmatmul.mubr.bf16.gmra.mrb[32].mxu1 %v1694_v6 }
 0x340   :  { %3086 = vmatprep.mubr.bf16.mxu1 %v10655_v19 }
 0x347   :  { %3087 = vmatmul.mubr.bf16.gmra.mrb[36].mxu1 %v1696_v58 }
 0x348   :  { %3096 = vmatprep.mubr.bf16.mxu1 %v10655_v19 }
 0x34f   :  { %3097 = vmatmul.mubr.bf16.gmra.mrb[40].mxu1 %v1698_v8 }
 0x350   :  { %3106 = vmatprep.mubr.bf16.mxu1 %v10655_v19 }
 0x357   :  { %3107 = vmatmul.mubr.bf16.gmra.mrb[44].mxu1 %v1700_v5 }
 0x358   :  { %3116 = vmatprep.mubr.bf16.mxu1 %v10655_v19 }
 0x35f   :  { %3117 = vmatmul.mubr.bf16.gmra.mrb[48].mxu1 %v1703_v12 }
 0x360   :  { %3126 = vmatprep.mubr.bf16.mxu1 %v10655_v19 }
 0x367   :  { %3127 = vmatmul.mubr.bf16.gmra.mrb[52].mxu1 %v1705_v37 }
 0x368   :  { %3136 = vmatprep.mubr.bf16.mxu1 %v10655_v19 }
 0x36f   :  { %3137 = vmatmul.mubr.bf16.gmra.mrb[56].mxu1 %v1707_v21  ;;  %v1738_v21 = vrot.slane %v8722_v40, 2 }
 0x370   :  { %3146 = vmatprep.mubr.bf16.mxu1 %v10655_v19 }
 0x377   :  { %3147 = vmatmul.mubr.bf16.gmra.mrb[60].mxu1 %v1709_v13 }
 0x378   :  { %3156 = vmatprep.mubr.bf16.mxu1 %v10655_v19 }
 0x37f   :  { %3157 = vmatmul.mubr.bf16.gmra.mrb[64].mxu1 %v1712_v23 }
 0x380   :  { %3166 = vmatprep.mubr.bf16.mxu1 %v10655_v19 }
 0x387   :  { %3167 = vmatmul.mubr.bf16.gmra.mrb[68].mxu1 %v1714_v63  ;;  %v7801_v63 = vld [vmem:[%s10597_s7 + $0x80] sm:$0xff]  }
 0x388   :  { %3176 = vmatprep.mubr.bf16.mxu1 %v10655_v19 }
 0x38f   :  { %3177 = vmatmul.mubr.bf16.gmra.mrb[72].mxu1 %v1716_v22 }
 0x390   :  { %3186 = vmatprep.mubr.bf16.mxu1 %v10655_v19 }
 0x397   :  { %3187 = vmatmul.mubr.bf16.gmra.mrb[76].mxu1 %v1718_v27  ;;  %v1739_v27 = vsel %vm1673_vm5, %v1737_v34, %v1738_v21 }
 0x398   :  { %3196 = vmatprep.mubr.bf16.mxu1 %v10655_v19 }
 0x39f   :  { %3197 = vmatmul.mubr.bf16.gmra.mrb[80].mxu1 %v1721_v32  ;;  %v7802_v32 = vld [vmem:[%s10597_s7 + $0x88] sm:$0xff]  }
 0x3a0   :  { %3206 = vmatprep.mubr.bf16.mxu1 %v10655_v19 }
 0x3a7   :  { %3207 = vmatmul.mubr.bf16.gmra.mrb[84].mxu1 %v1723_v38 }
 0x3a8   :  { %3216 = vmatprep.mubr.bf16.mxu1 %v10655_v19 }
 0x3af   :  { %3217 = vmatmul.mubr.bf16.gmra.mrb[88].mxu1 %v1725_v46 }
 0x3b0   :  { %3226 = vmatprep.mubr.bf16.mxu1 %v10655_v19 }
 0x3b7   :  { %3227 = vmatmul.mubr.bf16.gmra.mrb[92].mxu1 %v1727_v33  ;;  %v1740_v33 = vrot.slane %v8746_v59, 2 }
 0x3b8   :  { %3236 = vmatprep.mubr.bf16.mxu1 %v10655_v19 }
 0x3b9   :  { %v1741_v25 = vsel %vm1673_vm5, %v1738_v21, %v1740_v33 }
 0x3bf   :  { %3237 = vmatmul.mubr.bf16.gmra.mrb[96].mxu1 %v1730_v42 }
 0x3c0   :  { %3246 = vmatprep.mubr.bf16.mxu1 %v10655_v19 }
 0x3c7   :  { %3247 = vmatmul.mubr.bf16.gmra.mrb[100].mxu1 %v1732_v47 }
 0x3c8   :  { %3256 = vmatprep.mubr.bf16.mxu1 %v10655_v19 }
 0x3cf   :  { %3257 = vmatmul.mubr.bf16.gmra.mrb[104].mxu1 %v1734_v54 }
 0x3d0   :  { %3266 = vmatprep.mubr.bf16.mxu1 %v10655_v19 }
 0x3d2   :  { %v2998_v6 = vpop.f32.mrb[0].mxu1 }
 0x3d3   :  { %v3329_v58 = vmul.f32 %v9268_v61, %v2998_v6  ;;  %v3000_v44 = vpop.f32.mrb[1].mxu1 }
 0x3d4   :  { %v3330_v9 = vmul.f32 %v9270_v14, %v3000_v44  ;;  %v3002_v35 = vpop.f32.mrb[2].mxu1 }
 0x3d5   :  { %v3469_v8 = vadd.f32 %v9273_v2, %v3329_v58  ;;  %v3331_v16 = vmul.f32 %v9268_v61, %v3002_v35  ;;  %v3004_v60 = vpop.f32.mrb[3].mxu1  ;;  %v7804_v58 = vld [vmem:[%s10597_s7 + $0x98] sm:$0xff]  }
 0x3d6   :  { %v3470_v5 = vadd.f32 %v9275_v55, %v3330_v9  ;;  %v3332_v41 = vmul.f32 %v9270_v14, %v3004_v60  ;;  %v1742_v60 = vrot.slane %v8748_v53, 2 }
 0x3d7   :  { %v3471_v1 = vadd.f32 %v9273_v2, %v3331_v16  ;;  %3267 = vmatmul.mubr.bf16.gmra.mrb[108].mxu1 %v1736_v52  ;;  %v3597_v3 = vmax.f32 %v3469_v8, 0.0 }
 0x3d8   :  { %v3472_v39 = vadd.f32 %v9275_v55, %v3332_v41  ;;  %3276 = vmatprep.mubr.bf16.mxu1 %v10655_v19  ;;  %v3598_v20 = vmax.f32 %v3470_v5, 0.0  ;;  %v1743_v21 = vsel %vm1673_vm5, %v1740_v33, %v1742_v60 }
 0x3d9   :  { %v3599_v12 = vmax.f32 %v3471_v1, 0.0 }
 0x3da   :  { %v3600_v51 = vmax.f32 %v3472_v39, 0.0  ;;  %v3008_v37 = vpop.f32.mrb[4].mxu1 }
 0x3db   :  { %v9290_v36 = vpack.c.bf16 %v3599_v12, %v3597_v3  ;;  %v3333_v13 = vmul.f32 %v9268_v61, %v3008_v37  ;;  %v3010_v4 = vpop.f32.mrb[5].mxu1  ;;  %v7805_v12 = vld [vmem:[%s10597_s7 + $0xa0] sm:$0xff]  }
 0x3dc   :  { %v9293_v48 = vpack.c.bf16 %v3600_v51, %v3598_v20  ;;  %v3334_v23 = vmul.f32 %v9270_v14, %v3010_v4  ;;  %v3012_v7 = vpop.f32.mrb[6].mxu1 }
 0x3dd   :  { %v3473_v31 = vadd.f32 %v9273_v2, %v3333_v13  ;;  %v3335_v17 = vmul.f32 %v9268_v61, %v3012_v7  ;;  %v3014_v22 = vpop.f32.mrb[7].mxu1 }
 0x3de   :  { %v3474_v40 = vadd.f32 %v9275_v55, %v3334_v23  ;;  %v3336_v10 = vmul.f32 %v9270_v14, %v3014_v22  ;;  %5549 = vmatprep.mubr.bf16.mxu0 %v9293_v48  ;;  %v7806_v23 = vld [vmem:[%s10597_s7 + $0xa8] sm:$0xff]  }
 0x3df   :  { %v3475_v50 = vadd.f32 %v9273_v2, %v3335_v17  ;;  %3277 = vmatmul.mubr.bf16.gmra.mrb[112].mxu1 %v1739_v27  ;;  %5550 = vmatmul.mubr.bf16.vlgmr.msra.gmra.mrb[72].mxu0 %v9290_v36  ;;  %v3601_v56 = vmax.f32 %v3473_v31, 0.0 }
 0x3e0   :  { %v3476_v24 = vadd.f32 %v9275_v55, %v3336_v10  ;;  %3286 = vmatprep.mubr.bf16.mxu1 %v10655_v19  ;;  %5775 = vmatpush1.bf16.msra.mxu0 %v7801_v63  ;;  %v3602_v49 = vmax.f32 %v3474_v40, 0.0  ;;  %v1744_v40 = vrot.slane %v8843_v29, 2 }
 0x3e1   :  { %v3603_v38 = vmax.f32 %v3475_v50, 0.0  ;;  %5776 = vmatprep.subr.bf16.mxu0 %v10655_v19 }
 0x3e2   :  { %v3604_v46 = vmax.f32 %v3476_v24, 0.0  ;;  %v3018_v57 = vpop.f32.mrb[8].mxu1 }
 0x3e3   :  { %v9314_v30 = vpack.c.bf16 %v3603_v38, %v3601_v56  ;;  %v3337_v0 = vmul.f32 %v9268_v61, %v3018_v57  ;;  %v3020_v42 = vpop.f32.mrb[9].mxu1  ;;  %v7807_v38 = vld [vmem:[%s10597_s7 + $0xb0] sm:$0xff]  }
 0x3e4   :  { %v9317_v28 = vpack.c.bf16 %v3604_v46, %v3602_v49  ;;  %v3338_v11 = vmul.f32 %v9270_v14, %v3020_v42  ;;  %v3022_v47 = vpop.f32.mrb[10].mxu1  ;;  %5777 = vmatpush1.bf16.msra.mxu0 %v7802_v32 }
 0x3e5   :  { %v3477_v26 = vadd.f32 %v9273_v2, %v3337_v0  ;;  %v3339_v15 = vmul.f32 %v9268_v61, %v3022_v47  ;;  %v3024_v59 = vpop.f32.mrb[11].mxu1  ;;  %5778 = vmatprep.subr.bf16.mxu0 %v10655_v19  ;;  %v1745_v0 = vsel %vm1673_vm5, %v1742_v60, %v1744_v40 }
 0x3e6   :  { %v3478_v62 = vadd.f32 %v9275_v55, %v3338_v11  ;;  %v3340_v54 = vmul.f32 %v9270_v14, %v3024_v59  ;;  %5557 = vmatprep.mubr.bf16.mxu0 %v9317_v28 }
 0x3e7   :  { %v3479_v6 = vadd.f32 %v9273_v2, %v3339_v15  ;;  %3287 = vmatmul.mubr.bf16.gmra.mrb[116].mxu1 %v1741_v25  ;;  %5558 = vmatmul.mubr.bf16.gmra.mrb[76].mxu0 %v9314_v30  ;;  %v3605_v44 = vmax.f32 %v3477_v26, 0.0  ;;  %v7808_v26 = vld [vmem:[%s10597_s7 + $0xb8] sm:$0xff]  }
 0x3e8   :  { %v3480_v43 = vadd.f32 %v9275_v55, %v3340_v54  ;;  %3296 = vmatprep.mubr.bf16.mxu1 %v10655_v19  ;;  %5779 = vmatpush1.bf16.msra.mxu0 %v7803_v45  ;;  %v3606_v35 = vmax.f32 %v3478_v62, 0.0 }
 0x3e9   :  { %v3607_v9 = vmax.f32 %v3479_v6, 0.0  ;;  %5780 = vmatprep.subr.bf16.mxu0 %v10655_v19 }
 0x3ea   :  { %v3608_v8 = vmax.f32 %v3480_v43, 0.0  ;;  %v3028_v16 = vpop.f32.mrb[12].mxu1 }
 0x3eb   :  { %v9339_v5 = vpack.c.bf16 %v3607_v9, %v3605_v44  ;;  %v3341_v41 = vmul.f32 %v9268_v61, %v3028_v16  ;;  %v3030_v52 = vpop.f32.mrb[13].mxu1 }
 0x3ec   :  { %v9342_v1 = vpack.c.bf16 %v3608_v8, %v3606_v35  ;;  %v3342_v39 = vmul.f32 %v9270_v14, %v3030_v52  ;;  %v3032_v3 = vpop.f32.mrb[14].mxu1  ;;  %5781 = vmatpush1.bf16.msra.mxu0 %v7804_v58  ;;  %v7809_v8 = vld [vmem:[%s10597_s7 + $0xc0] sm:$0xff]  }
 0x3ed   :  { %v3481_v20 = vadd.f32 %v9273_v2, %v3341_v41  ;;  %v3343_v51 = vmul.f32 %v9268_v61, %v3032_v3  ;;  %v3034_v53 = vpop.f32.mrb[15].mxu1  ;;  %5782 = vmatprep.subr.bf16.mxu0 %v10655_v19 }
 0x3ee   :  { %v3482_v37 = vadd.f32 %v9275_v55, %v3342_v39  ;;  %v3344_v34 = vmul.f32 %v9270_v14, %v3034_v53  ;;  %5565 = vmatprep.mubr.bf16.mxu0 %v9342_v1 }
 0x3ef   :  { %v3483_v13 = vadd.f32 %v9273_v2, %v3343_v51  ;;  %3297 = vmatmul.mubr.bf16.gmra.mrb[120].mxu1 %v1743_v21  ;;  %5566 = vmatmul.mubr.bf16.gmra.mrb[80].mxu0 %v9339_v5  ;;  %v3609_v7 = vmax.f32 %v3481_v20, 0.0 }
 0x3f0   :  { %v3484_v4 = vadd.f32 %v9275_v55, %v3344_v34  ;;  %3306 = vmatprep.mubr.bf16.mxu1 %v10655_v19  ;;  %5783 = vmatpush1.bf16.msra.mxu0 %v7805_v12  ;;  %v3610_v31 = vmax.f32 %v3482_v37, 0.0 }
 0x3f1   :  { %v3611_v63 = vmax.f32 %v3483_v13, 0.0  ;;  %5784 = vmatprep.subr.bf16.mxu0 %v10655_v19 }
 0x3f2   :  { %v3612_v17 = vmax.f32 %v3484_v4, 0.0  ;;  %v3038_v22 = vpop.f32.mrb[16].mxu1 }
 0x3f3   :  { %v9364_v10 = vpack.c.bf16 %v3611_v63, %v3609_v7  ;;  %v3345_v27 = vmul.f32 %v9268_v61, %v3038_v22  ;;  %v3040_v50 = vpop.f32.mrb[17].mxu1 }
 0x3f4   :  { %v9367_v24 = vpack.c.bf16 %v3612_v17, %v3610_v31  ;;  %v3346_v32 = vmul.f32 %v9270_v14, %v3040_v50  ;;  %v3042_v56 = vpop.f32.mrb[18].mxu1  ;;  %5785 = vmatpush1.bf16.msra.mxu0 %v7806_v23 }
 0x3f5   :  { %v3485_v49 = vadd.f32 %v9273_v2, %v3345_v27  ;;  %v3347_v46 = vmul.f32 %v9268_v61, %v3042_v56  ;;  %v3044_v29 = vpop.f32.mrb[19].mxu1  ;;  %5786 = vmatprep.subr.bf16.mxu0 %v10655_v19 }
 0x3f6   :  { %v3486_v57 = vadd.f32 %v9275_v55, %v3346_v32  ;;  %v3348_v33 = vmul.f32 %v9270_v14, %v3044_v29 }
 0x3f7   :  { %v3613_v42 = vmax.f32 %v3485_v49, 0.0  ;;  %v3487_v11 = vadd.f32 %v9273_v2, %v3347_v46  ;;  %3307 = vmatmul.mubr.bf16.gmra.mrb[124].mxu1 %v1745_v0 }
 0x3f8   :  { %v3614_v47 = vmax.f32 %v3486_v57, 0.0  ;;  %v3488_v45 = vadd.f32 %v9275_v55, %v3348_v33  ;;  %5787 = vmatpush1.bf16.msra.mxu0 %v7807_v38 }
 0x3f9   :  { %v3615_v15 = vmax.f32 %v3487_v11, 0.0  ;;  %v7029_v59 = vpack.c.bf16 %v3613_v42, %v3609_v7  ;;  %5788 = vmatprep.subr.bf16.mxu0 %v10655_v19 }
 0x3fa   :  { %v3616_v62 = vmax.f32 %v3488_v45, 0.0  ;;  %v3048_v54 = vpop.f32.mrb[20].mxu1  ;;  %v7030_v25 = vpack.c.bf16 %v3614_v47, %v3610_v31  ;;  %v7810_v31 = vld [vmem:[%s10597_s7 + $0xc8] sm:$0xff]  }
 0x3fb   :  { %v9385_v6 = vpack.c.bf16 %v3615_v15, %v3613_v42  ;;  %v3349_v43 = vmul.f32 %v9268_v61, %v3048_v54  ;;  %v3050_v58 = vpop.f32.mrb[21].mxu1 }
 0x3fc   :  { %v9388_v44 = vpack.c.bf16 %v3616_v62, %v3614_v47  ;;  %v3350_v9 = vmul.f32 %v9270_v14, %v3050_v58  ;;  %v3052_v35 = vpop.f32.mrb[22].mxu1  ;;  %5573 = vmatprep.mubr.bf16.mxu0 %v7030_v25  ;;  %5789 = vmatpush1.bf16.msra.mxu0 %v7808_v26  ;;  %v3792_v58 = vshll.u32 %v9290_v36, 16 }
 0x3fd   :  { %v3489_v16 = vadd.f32 %v9273_v2, %v3349_v43  ;;  %v3351_v60 = vmul.f32 %v9268_v61, %v3052_v35  ;;  %v3054_v41 = vpop.f32.mrb[23].mxu1  ;;  %5574 = vmatmul.mubr.bf16.gmra.mrb[84].mxu0 %v7029_v59  ;;  %5790 = vmatprep.subr.bf16.mxu0 %v10655_v19  ;;  %v4509_v27 = vunpack.c.h.b16 %v9385_v6  ;;  %v3804_v43 = vshll.u32 %v9293_v48, 16 }
 0x3fe   :  { %v3490_v52 = vadd.f32 %v9275_v55, %v3350_v9  ;;  %v3352_v39 = vmul.f32 %v9270_v14, %v3054_v41  ;;  %v4510_v38 = vunpack.c.h.b16 %v9388_v44 }
 0x3ff   :  { %v3491_v3 = vadd.f32 %v9273_v2, %v3351_v60  ;;  %v3617_v20 = vmax.f32 %v3489_v16, 0.0 }
 0x400   :  { %v3492_v12 = vadd.f32 %v9275_v55, %v3352_v39  ;;  %5791 = vmatpush1.bf16.msra.mxu0 %v7809_v8  ;;  %v3618_v53 = vmax.f32 %v3490_v52, 0.0 }
 0x401   :  { %v3619_v51 = vmax.f32 %v3491_v3, 0.0  ;;  %5792 = vmatprep.subr.bf16.mxu0 %v10655_v19 }
 0x402   :  { %v3620_v37 = vmax.f32 %v3492_v12, 0.0  ;;  %v3058_v34 = vpop.f32.mrb[24].mxu1 }
 0x403   :  { %v9402_v21 = vpack.c.bf16 %v3619_v51, %v3617_v20  ;;  %v3353_v13 = vmul.f32 %v9268_v61, %v3058_v34  ;;  %v3060_v4 = vpop.f32.mrb[25].mxu1  ;;  %v3806_v20 = vrot.slane %v3804_v43, 1  ;;  %v3794_v34 = vrot.slane %v3792_v58, 1 }
 0x404   :  { %v9405_v23 = vpack.c.bf16 %v3620_v37, %v3618_v53  ;;  %v3354_v7 = vmul.f32 %v9270_v14, %v3060_v4  ;;  %v3062_v63 = vpop.f32.mrb[26].mxu1  ;;  %5793 = vmatpush1.bf16.msra.mxu0 %v7810_v31  ;;  %v3790_v37 = vshrl.u32 %v9290_v36, 16 }
 0x405   :  { %v3493_v17 = vadd.f32 %v9273_v2, %v3353_v13  ;;  %v3355_v22 = vmul.f32 %v9268_v61, %v3062_v63  ;;  %v3064_v40 = vpop.f32.mrb[27].mxu1  ;;  %v4515_v50 = vunpack.c.l.b16 %v9402_v21  ;;  %5794 = vmatprep.subr.bf16.mxu0 %v10655_v19  ;;  %v4521_v12 = vunpack.c.h.b16 %v9402_v21 }
 0x406   :  { %v3494_v32 = vadd.f32 %v9275_v55, %v3354_v7  ;;  %v3356_v56 = vmul.f32 %v9270_v14, %v3064_v40  ;;  %v4516_v49 = vunpack.c.l.b16 %v9405_v23  ;;  %v4522_v52 = vunpack.c.h.b16 %v9405_v23 }
 0x407   :  { %v3495_v46 = vadd.f32 %v9273_v2, %v3355_v22  ;;  %v4917_v29 = vpack.c.b16 %v4515_v50, %v4509_v27  ;;  %v3621_v0 = vmax.f32 %v3493_v17, 0.0  ;;  %v3802_v63 = vshrl.u32 %v9293_v48, 16 }
 0x408   :  { %v3496_v57 = vadd.f32 %v9275_v55, %v3356_v56  ;;  %v4918_v33 = vpack.c.b16 %v4516_v49, %v4510_v38  ;;  %v3622_v11 = vmax.f32 %v3494_v32, 0.0  ;;  %v3797_v49 = vshll.u32 %v9314_v30, 16 }
 0x409   :  { %v3623_v42 = vmax.f32 %v3495_v46, 0.0  ;;  %v3807_v38 = vor.u32 %v3806_v20, %v3802_v63 }
 0x40a   :  { %v3624_v47 = vmax.f32 %v3496_v57, 0.0  ;;  %v3068_v45 = vpop.f32.mrb[28].mxu1  ;;  %5581 = vmatprep.mubr.bf16.mxu0 %v4918_v33  ;;  %v7811_v33 = vld [vmem:[%s10597_s7 + $0xd0] sm:$0xff]  }
 0x40b   :  { %v9422_v26 = vpack.c.bf16 %v3623_v42, %v3621_v0  ;;  %v3357_v15 = vmul.f32 %v9268_v61, %v3068_v45  ;;  %v3070_v59 = vpop.f32.mrb[29].mxu1  ;;  %5582 = vmatmul.mubr.bf16.gmra.mrb[88].mxu0 %v4917_v29  ;;  %v3809_v0 = vshll.u32 %v9317_v28, 16  ;;  %v3795_v42 = vor.u32 %v3794_v34, %v3790_v37 }
 0x40c   :  { %v9425_v62 = vpack.c.bf16 %v3624_v47, %v3622_v11  ;;  %v3358_v54 = vmul.f32 %v9270_v14, %v3070_v59  ;;  %v3072_v25 = vpop.f32.mrb[30].mxu1  ;;  %v3799_v59 = vrot.slane %v3797_v49, 1  ;;  %5795 = vmatpush1.bf16.msra.mxu0 %v7811_v33 }
 0x40d   :  { %v3497_v9 = vadd.f32 %v9273_v2, %v3357_v15  ;;  %v3359_v35 = vmul.f32 %v9268_v61, %v3072_v25  ;;  %v3074_v8 = vpop.f32.mrb[31].mxu1  ;;  %v4527_v16 = vunpack.c.l.b16 %v9422_v26  ;;  %v4533_v27 = vunpack.c.h.b16 %v9422_v26  ;;  %5796 = vmatprep.subr.bf16.mxu0 %v10655_v19 }
 0x40e   :  { %v3498_v60 = vadd.f32 %v9275_v55, %v3358_v54  ;;  %v3360_v41 = vmul.f32 %v9270_v14, %v3074_v8  ;;  %v4528_v39 = vunpack.c.l.b16 %v9425_v62  ;;  %v4534_v40 = vunpack.c.h.b16 %v9425_v62 }
 0x40f   :  { %v3499_v3 = vadd.f32 %v9273_v2, %v3359_v35  ;;  %v3625_v13 = vmax.f32 %v3497_v9, 0.0  ;;  %v4923_v7 = vpack.c.b16 %v4527_v16, %v4521_v12  ;;  %v3811_v58 = vrot.slane %v3809_v0, 1 }
 0x410   :  { %v3500_v51 = vadd.f32 %v9275_v55, %v3360_v41  ;;  %v4924_v53 = vpack.c.b16 %v4528_v39, %v4522_v52  ;;  %v3626_v31 = vmax.f32 %v3498_v60, 0.0  ;;  %v9464_v35 = vsel %vm1046_vm2, %v3795_v42, %v3799_v59 }
 0x411   :  { %v3627_v4 = vmax.f32 %v3499_v3, 0.0  ;;  %v4352_v8 = vrot.slane %v9293_v48, 1  ;;  %v4349_v16 = vrot.slane %v9290_v36, 1  ;;  %v9470_v52 = vsel %vm1046_vm2, %v3807_v38, %v3811_v58 }
 0x412   :  { %v3628_v17 = vmax.f32 %v3500_v51, 0.0  ;;  %v3078_v22 = vpop.f32.mrb[32].mxu1  ;;  %5589 = vmatprep.mubr.bf16.mxu0 %v4924_v53  ;;  %v3821_v39 = vshrl.u32 %v9317_v28, 16  ;;  %v4353_v51 = vrot.slane %v9317_v28, 1  ;;  %v3813_v48 = vshrl.u32 %v9314_v30, 16 }
 0x413   :  { %v9444_v50 = vpack.c.bf16 %v3627_v4, %v3625_v13  ;;  %v3361_v32 = vmul.f32 %v9268_v61, %v3078_v22  ;;  %v3080_v56 = vpop.f32.mrb[33].mxu1  ;;  %5590 = vmatmul.mubr.bf16.gmra.mrb[92].mxu0 %v4923_v7  ;;  %v4350_v36 = vrot.slane %v9314_v30, 1 }
 0x414   :  { %v9448_v46 = vpack.c.bf16 %v3628_v17, %v3626_v31  ;;  %v3362_v29 = vmul.f32 %v9270_v14, %v3080_v56  ;;  %v3082_v57 = vpop.f32.mrb[34].mxu1  ;;  %v3823_v63 = vor.u32 %v3821_v39, %v3811_v58  ;;  %v3817_v31 = vshll.u32 %v9339_v5, 16 }
 0x415   :  { %v3501_v11 = vadd.f32 %v9273_v2, %v3361_v32  ;;  %v3363_v47 = vmul.f32 %v9268_v61, %v3082_v57  ;;  %v3084_v45 = vpop.f32.mrb[35].mxu1  ;;  %v4539_v15 = vunpack.c.l.b16 %v9444_v50  ;;  %v9487_v49 = vsel %vm1367_vm4, %v4352_v8, %v4353_v51 }
 0x416   :  { %v3502_v54 = vadd.f32 %v9275_v55, %v3362_v29  ;;  %v3364_v25 = vmul.f32 %v9270_v14, %v3084_v45  ;;  %v4540_v43 = vunpack.c.l.b16 %v9448_v46  ;;  %v3819_v38 = vrot.slane %v3817_v31, 1  ;;  %10833 = vst [vmem:[#allocation15_spill] sm:$0xff] %v9487_v49 }
 0x417   :  { %v3503_v9 = vadd.f32 %v9273_v2, %v3363_v47  ;;  %v3629_v3 = vmax.f32 %v3501_v11, 0.0  ;;  %v4929_v20 = vpack.c.b16 %v4539_v15, %v4533_v27  ;;  %v3815_v27 = vor.u32 %v3813_v48, %v3799_v59 }
 0x418   :  { %v3504_v60 = vadd.f32 %v9275_v55, %v3364_v25  ;;  %v4930_v41 = vpack.c.b16 %v4540_v43, %v4534_v40  ;;  %v3630_v53 = vmax.f32 %v3502_v54, 0.0  ;;  %v3825_v40 = vshll.u32 %v9342_v1, 16 }
 0x419   :  { %v3631_v12 = vmax.f32 %v3503_v9, 0.0  ;;  %v9493_v0 = vsel %vm1367_vm4, %v4349_v16, %v4350_v36  ;;  %v9497_v11 = vsel %vm1046_vm2, %v3815_v27, %v3819_v38  ;;  %v3829_v54 = vshrl.u32 %v9339_v5, 16 }
 0x41a   :  { %v3632_v37 = vmax.f32 %v3504_v60, 0.0  ;;  %v3088_v34 = vpop.f32.mrb[36].mxu1  ;;  %5597 = vmatprep.mubr.bf16.mxu0 %v4930_v41  ;;  %v3827_v33 = vrot.slane %v3825_v40, 1  ;;  %10834 = vst [vmem:[#allocation20_spill] sm:$0xff] %v9493_v0  ;;  %v4357_v25 = vrot.slane %v9342_v1, 1  ;;  %v3837_v8 = vshrl.u32 %v9342_v1, 16 }
 0x41b   :  { %v9476_v13 = vpack.c.bf16 %v3631_v12, %v3629_v3  ;;  %v3365_v4 = vmul.f32 %v9268_v61, %v3088_v34  ;;  %v3090_v7 = vpop.f32.mrb[37].mxu1  ;;  %5598 = vmatmul.mubr.bf16.gmra.mrb[96].mxu0 %v4929_v20  ;;  %v4355_v16 = vrot.slane %v9339_v5, 1  ;;  %v3831_v3 = vor.u32 %v3829_v54, %v3819_v38  ;;  %v7812_v1 = vld [vmem:[%s10597_s7 + $0xd8] sm:$0xff]  }
 0x41c   :  { %v9480_v17 = vpack.c.bf16 %v3632_v37, %v3630_v53  ;;  %v3366_v28 = vmul.f32 %v9270_v14, %v3090_v7  ;;  %v3092_v22 = vpop.f32.mrb[38].mxu1  ;;  %v9501_v45 = vsel %vm1046_vm2, %v3823_v63, %v3827_v33  ;;  %v3833_v12 = vshll.u32 %v9364_v10, 16  ;;  %5797 = vmatpush1.bf16.msra.mxu0 %v7812_v1 }
 0x41d   :  { %v3505_v32 = vadd.f32 %v9273_v2, %v3365_v4  ;;  %v3367_v30 = vmul.f32 %v9268_v61, %v3092_v22  ;;  %v3094_v56 = vpop.f32.mrb[39].mxu1  ;;  %v3839_v5 = vor.u32 %v3837_v8, %v3827_v33  ;;  %v3841_v34 = vshll.u32 %v9367_v24, 16  ;;  %5798 = vmatprep.subr.bf16.mxu0 %v10655_v19 }
 0x41e   :  { %v3506_v29 = vadd.f32 %v9275_v55, %v3366_v28  ;;  %v3368_v57 = vmul.f32 %v9270_v14, %v3094_v56  ;;  %5605 = vmatprep.mubr.bf16.mxu0 %v9480_v17  ;;  %v3835_v63 = vrot.slane %v3833_v12, 1  ;;  %v9522_v31 = vsel %vm1367_vm4, %v4353_v51, %v4357_v25 }
 0x41f   :  { %v3507_v42 = vadd.f32 %v9273_v2, %v3367_v30  ;;  %v3633_v15 = vmax.f32 %v3505_v32, 0.0  ;;  %10835 = vst [vmem:[#allocation9_spill] sm:$0xff] %v9522_v31  ;;  %v9527_v40 = vrot.slane %v3841_v34, 1  ;;  %v9530_v27 = vsel %vm1367_vm4, %v4350_v36, %v4355_v16 }
 0x420   :  { %v3508_v47 = vadd.f32 %v9275_v55, %v3368_v57  ;;  %v3634_v43 = vmax.f32 %v3506_v29, 0.0  ;;  %10836 = vst [vmem:[#allocation19_spill] sm:$0xff] %v9530_v27  ;;  %v9535_v30 = vsel %vm1046_vm2, %v3831_v3, %v3835_v63  ;;  %v10654_v57 = vrot.slane %v9367_v24, 1 }
 0x421   :  { %v3635_v59 = vmax.f32 %v3507_v42, 0.0  ;;  %v9540_v56 = vsel %vm1046_vm2, %v3839_v5, %v9527_v40  ;;  %v3854_v3 = vshll.u32 %v9385_v6, 16  ;;  %v3866_v1 = vshll.u32 %v9388_v44, 16 }
 0x422   :  { %v3636_v58 = vmax.f32 %v3508_v47, 0.0  ;;  %v3098_v9 = vpop.f32.mrb[40].mxu1  ;;  %v10653_v47 = vrot.slane %v9364_v10, 1  ;;  %v9557_v12 = vsel %vm1367_vm4, %v4357_v25, %v10654_v57  ;;  %v7813_v25 = vld [vmem:[%s10597_s7 + $0xe0] sm:$0xff]  }
 0x423   :  { %v9507_v60 = vpack.c.bf16 %v3635_v59, %v3633_v15  ;;  %v3369_v41 = vmul.f32 %v9268_v61, %v3098_v9  ;;  %v3100_v39 = vpop.f32.mrb[41].mxu1  ;;  %5606 = vmatmul.mubr.bf16.gmra.mrb[100].mxu0 %v9476_v13  ;;  %10837 = vst [vmem:[#allocation11_spill] sm:$0xff] %v9557_v12 }
 0x424   :  { %v9512_v20 = vpack.c.bf16 %v3636_v58, %v3634_v43  ;;  %v3370_v53 = vmul.f32 %v9270_v14, %v3100_v39  ;;  %v3102_v37 = vpop.f32.mrb[42].mxu1  ;;  %v9566_v5 = vsel %vm1367_vm4, %v4355_v16, %v10653_v47  ;;  %5799 = vmatpush1.bf16.msra.mxu0 %v7813_v25  ;;  %v3868_v16 = vrot.slane %v3866_v1, 1 }
 0x425   :  { %v3509_v48 = vadd.f32 %v9273_v2, %v3369_v41  ;;  %v3371_v4 = vmul.f32 %v9268_v61, %v3102_v37  ;;  %v3104_v7 = vpop.f32.mrb[43].mxu1  ;;  %10838 = vst [vmem:[#allocation21_spill] sm:$0xff] %v9566_v5  ;;  %5800 = vmatprep.subr.bf16.mxu0 %v10655_v19 }
 0x426   :  { %v3510_v28 = vadd.f32 %v9275_v55, %v3370_v53  ;;  %v3372_v22 = vmul.f32 %v9270_v14, %v3104_v7  ;;  %5613 = vmatprep.mubr.bf16.mxu0 %v9512_v20 }
 0x427   :  { %v3511_v32 = vadd.f32 %v9273_v2, %v3371_v4  ;;  %v3637_v38 = vmax.f32 %v3509_v48, 0.0  ;;  %v3845_v4 = vshrl.u32 %v9364_v10, 16 }
 0x428   :  { %v3512_v51 = vadd.f32 %v9275_v55, %v3372_v22  ;;  %v3638_v33 = vmax.f32 %v3510_v28, 0.0  ;;  %v3848_v22 = vshrl.u32 %v9367_v24, 16 }
 0x429   :  { %v3639_v29 = vmax.f32 %v3511_v32, 0.0  ;;  %v3856_v32 = vrot.slane %v3854_v3, 1 }
 0x42a   :  { %v3640_v36 = vmax.f32 %v3512_v51, 0.0  ;;  %v3108_v42 = vpop.f32.mrb[44].mxu1 }
 0x42b   :  { %v9544_v15 = vpack.c.bf16 %v3639_v29, %v3637_v38  ;;  %v3373_v59 = vmul.f32 %v9268_v61, %v3108_v42  ;;  %v3110_v54 = vpop.f32.mrb[45].mxu1  ;;  %5614 = vmatmul.mubr.bf16.gmra.mrb[104].mxu0 %v9507_v60 }
 0x42c   :  { %v9548_v43 = vpack.c.bf16 %v3640_v36, %v3638_v33  ;;  %v3374_v58 = vmul.f32 %v9270_v14, %v3110_v54  ;;  %v3112_v9 = vpop.f32.mrb[46].mxu1  ;;  %v9575_v33 = vor.u32 %v3845_v4, %v3835_v63  ;;  %v3852_v54 = vshrl.u32 %v9385_v6, 16 }
 0x42d   :  { %v3513_v8 = vadd.f32 %v9273_v2, %v3373_v59  ;;  %v3375_v41 = vmul.f32 %v9268_v61, %v3112_v9  ;;  %v3114_v39 = vpop.f32.mrb[47].mxu1  ;;  %v3864_v63 = vshrl.u32 %v9388_v44, 16 }
 0x42e   :  { %v3514_v53 = vadd.f32 %v9275_v55, %v3374_v58  ;;  %v3376_v37 = vmul.f32 %v9270_v14, %v3114_v39  ;;  %5621 = vmatprep.mubr.bf16.mxu0 %v9548_v43  ;;  %v3859_v58 = vshll.u32 %v9402_v21, 16  ;;  %v3871_v39 = vshll.u32 %v9405_v23, 16 }
 0x42f   :  { %v3515_v34 = vadd.f32 %v9273_v2, %v3375_v41  ;;  %v3641_v7 = vmax.f32 %v3513_v8, 0.0  ;;  %v3857_v1 = vor.u32 %v3856_v32, %v3852_v54  ;;  %v3869_v4 = vor.u32 %v3868_v16, %v3864_v63 }
 0x430   :  { %v3516_v48 = vadd.f32 %v9275_v55, %v3376_v37  ;;  %v3642_v51 = vmax.f32 %v3514_v53, 0.0 }
 0x431   :  { %v3643_v28 = vmax.f32 %v3515_v34, 0.0  ;;  %v3861_v34 = vrot.slane %v3859_v58, 1 }
 0x432   :  { %v3644_v38 = vmax.f32 %v3516_v48, 0.0  ;;  %v3118_v29 = vpop.f32.mrb[48].mxu1 }
 0x433   :  { %v9577_v36 = vpack.c.bf16 %v3643_v28, %v3641_v7  ;;  %v3377_v42 = vmul.f32 %v9268_v61, %v3118_v29  ;;  %v3120_v59 = vpop.f32.mrb[49].mxu1  ;;  %5622 = vmatmul.mubr.bf16.gmra.mrb[108].mxu0 %v9544_v15  ;;  %v3873_v28 = vrot.slane %v3871_v39, 1  ;;  %v9598_v47 = vsel %vm1046_vm2, %v3857_v1, %v3861_v34 }
 0x434   :  { %v9584_v9 = vpack.c.bf16 %v3644_v38, %v3642_v51  ;;  %v3378_v8 = vmul.f32 %v9270_v14, %v3120_v59  ;;  %v3122_v41 = vpop.f32.mrb[50].mxu1  ;;  %v9595_v59 = vor.u32 %v3848_v22, %v9527_v40  ;;  %v3875_v39 = vshrl.u32 %v9402_v21, 16 }
 0x435   :  { %10839 = vst [vmem:[#allocation10_spill] sm:$0xff] %v9577_v36  ;;  %v3517_v3 = vadd.f32 %v9273_v2, %v3377_v42  ;;  %v3379_v53 = vmul.f32 %v9268_v61, %v3122_v41  ;;  %v3124_v37 = vpop.f32.mrb[51].mxu1  ;;  %v9602_v32 = vsel %vm1046_vm2, %v3869_v4, %v3873_v28  ;;  %v3883_v1 = vshrl.u32 %v9405_v23, 16 }
 0x436   :  { %v3518_v48 = vadd.f32 %v9275_v55, %v3378_v8  ;;  %v3380_v25 = vmul.f32 %v9270_v14, %v3124_v37 }
 0x437   :  { %v3645_v38 = vmax.f32 %v3517_v3, 0.0  ;;  %v3519_v29 = vadd.f32 %v9273_v2, %v3379_v53  ;;  %v3885_v54 = vor.u32 %v3883_v1, %v3873_v28  ;;  %v4511_v28 = vunpack.c.h.b16 %v9598_v47 }
 0x438   :  { %v3646_v42 = vmax.f32 %v3518_v48, 0.0  ;;  %v3520_v41 = vadd.f32 %v9275_v55, %v3380_v25  ;;  %v3879_v48 = vshll.u32 %v9422_v26, 16 }
 0x439   :  { %v3647_v16 = vmax.f32 %v3519_v29, 0.0  ;;  %v7031_v58 = vpack.c.bf16 %v3645_v38, %v3641_v7  ;;  %v10658_v29 = vrot.slane %v9405_v23, 1 }
 0x43a   :  { %v3648_v63 = vmax.f32 %v3520_v41, 0.0  ;;  %v3128_v40 = vpop.f32.mrb[52].mxu1  ;;  %v7032_v22 = vpack.c.bf16 %v3646_v42, %v3642_v51  ;;  %v7814_v51 = vld [vmem:[%s10597_s7 + $0xe8] sm:$0xff]  }
 0x43b   :  { %v9609_v3 = vpack.c.bf16 %v3647_v16, %v3645_v38  ;;  %v3381_v53 = vmul.f32 %v9268_v61, %v3128_v40  ;;  %v3130_v37 = vpop.f32.mrb[53].mxu1  ;;  %v3887_v38 = vshll.u32 %v9425_v62, 16  ;;  %5801 = vmatpush1.bf16.msra.mxu0 %v7814_v51 }
 0x43c   :  { %v9614_v25 = vpack.c.bf16 %v3648_v63, %v3646_v42  ;;  %v3382_v7 = vmul.f32 %v9270_v14, %v3130_v37  ;;  %v3132_v4 = vpop.f32.mrb[54].mxu1  ;;  %5629 = vmatprep.mubr.bf16.mxu0 %v7032_v22  ;;  %v3877_v42 = vor.u32 %v3875_v39, %v3861_v34  ;;  %v9624_v63 = vrot.slane %v3879_v48, 1  ;;  %5802 = vmatprep.subr.bf16.mxu0 %v10655_v19 }
 0x43d   :  { %10840 = vst [vmem:[#allocation18_spill] sm:$0xff] %v9609_v3  ;;  %v3521_v41 = vadd.f32 %v9273_v2, %v3381_v53  ;;  %v3383_v16 = vmul.f32 %v9268_v61, %v3132_v4  ;;  %v3134_v40 = vpop.f32.mrb[55].mxu1  ;;  %5630 = vmatmul.mubr.bf16.gmra.mrb[112].mxu0 %v7031_v58  ;;  %v9628_v8 = vrot.slane %v3887_v38, 1  ;;  %v4366_v34 = vrot.slane %v9388_v44, 1 }
 0x43e   :  { %v3522_v37 = vadd.f32 %v9275_v55, %v3382_v7  ;;  %v3384_v22 = vmul.f32 %v9270_v14, %v3134_v40  ;;  %v9634_v53 = vsel %vm1046_vm2, %v3877_v42, %v9624_v63  ;;  %v4512_v4 = vunpack.c.h.b16 %v9602_v32 }
 0x43f   :  { %v3523_v57 = vadd.f32 %v9273_v2, %v3383_v16  ;;  %v9640_v39 = vsel %vm1046_vm2, %v3885_v54, %v9628_v8  ;;  %v4517_v1 = vunpack.c.l.b16 %v9634_v53  ;;  %v3649_v48 = vmax.f32 %v3521_v41, 0.0 }
 0x440   :  { %v3524_v58 = vadd.f32 %v9275_v55, %v3384_v22  ;;  %v4518_v51 = vunpack.c.l.b16 %v9640_v39  ;;  %v3650_v38 = vmax.f32 %v3522_v37, 0.0  ;;  %v9651_v54 = vsel %vm1367_vm4, %v4366_v34, %v10658_v29 }
 0x441   :  { %v3651_v7 = vmax.f32 %v3523_v57, 0.0  ;;  %v9646_v44 = vpack.c.b16 %v4517_v1, %v4511_v28 }
 0x442   :  { %v3652_v16 = vmax.f32 %v3524_v58, 0.0  ;;  %v3138_v40 = vpop.f32.mrb[56].mxu1  ;;  %v9656_v57 = vpack.c.b16 %v4518_v51, %v4512_v4 }
 0x443   :  { %v9653_v42 = vpack.c.bf16 %v3651_v7, %v3649_v48  ;;  %v3385_v22 = vmul.f32 %v9268_v61, %v3138_v40  ;;  %v3140_v41 = vpop.f32.mrb[57].mxu1  ;;  %v4594_v40 = vunpack.c.h.b16 %v9614_v25 }
 0x444   :  { %v9658_v19 = vpack.c.bf16 %v3652_v16, %v3650_v38  ;;  %v3386_v37 = vmul.f32 %v9270_v14, %v3140_v41  ;;  %v3142_v58 = vpop.f32.mrb[58].mxu1  ;;  %v4593_v38 = vunpack.c.h.b16 %v9609_v3 }
 0x445   :  { %10841 = vst [vmem:[#allocation12_spill] sm:$0xff] %v9653_v42  ;;  %v3525_v28 = vadd.f32 %v9273_v2, %v3385_v22  ;;  %v3387_v1 = vmul.f32 %v9268_v61, %v3142_v58  ;;  %v3144_v18 = vpop.f32.mrb[59].mxu1  ;;  %v4599_v34 = vunpack.c.l.b16 %v9653_v42 }
 0x446   :  { %v3526_v48 = vadd.f32 %v9275_v55, %v3386_v37  ;;  %v3388_v7 = vmul.f32 %v9270_v14, %v3144_v18  ;;  %v4600_v4 = vunpack.c.l.b16 %v9658_v19 }
 0x447   :  { %v3527_v51 = vadd.f32 %v9273_v2, %v3387_v1  ;;  %v3653_v41 = vmax.f32 %v3525_v28, 0.0  ;;  %v4959_v29 = vpack.c.b16 %v4599_v34, %v4593_v38  ;;  %v7815_v28 = vld [vmem:[%s10597_s7 + $0xf0] sm:$0xff]  }
 0x448   :  { %v3528_v16 = vadd.f32 %v9275_v55, %v3388_v7  ;;  %v4960_v22 = vpack.c.b16 %v4600_v4, %v4594_v40  ;;  %v3654_v5 = vmax.f32 %v3526_v48, 0.0  ;;  %5803 = vmatpush1.bf16.msra.mxu0 %v7815_v28  ;;  %v4605_v4 = vunpack.c.h.b16 %v9653_v42 }
 0x449   :  { %v3655_v58 = vmax.f32 %v3527_v51, 0.0  ;;  %v10842_v51 = vmov 0  }
 0x44a   :  { %v3656_v12 = vmax.f32 %v3528_v16, 0.0  ;;  %v3148_v27 = vpop.f32.mrb[60].mxu1  ;;  %5637 = vmatprep.mubr.bf16.mxu0 %v4960_v22  ;;  %5804 = vmatprep.subr.bf16.mxu0 %v10842_v51 }
 0x44b   :  { %v9671_v37 = vpack.c.bf16 %v3655_v58, %v3653_v41  ;;  %v3389_v18 = vmul.f32 %v9268_v61, %v3148_v27  ;;  %v3150_v31 = vpop.f32.mrb[61].mxu1  ;;  %5638 = vmatmul.mubr.bf16.gmra.mrb[116].mxu0 %v4959_v29 }
 0x44c   :  { %v9674_v0 = vpack.c.bf16 %v3656_v12, %v3654_v5  ;;  %v3390_v1 = vmul.f32 %v9270_v14, %v3150_v31  ;;  %v3152_v49 = vpop.f32.mrb[62].mxu1  ;;  %v4606_v12 = vunpack.c.h.b16 %v9658_v19 }
 0x44d   :  { %v3529_v34 = vadd.f32 %v9273_v2, %v3389_v18  ;;  %v3391_v48 = vmul.f32 %v9268_v61, %v3152_v49  ;;  %v3154_v7 = vpop.f32.mrb[63].mxu1  ;;  %v4611_v40 = vunpack.c.l.b16 %v9671_v37 }
 0x44e   :  { %v3530_v27 = vadd.f32 %v9275_v55, %v3390_v1  ;;  %v3392_v29 = vmul.f32 %v9270_v14, %v3154_v7  ;;  %v4612_v31 = vunpack.c.l.b16 %v9674_v0 }
 0x44f   :  { %v3531_v5 = vadd.f32 %v9273_v2, %v3391_v48  ;;  %v3657_v16 = vmax.f32 %v3529_v34, 0.0  ;;  %v4965_v41 = vpack.c.b16 %v4611_v40, %v4605_v4  ;;  %v7816_v34 = vld [vmem:[%s10597_s7 + $0xf8] sm:$0xff]  }
 0x450   :  { %v3532_v49 = vadd.f32 %v9275_v55, %v3392_v29  ;;  %v4966_v38 = vpack.c.b16 %v4612_v31, %v4606_v12  ;;  %v3658_v58 = vmax.f32 %v3530_v27, 0.0  ;;  %v4364_v31 = vrot.slane %v9402_v21, 1  ;;  %5805 = vmatpush1.bf16.msra.mxu0 %v7816_v34 }
 0x451   :  { %v3659_v22 = vmax.f32 %v3531_v5, 0.0  ;;  %6031 = vmatprep.subr.bf16.mxu0 %v10842_v51  ;;  %v10845_v34 = vrot.slane %v9367_v24, 1 }
 0x452   :  { %v3660_v18 = vmax.f32 %v3532_v49, 0.0  ;;  %v3158_v1 = vpop.f32.mrb[64].mxu1  ;;  %5645 = vmatprep.mubr.bf16.mxu0 %v4966_v38 }
 0x453   :  { %v9691_v7 = vpack.c.bf16 %v3659_v22, %v3657_v16  ;;  %v3393_v28 = vmul.f32 %v9268_v61, %v3158_v1  ;;  %v3160_v3 = vpop.f32.mrb[65].mxu1  ;;  %5646 = vmatmul.mubr.bf16.gmra.mrb[120].mxu0 %v4965_v41  ;;  %v4617_v16 = vunpack.c.h.b16 %v9671_v37  ;;  %v4363_v41 = vrot.slane %v9385_v6, 1 }
 0x454   :  { %v9694_v48 = vpack.c.bf16 %v3660_v18, %v3658_v58  ;;  %v3394_v42 = vmul.f32 %v9270_v14, %v3160_v3  ;;  %v3162_v36 = vpop.f32.mrb[66].mxu1  ;;  %v4618_v3 = vunpack.c.h.b16 %v9674_v0 }
 0x455   :  { %10843 = vst [vmem:[#allocation14_spill] sm:$0xff] %v9691_v7  ;;  %v3533_v40 = vadd.f32 %v9273_v2, %v3393_v28  ;;  %v3395_v27 = vmul.f32 %v9268_v61, %v3162_v36  ;;  %v3164_v29 = vpop.f32.mrb[67].mxu1  ;;  %v4623_v12 = vunpack.c.l.b16 %v9691_v7  ;;  %v4365_v7 = vsel %vm1367_vm4, %v4363_v41, %v4364_v31 }
 0x456   :  { %10844 = vst [vmem:[#allocation23_spill] sm:$0xff] %v9694_v48  ;;  %v3534_v5 = vadd.f32 %v9275_v55, %v3394_v42  ;;  %v3396_v4 = vmul.f32 %v9270_v14, %v3164_v29  ;;  %v4624_v49 = vunpack.c.l.b16 %v9694_v48  ;;  %v10849_v41 = vrot.slane %v9364_v10, 1 }
 0x457   :  { %v3535_v38 = vadd.f32 %v9273_v2, %v3395_v27  ;;  %v3661_v58 = vmax.f32 %v3533_v40, 0.0  ;;  %v4971_v18 = vpack.c.b16 %v4623_v12, %v4617_v16  ;;  %v9716_v27 = vcombine.low %v10845_v34, %v9651_v54 }
 0x458   :  { %v3536_v36 = vadd.f32 %v9275_v55, %v3396_v4  ;;  %v4972_v22 = vpack.c.b16 %v4624_v49, %v4618_v3  ;;  %v3662_v1 = vmax.f32 %v3534_v5, 0.0 }
 0x459   :  { %v3663_v42 = vmax.f32 %v3535_v38, 0.0  ;;  %10846 = vst [vmem:[#allocation13_spill] sm:$0xff] %v9716_v27 }
 0x45a   :  { %v3664_v28 = vmax.f32 %v3536_v36, 0.0  ;;  %v3168_v29 = vpop.f32.mrb[68].mxu1  ;;  %5653 = vmatprep.mubr.bf16.mxu0 %v4972_v22 }
 0x45b   :  { %v9721_v4 = vpack.c.bf16 %v3663_v42, %v3661_v58  ;;  %v3397_v6 = vmul.f32 %v9268_v61, %v3168_v29  ;;  %v3170_v40 = vpop.f32.mrb[69].mxu1  ;;  %5654 = vmatmul.mubr.bf16.gmra.mrb[124].mxu0 %v4971_v18  ;;  %v9735_v58 = vcombine.low %v10849_v41, %v4365_v7 }
 0x45c   :  { %v9724_v12 = vpack.c.bf16 %v3664_v28, %v3662_v1  ;;  %v3398_v5 = vmul.f32 %v9270_v14, %v3170_v40  ;;  %v3172_v3 = vpop.f32.mrb[70].mxu1  ;;  %v10666_v28 = vrot.slane %v9425_v62, 1 }
 0x45d   :  { %10847 = vst [vmem:[#allocation16_spill] sm:$0xff] %v9721_v4  ;;  %v3537_v49 = vadd.f32 %v9273_v2, %v3397_v6  ;;  %v3399_v24 = vmul.f32 %v9268_v61, %v3172_v3  ;;  %v3174_v38 = vpop.f32.mrb[71].mxu1  ;;  %10850 = vst [vmem:[#allocation24_spill] sm:$0xff] %v9735_v58 }
 0x45e   :  { %10848 = vst [vmem:[#allocation22_spill] sm:$0xff] %v9724_v12  ;;  %v3538_v16 = vadd.f32 %v9275_v55, %v3398_v5  ;;  %v3400_v36 = vmul.f32 %v9270_v14, %v3174_v38  ;;  %5661 = vmatprep.mubr.bf16.mxu0 %v9724_v12 }
 0x45f   :  { %v3539_v22 = vadd.f32 %v9273_v2, %v3399_v24  ;;  %v3665_v18 = vmax.f32 %v3537_v49, 0.0 }
 0x460   :  { %v3540_v42 = vadd.f32 %v9275_v55, %v3400_v36  ;;  %v3666_v29 = vmax.f32 %v3538_v16, 0.0  ;;  %v10853_v16 = vrot.slane %v9405_v23, 1 }
 0x461   :  { %v3667_v1 = vmax.f32 %v3539_v22, 0.0 }
 0x462   :  { %v3668_v34 = vmax.f32 %v3540_v42, 0.0  ;;  %v3178_v6 = vpop.f32.mrb[72].mxu1  ;;  %v9753_v41 = vsel %vm1367_vm4, %v10853_v16, %v10666_v28  ;;  %v10668_v42 = vrot.slane %v9422_v26, 1 }
 0x463   :  { %v9739_v40 = vpack.c.bf16 %v3667_v1, %v3665_v18  ;;  %v3401_v5 = vmul.f32 %v9268_v61, %v3178_v6  ;;  %v3180_v3 = vpop.f32.mrb[73].mxu1  ;;  %5662 = vmatmul.mubr.bf16.gmra.mrb[128].mxu0 %v9721_v4  ;;  %10854 = vst [vmem:[#allocation26_spill] sm:$0xff] %v9753_v41  ;;  %v4514_v6 = vunpack.c.h.b16 %v9651_v54 }
 0x464   :  { %v9743_v24 = vpack.c.bf16 %v3668_v34, %v3666_v29  ;;  %v3402_v10 = vmul.f32 %v9270_v14, %v3180_v3  ;;  %v3182_v38 = vpop.f32.mrb[74].mxu1  ;;  %v4520_v29 = vunpack.c.l.b16 %v9753_v41 }
 0x465   :  { %10851 = vst [vmem:[#allocation17_spill] sm:$0xff] %v9739_v40  ;;  %v3541_v49 = vadd.f32 %v9273_v2, %v3401_v5  ;;  %v3403_v36 = vmul.f32 %v9268_v61, %v3182_v38  ;;  %v3184_v22 = vpop.f32.mrb[75].mxu1 }
 0x466   :  { %10852 = vst [vmem:[#allocation25_spill] sm:$0xff] %v9743_v24  ;;  %v3542_v18 = vadd.f32 %v9275_v55, %v3402_v10  ;;  %v3404_v1 = vmul.f32 %v9270_v14, %v3184_v22  ;;  %5669 = vmatprep.mubr.bf16.mxu0 %v9743_v24  ;;  %v9763_v38 = vpack.c.b16 %v4520_v29, %v4514_v6 }
 0x467   :  { %v3543_v34 = vadd.f32 %v9273_v2, %v3403_v36  ;;  %v3669_v23 = vmax.f32 %v3541_v49, 0.0  ;;  %v9770_v10 = vsel %vm1367_vm4, %v4364_v31, %v10668_v42 }
 0x468   :  { %v3544_v5 = vadd.f32 %v9275_v55, %v3404_v1  ;;  %10855 = vst [vmem:[#allocation27_spill] sm:$0xff] %v9763_v38  ;;  %10856 = vst [vmem:[#allocation28_spill] sm:$0xff] %v9770_v10  ;;  %v3670_v22 = vmax.f32 %v3542_v18, 0.0  ;;  %v4519_v36 = vunpack.c.l.b16 %v9770_v10  ;;  %v4513_v1 = vunpack.c.h.b16 %v4365_v7 }
 0x469   :  { %v3671_v3 = vmax.f32 %v3543_v34, 0.0 }
 0x46a   :  { %v3672_v16 = vmax.f32 %v3544_v5, 0.0  ;;  %v3188_v28 = vpop.f32.mrb[76].mxu1  ;;  %v9782_v5 = vpack.c.b16 %v4519_v36, %v4513_v1 }
 0x46b   :  { %v9773_v41 = vpack.c.bf16 %v3671_v3, %v3669_v23  ;;  %v3405_v54 = vmul.f32 %v9268_v61, %v3188_v28  ;;  %v3190_v49 = vpop.f32.mrb[77].mxu1  ;;  %5670 = vmatmul.mubr.bf16.gmra.mrb[132].mxu0 %v9739_v40 }
 0x46c   :  { %v9777_v29 = vpack.c.bf16 %v3672_v16, %v3670_v22  ;;  %v3406_v21 = vmul.f32 %v9270_v14, %v3190_v49  ;;  %v3192_v34 = vpop.f32.mrb[78].mxu1  ;;  %10859 = vst [vmem:[#allocation31_spill] sm:$0xff] %v9782_v5 }
 0x46d   :  { %10857 = vst [vmem:[#allocation29_spill] sm:$0xff] %v9773_v41  ;;  %v3545_v31 = vadd.f32 %v9273_v2, %v3405_v54  ;;  %v3407_v18 = vmul.f32 %v9268_v61, %v3192_v34  ;;  %v3194_v6 = vpop.f32.mrb[79].mxu1 }
 0x46e   :  { %10858 = vst [vmem:[#allocation30_spill] sm:$0xff] %v9777_v29  ;;  %v3546_v23 = vadd.f32 %v9275_v55, %v3406_v21  ;;  %v3408_v28 = vmul.f32 %v9270_v14, %v3194_v6  ;;  %5677 = vmatprep.mubr.bf16.mxu0 %v9777_v29 }
 0x46f   :  { %v3547_v7 = vadd.f32 %v9273_v2, %v3407_v18  ;;  %v3673_v22 = vmax.f32 %v3545_v31, 0.0 }
 0x470   :  { %v3548_v3 = vadd.f32 %v9275_v55, %v3408_v28  ;;  %v3674_v49 = vmax.f32 %v3546_v23, 0.0 }
 0x471   :  { %v3675_v16 = vmax.f32 %v3547_v7, 0.0 }
 0x472   :  { %v3676_v42 = vmax.f32 %v3548_v3, 0.0  ;;  %v3198_v54 = vpop.f32.mrb[80].mxu1 }
 0x473   :  { %v9789_v10 = vpack.c.bf16 %v3675_v16, %v3673_v22  ;;  %v3409_v36 = vmul.f32 %v9268_v61, %v3198_v54  ;;  %v3200_v1 = vpop.f32.mrb[81].mxu1  ;;  %5678 = vmatmul.mubr.bf16.gmra.mrb[136].mxu0 %v9773_v41 }
 0x474   :  { %v9793_v21 = vpack.c.bf16 %v3676_v42, %v3674_v49  ;;  %v3410_v34 = vmul.f32 %v9270_v14, %v3200_v1  ;;  %v3202_v6 = vpop.f32.mrb[82].mxu1 }
 0x475   :  { %10860 = vst [vmem:[#allocation32_spill] sm:$0xff] %v9789_v10  ;;  %v3549_v18 = vadd.f32 %v9273_v2, %v3409_v36  ;;  %v3411_v31 = vmul.f32 %v9268_v61, %v3202_v6  ;;  %v3204_v28 = vpop.f32.mrb[83].mxu1 }
 0x476   :  { %10861 = vst [vmem:[#allocation33_spill] sm:$0xff] %v9793_v21  ;;  %v3550_v23 = vadd.f32 %v9275_v55, %v3410_v34  ;;  %v3412_v7 = vmul.f32 %v9270_v14, %v3204_v28 }
 0x477   :  { %v3677_v3 = vmax.f32 %v3549_v18, 0.0  ;;  %v3551_v16 = vadd.f32 %v9273_v2, %v3411_v31 }
 0x478   :  { %v3678_v54 = vmax.f32 %v3550_v23, 0.0  ;;  %v3552_v5 = vadd.f32 %v9275_v55, %v3412_v7 }
 0x479   :  { %v3679_v42 = vmax.f32 %v3551_v16, 0.0  ;;  %v7033_v38 = vpack.c.bf16 %v3677_v3, %v3673_v22 }
 0x47a   :  { %v3680_v58 = vmax.f32 %v3552_v5, 0.0  ;;  %v3208_v1 = vpop.f32.mrb[84].mxu1  ;;  %v7034_v27 = vpack.c.bf16 %v3678_v54, %v3674_v49 }
 0x47b   :  { %v9802_v10 = vpack.c.bf16 %v3679_v42, %v3677_v3  ;;  %v3413_v36 = vmul.f32 %v9268_v61, %v3208_v1  ;;  %v3210_v6 = vpop.f32.mrb[85].mxu1 }
 0x47c   :  { %v9805_v21 = vpack.c.bf16 %v3680_v58, %v3678_v54  ;;  %v3414_v34 = vmul.f32 %v9270_v14, %v3210_v6  ;;  %v3212_v18 = vpop.f32.mrb[86].mxu1  ;;  %5685 = vmatprep.mubr.bf16.mxu0 %v7034_v27 }
 0x47d   :  { %10862 = vst [vmem:[#allocation34_spill] sm:$0xff] %v9802_v10  ;;  %v3553_v31 = vadd.f32 %v9273_v2, %v3413_v36  ;;  %v3415_v28 = vmul.f32 %v9268_v61, %v3212_v18  ;;  %v3214_v23 = vpop.f32.mrb[87].mxu1  ;;  %5686 = vmatmul.mubr.bf16.gmra.mrb[140].mxu0 %v7033_v38 }
 0x47e   :  { %10863 = vst [vmem:[#allocation35_spill] sm:$0xff] %v9805_v21  ;;  %v3554_v5 = vadd.f32 %v9275_v55, %v3414_v34  ;;  %v3416_v22 = vmul.f32 %v9270_v14, %v3214_v23 }
 0x47f   :  { %v3555_v49 = vadd.f32 %v9273_v2, %v3415_v28  ;;  %v3681_v58 = vmax.f32 %v3553_v31, 0.0 }
 0x480   :  { %v3556_v7 = vadd.f32 %v9275_v55, %v3416_v22  ;;  %v3682_v16 = vmax.f32 %v3554_v5, 0.0 }
 0x481   :  { %v3683_v3 = vmax.f32 %v3555_v49, 0.0  ;;  %v4678_v49 = vunpack.c.h.b16 %v9805_v21 }
 0x482   :  { %v3684_v54 = vmax.f32 %v3556_v7, 0.0  ;;  %v3218_v42 = vpop.f32.mrb[88].mxu1 }
 0x483   :  { %v9814_v27 = vpack.c.bf16 %v3683_v3, %v3681_v58  ;;  %v3417_v1 = vmul.f32 %v9268_v61, %v3218_v42  ;;  %v3220_v36 = vpop.f32.mrb[89].mxu1  ;;  %v4677_v3 = vunpack.c.h.b16 %v9802_v10 }
 0x484   :  { %v9817_v6 = vpack.c.bf16 %v3684_v54, %v3682_v16  ;;  %v3418_v38 = vmul.f32 %v9270_v14, %v3220_v36  ;;  %v3222_v34 = vpop.f32.mrb[90].mxu1 }
 0x485   :  { %10864 = vst [vmem:[#allocation36_spill] sm:$0xff] %v9814_v27  ;;  %v3557_v18 = vadd.f32 %v9273_v2, %v3417_v1  ;;  %v3419_v28 = vmul.f32 %v9268_v61, %v3222_v34  ;;  %v3224_v23 = vpop.f32.mrb[91].mxu1  ;;  %v4683_v31 = vunpack.c.l.b16 %v9814_v27 }
 0x486   :  { %10865 = vst [vmem:[#allocation37_spill] sm:$0xff] %v9817_v6  ;;  %v3558_v5 = vadd.f32 %v9275_v55, %v3418_v38  ;;  %v3420_v22 = vmul.f32 %v9270_v14, %v3224_v23  ;;  %v4684_v7 = vunpack.c.l.b16 %v9817_v6 }
 0x487   :  { %v3559_v58 = vadd.f32 %v9273_v2, %v3419_v28  ;;  %v3685_v42 = vmax.f32 %v3557_v18, 0.0  ;;  %v5001_v36 = vpack.c.b16 %v4683_v31, %v4677_v3 }
 0x488   :  { %v3560_v16 = vadd.f32 %v9275_v55, %v3420_v22  ;;  %v5002_v54 = vpack.c.b16 %v4684_v7, %v4678_v49  ;;  %v3686_v34 = vmax.f32 %v3558_v5, 0.0 }
 0x489   :  { %v3687_v1 = vmax.f32 %v3559_v58, 0.0 }
 0x48a   :  { %v3688_v41 = vmax.f32 %v3560_v16, 0.0  ;;  %v3228_v29 = vpop.f32.mrb[92].mxu1  ;;  %5693 = vmatprep.mubr.bf16.mxu0 %v5002_v54 }
 0x48b   :  { %v9830_v38 = vpack.c.bf16 %v3687_v1, %v3685_v42  ;;  %v3421_v23 = vmul.f32 %v9268_v61, %v3228_v29  ;;  %v3230_v21 = vpop.f32.mrb[93].mxu1  ;;  %5694 = vmatmul.mubr.bf16.gmra.mrb[144].mxu0 %v5001_v36  ;;  %v4690_v29 = vunpack.c.h.b16 %v9817_v6 }
 0x48c   :  { %v9833_v40 = vpack.c.bf16 %v3688_v41, %v3686_v34  ;;  %v3422_v28 = vmul.f32 %v9270_v14, %v3230_v21  ;;  %v3232_v10 = vpop.f32.mrb[94].mxu1  ;;  %v4689_v21 = vunpack.c.h.b16 %v9814_v27 }
 0x48d   :  { %10866 = vst [vmem:[#allocation38_spill] sm:$0xff] %v9830_v38  ;;  %v3561_v22 = vadd.f32 %v9273_v2, %v3421_v23  ;;  %v3423_v18 = vmul.f32 %v9268_v61, %v3232_v10  ;;  %v3234_v31 = vpop.f32.mrb[95].mxu1  ;;  %v4695_v5 = vunpack.c.l.b16 %v9830_v38 }
 0x48e   :  { %10867 = vst [vmem:[#allocation39_spill] sm:$0xff] %v9833_v40  ;;  %v3562_v49 = vadd.f32 %v9275_v55, %v3422_v28  ;;  %v3424_v7 = vmul.f32 %v9270_v14, %v3234_v31  ;;  %v4696_v58 = vunpack.c.l.b16 %v9833_v40 }
 0x48f   :  { %v3563_v41 = vadd.f32 %v9273_v2, %v3423_v18  ;;  %v3689_v54 = vmax.f32 %v3561_v22, 0.0  ;;  %v5007_v42 = vpack.c.b16 %v4695_v5, %v4689_v21 }
 0x490   :  { %v3564_v3 = vadd.f32 %v9275_v55, %v3424_v7  ;;  %v5008_v16 = vpack.c.b16 %v4696_v58, %v4690_v29  ;;  %v3690_v1 = vmax.f32 %v3562_v49, 0.0 }
 0x491   :  { %v3691_v10 = vmax.f32 %v3563_v41, 0.0  ;;  %v4702_v41 = vunpack.c.h.b16 %v9833_v40 }
 0x492   :  { %v3692_v36 = vmax.f32 %v3564_v3, 0.0  ;;  %v3238_v34 = vpop.f32.mrb[96].mxu1  ;;  %5701 = vmatprep.mubr.bf16.mxu0 %v5008_v16  ;;  %v4701_v16 = vunpack.c.h.b16 %v9830_v38 }
 0x493   :  { %v9846_v23 = vpack.c.bf16 %v3691_v10, %v3689_v54  ;;  %v3425_v28 = vmul.f32 %v9268_v61, %v3238_v34  ;;  %v3240_v31 = vpop.f32.mrb[97].mxu1  ;;  %5702 = vmatmul.mubr.bf16.gmra.mrb[148].mxu0 %v5007_v42 }
 0x494   :  { %v9849_v6 = vpack.c.bf16 %v3692_v36, %v3690_v1  ;;  %v3426_v18 = vmul.f32 %v9270_v14, %v3240_v31  ;;  %v3242_v27 = vpop.f32.mrb[98].mxu1 }
 0x495   :  { %10868 = vst [vmem:[#allocation40_spill] sm:$0xff] %v9846_v23  ;;  %v3565_v7 = vadd.f32 %v9273_v2, %v3425_v28  ;;  %v3427_v22 = vmul.f32 %v9268_v61, %v3242_v27  ;;  %v3244_v5 = vpop.f32.mrb[99].mxu1  ;;  %v4707_v49 = vunpack.c.l.b16 %v9846_v23 }
 0x496   :  { %10869 = vst [vmem:[#allocation41_spill] sm:$0xff] %v9849_v6  ;;  %v3566_v29 = vadd.f32 %v9275_v55, %v3426_v18  ;;  %v3428_v58 = vmul.f32 %v9270_v14, %v3244_v5  ;;  %v4708_v21 = vunpack.c.l.b16 %v9849_v6 }
 0x497   :  { %v3567_v3 = vadd.f32 %v9273_v2, %v3427_v22  ;;  %v3693_v42 = vmax.f32 %v3565_v7, 0.0  ;;  %v5013_v1 = vpack.c.b16 %v4707_v49, %v4701_v16 }
 0x498   :  { %v3568_v54 = vadd.f32 %v9275_v55, %v3428_v58  ;;  %v5014_v10 = vpack.c.b16 %v4708_v21, %v4702_v41  ;;  %v3694_v36 = vmax.f32 %v3566_v29, 0.0 }
 0x499   :  { %v3695_v27 = vmax.f32 %v3567_v3, 0.0 }
 0x49a   :  { %v3696_v34 = vmax.f32 %v3568_v54, 0.0  ;;  %v3248_v28 = vpop.f32.mrb[100].mxu1  ;;  %5709 = vmatprep.mubr.bf16.mxu0 %v5014_v10 }
 0x49b   :  { %v9862_v31 = vpack.c.bf16 %v3695_v27, %v3693_v42  ;;  %v3429_v18 = vmul.f32 %v9268_v61, %v3248_v28  ;;  %v3250_v5 = vpop.f32.mrb[101].mxu1  ;;  %5710 = vmatmul.mubr.bf16.gmra.mrb[152].mxu0 %v5013_v1 }
 0x49c   :  { %v9865_v23 = vpack.c.bf16 %v3696_v34, %v3694_v36  ;;  %v3430_v22 = vmul.f32 %v9270_v14, %v3250_v5  ;;  %v3252_v6 = vpop.f32.mrb[102].mxu1 }
 0x49d   :  { %10870 = vst [vmem:[#allocation42_spill] sm:$0xff] %v9862_v31  ;;  %v3569_v58 = vadd.f32 %v9273_v2, %v3429_v18  ;;  %v3431_v7 = vmul.f32 %v9268_v61, %v3252_v6  ;;  %v3254_v49 = vpop.f32.mrb[103].mxu1 }
 0x49e   :  { %10871 = vst [vmem:[#allocation43_spill] sm:$0xff] %v9865_v23  ;;  %v3570_v29 = vadd.f32 %v9275_v55, %v3430_v22  ;;  %v3432_v41 = vmul.f32 %v9270_v14, %v3254_v49  ;;  %5717 = vmatprep.mubr.bf16.mxu0 %v9865_v23 }
 0x49f   :  { %v3571_v21 = vadd.f32 %v9273_v2, %v3431_v7  ;;  %v3697_v16 = vmax.f32 %v3569_v58, 0.0 }
 0x4a0   :  { %v3572_v3 = vadd.f32 %v9275_v55, %v3432_v41  ;;  %v3698_v10 = vmax.f32 %v3570_v29, 0.0 }
 0x4a1   :  { %v3699_v54 = vmax.f32 %v3571_v21, 0.0 }
 0x4a2   :  { %v3700_v42 = vmax.f32 %v3572_v3, 0.0  ;;  %v3258_v27 = vpop.f32.mrb[104].mxu1 }
 0x4a3   :  { %v9875_v1 = vpack.c.bf16 %v3699_v54, %v3697_v16  ;;  %v3433_v6 = vmul.f32 %v9268_v61, %v3258_v27  ;;  %v3260_v36 = vpop.f32.mrb[105].mxu1  ;;  %5718 = vmatmul.mubr.bf16.gmra.mrb[156].mxu0 %v9862_v31 }
 0x4a4   :  { %v9879_v34 = vpack.c.bf16 %v3700_v42, %v3698_v10  ;;  %v3434_v28 = vmul.f32 %v9270_v14, %v3260_v36  ;;  %v3262_v18 = vpop.f32.mrb[106].mxu1 }
 0x4a5   :  { %10872 = vst [vmem:[#allocation44_spill] sm:$0xff] %v9875_v1  ;;  %v3573_v5 = vadd.f32 %v9273_v2, %v3433_v6  ;;  %v3435_v22 = vmul.f32 %v9268_v61, %v3262_v18  ;;  %v3264_v58 = vpop.f32.mrb[107].mxu1 }
 0x4a6   :  { %10873 = vst [vmem:[#allocation45_spill] sm:$0xff] %v9879_v34  ;;  %v3574_v7 = vadd.f32 %v9275_v55, %v3434_v28  ;;  %v3436_v49 = vmul.f32 %v9270_v14, %v3264_v58  ;;  %5725 = vmatprep.mubr.bf16.mxu0 %v9879_v34 }
 0x4a7   :  { %v3575_v29 = vadd.f32 %v9273_v2, %v3435_v22  ;;  %v3701_v21 = vmax.f32 %v3573_v5, 0.0 }
 0x4a8   :  { %v3576_v41 = vadd.f32 %v9275_v55, %v3436_v49  ;;  %v3702_v16 = vmax.f32 %v3574_v7, 0.0 }
 0x4a9   :  { %v3703_v3 = vmax.f32 %v3575_v29, 0.0 }
 0x4aa   :  { %v3704_v54 = vmax.f32 %v3576_v41, 0.0  ;;  %v3268_v10 = vpop.f32.mrb[108].mxu1 }
 0x4ab   :  { %v9889_v42 = vpack.c.bf16 %v3703_v3, %v3701_v21  ;;  %v3437_v27 = vmul.f32 %v9268_v61, %v3268_v10  ;;  %v3270_v6 = vpop.f32.mrb[109].mxu1  ;;  %5726 = vmatmul.mubr.bf16.gmra.mrb[160].mxu0 %v9875_v1 }
 0x4ac   :  { %v9893_v36 = vpack.c.bf16 %v3704_v54, %v3702_v16  ;;  %v3438_v28 = vmul.f32 %v9270_v14, %v3270_v6  ;;  %v3272_v18 = vpop.f32.mrb[110].mxu1 }
 0x4ad   :  { %10874 = vst [vmem:[#allocation46_spill] sm:$0xff] %v9889_v42  ;;  %v3577_v22 = vadd.f32 %v9273_v2, %v3437_v27  ;;  %v3439_v5 = vmul.f32 %v9268_v61, %v3272_v18  ;;  %v3274_v58 = vpop.f32.mrb[111].mxu1 }
 0x4ae   :  { %10875 = vst [vmem:[#allocation47_spill] sm:$0xff] %v9893_v36  ;;  %v3578_v7 = vadd.f32 %v9275_v55, %v3438_v28  ;;  %v3440_v49 = vmul.f32 %v9270_v14, %v3274_v58  ;;  %5733 = vmatprep.mubr.bf16.mxu0 %v9893_v36 }
 0x4af   :  { %v3579_v29 = vadd.f32 %v9273_v2, %v3439_v5  ;;  %v3705_v21 = vmax.f32 %v3577_v22, 0.0 }
 0x4b0   :  { %v3580_v41 = vadd.f32 %v9275_v55, %v3440_v49  ;;  %v3706_v16 = vmax.f32 %v3578_v7, 0.0 }
 0x4b1   :  { %v3707_v3 = vmax.f32 %v3579_v29, 0.0 }
 0x4b2   :  { %v3708_v54 = vmax.f32 %v3580_v41, 0.0  ;;  %v3278_v10 = vpop.f32.mrb[112].mxu1 }
 0x4b3   :  { %v9903_v6 = vpack.c.bf16 %v3707_v3, %v3705_v21  ;;  %v3441_v27 = vmul.f32 %v9268_v61, %v3278_v10  ;;  %v3280_v18 = vpop.f32.mrb[113].mxu1  ;;  %5734 = vmatmul.mubr.bf16.gmra.mrb[164].mxu0 %v9889_v42 }
 0x4b4   :  { %v9907_v28 = vpack.c.bf16 %v3708_v54, %v3706_v16  ;;  %v3442_v58 = vmul.f32 %v9270_v14, %v3280_v18  ;;  %v3282_v36 = vpop.f32.mrb[114].mxu1 }
 0x4b5   :  { %v3581_v5 = vadd.f32 %v9273_v2, %v3441_v27  ;;  %v3443_v22 = vmul.f32 %v9268_v61, %v3282_v36  ;;  %v3284_v49 = vpop.f32.mrb[115].mxu1 }
 0x4b6   :  { %10876 = vst [vmem:[#allocation48_spill] sm:$0xff] %v9907_v28  ;;  %v3582_v7 = vadd.f32 %v9275_v55, %v3442_v58  ;;  %v3444_v29 = vmul.f32 %v9270_v14, %v3284_v49 }
 0x4b7   :  { %v3709_v41 = vmax.f32 %v3581_v5, 0.0  ;;  %v3583_v3 = vadd.f32 %v9273_v2, %v3443_v22 }
 0x4b8   :  { %v3710_v10 = vmax.f32 %v3582_v7, 0.0  ;;  %v3584_v1 = vadd.f32 %v9275_v55, %v3444_v29 }
 0x4b9   :  { %v3711_v54 = vmax.f32 %v3583_v3, 0.0  ;;  %v7035_v31 = vpack.c.bf16 %v3709_v41, %v3705_v21 }
 0x4ba   :  { %v3712_v34 = vmax.f32 %v3584_v1, 0.0  ;;  %v3288_v18 = vpop.f32.mrb[116].mxu1  ;;  %v7036_v23 = vpack.c.bf16 %v3710_v10, %v3706_v16 }
 0x4bb   :  { %v9916_v38 = vpack.c.bf16 %v3711_v54, %v3709_v41  ;;  %v3445_v36 = vmul.f32 %v9268_v61, %v3288_v18  ;;  %v3290_v27 = vpop.f32.mrb[117].mxu1 }
 0x4bc   :  { %v9919_v40 = vpack.c.bf16 %v3712_v34, %v3710_v10  ;;  %v3446_v58 = vmul.f32 %v9270_v14, %v3290_v27  ;;  %v3292_v5 = vpop.f32.mrb[118].mxu1  ;;  %5741 = vmatprep.mubr.bf16.mxu0 %v7036_v23 }
 0x4bd   :  { %v3585_v22 = vadd.f32 %v9273_v2, %v3445_v36  ;;  %v3447_v49 = vmul.f32 %v9268_v61, %v3292_v5  ;;  %v3294_v7 = vpop.f32.mrb[119].mxu1  ;;  %5742 = vmatmul.mubr.bf16.gmra.mrb[168].mxu0 %v7035_v31 }
 0x4be   :  { %v3586_v1 = vadd.f32 %v9275_v55, %v3446_v58  ;;  %v3448_v21 = vmul.f32 %v9270_v14, %v3294_v7 }
 0x4bf   :  { %v3587_v16 = vadd.f32 %v9273_v2, %v3447_v49  ;;  %v3713_v34 = vmax.f32 %v3585_v22, 0.0  ;;  %v4761_v22 = vunpack.c.h.b16 %v9916_v38 }
 0x4c0   :  { %v3588_v29 = vadd.f32 %v9275_v55, %v3448_v21  ;;  %v3714_v3 = vmax.f32 %v3586_v1, 0.0 }
 0x4c1   :  { %v3715_v41 = vmax.f32 %v3587_v16, 0.0 }
 0x4c2   :  { %v3716_v10 = vmax.f32 %v3588_v29, 0.0  ;;  %v3298_v54 = vpop.f32.mrb[120].mxu1  ;;  %v4762_v29 = vunpack.c.h.b16 %v9919_v40 }
 0x4c3   :  { %v9928_v23 = vpack.c.bf16 %v3715_v41, %v3713_v34  ;;  %v3449_v18 = vmul.f32 %v9268_v61, %v3298_v54  ;;  %v3300_v36 = vpop.f32.mrb[121].mxu1 }
 0x4c4   :  { %v9931_v27 = vpack.c.bf16 %v3716_v10, %v3714_v3  ;;  %v3450_v31 = vmul.f32 %v9270_v14, %v3300_v36  ;;  %v3302_v58 = vpop.f32.mrb[122].mxu1 }
 0x4c5   :  { %v3589_v5 = vadd.f32 %v9273_v2, %v3449_v18  ;;  %v3451_v49 = vmul.f32 %v9268_v61, %v3302_v58  ;;  %v3304_v7 = vpop.f32.mrb[123].mxu1  ;;  %v4767_v1 = vunpack.c.l.b16 %v9928_v23 }
 0x4c6   :  { %v3590_v21 = vadd.f32 %v9275_v55, %v3450_v31  ;;  %v3452_v16 = vmul.f32 %v9270_v14, %v3304_v7  ;;  %v4768_v34 = vunpack.c.l.b16 %v9931_v27 }
 0x4c7   :  { %v3591_v41 = vadd.f32 %v9273_v2, %v3451_v49  ;;  %v5043_v3 = vpack.c.b16 %v4767_v1, %v4761_v22  ;;  %v3717_v18 = vmax.f32 %v3589_v5, 0.0 }
 0x4c8   :  { %v3592_v10 = vadd.f32 %v9275_v55, %v3452_v16  ;;  %v5044_v54 = vpack.c.b16 %v4768_v34, %v4762_v29  ;;  %v3718_v58 = vmax.f32 %v3590_v21, 0.0  ;;  %v4773_v21 = vunpack.c.h.b16 %v9928_v23 }
 0x4c9   :  { %v3719_v36 = vmax.f32 %v3591_v41, 0.0  ;;  %v4774_v41 = vunpack.c.h.b16 %v9931_v27 }
 0x4ca   :  { %v3720_v4 = vmax.f32 %v3592_v10, 0.0  ;;  %v3308_v24 = vpop.f32.mrb[124].mxu1  ;;  %5749 = vmatprep.mubr.bf16.mxu0 %v5044_v54 }
 0x4cb   :  { %v9944_v12 = vpack.c.bf16 %v3719_v36, %v3717_v18  ;;  %v3453_v31 = vmul.f32 %v9268_v61, %v3308_v24  ;;  %v3310_v7 = vpop.f32.mrb[125].mxu1  ;;  %5750 = vmatmul.mubr.bf16.gmra.mrb[172].mxu0 %v5043_v3 }
 0x4cc   :  { %v9947_v48 = vpack.c.bf16 %v3720_v4, %v3718_v58  ;;  %v3454_v49 = vmul.f32 %v9270_v14, %v3310_v7  ;;  %v3312_v22 = vpop.f32.mrb[126].mxu1 }
 0x4cd   :  { %v3593_v1 = vadd.f32 %v9273_v2, %v3453_v31  ;;  %v3455_v5 = vmul.f32 %v9268_v61, %v3312_v22  ;;  %v3314_v16 = vpop.f32.mrb[127].mxu1  ;;  %v4779_v29 = vunpack.c.l.b16 %v9944_v12 }
 0x4ce   :  { %v3594_v34 = vadd.f32 %v9275_v55, %v3454_v49  ;;  %v3456_v24 = vmul.f32 %v9270_v14, %v3314_v16  ;;  %v4780_v4 = vunpack.c.l.b16 %v9947_v48  ;;  %v4785_v14 = vunpack.c.h.b16 %v9944_v12 }
 0x4cf   :  { %v3595_v3 = vadd.f32 %v9273_v2, %v3455_v5  ;;  %v5049_v10 = vpack.c.b16 %v4779_v29, %v4773_v21  ;;  %v3721_v61 = vmax.f32 %v3593_v1, 0.0  ;;  %v4786_v2 = vunpack.c.h.b16 %v9947_v48  ;;  %v7817_v21 = vld [vmem:[%s10597_s7 + $0x100] sm:$0xff]  }
 0x4d0   :  { %v3596_v54 = vadd.f32 %v9275_v55, %v3456_v24  ;;  %v5050_v18 = vpack.c.b16 %v4780_v4, %v4774_v41  ;;  %v3722_v58 = vmax.f32 %v3594_v34, 0.0  ;;  %v4189_v1 = vshll.u32 %v9889_v42, 16 }
 0x4d1   :  { %v3723_v36 = vmax.f32 %v3595_v3, 0.0  ;;  %v4201_v34 = vshrl.u32 %v9889_v42, 16  ;;  %v4205_v24 = vshll.u32 %v9903_v6, 16  ;;  %v3903_v3 = vshll.u32 %v9448_v46, 16 }
 0x4d2   :  { %v3724_v31 = vmax.f32 %v3596_v54, 0.0  ;;  %5757 = vmatprep.mubr.bf16.mxu0 %v5050_v18  ;;  %v9973_v29 = vrot.slane %v4189_v1, 1  ;;  %v3899_v54 = vshrl.u32 %v9425_v62, 16 }
 0x4d3   :  { %v9960_v7 = vpack.c.bf16 %v3723_v36, %v3721_v61  ;;  %5758 = vmatmul.mubr.bf16.gmra.mrb[176].mxu0 %v5049_v10  ;;  %v4207_v4 = vrot.slane %v4205_v24, 1  ;;  %v3905_v18 = vrot.slane %v3903_v3, 1  ;;  %v3891_v61 = vshrl.u32 %v9422_v26, 16 }
 0x4d4   :  { %v9962_v49 = vpack.c.bf16 %v3724_v31, %v3722_v58  ;;  %v4203_v41 = vor.u32 %v4201_v34, %v9973_v29  ;;  %v3901_v58 = vor.u32 %v3899_v54, %v9628_v8  ;;  %v4238_v8 = vshll.u32 %v9919_v40, 16 }
 0x4d5   :  { %v4791_v22 = vunpack.c.l.b16 %v9960_v7  ;;  %v3893_v31 = vor.u32 %v3891_v61, %v9624_v63  ;;  %v4220_v54 = vshrl.u32 %v9907_v28, 16  ;;  %v10713_v61 = vrot.slane %v9889_v42, 1 }
 0x4d6   :  { %v4792_v5 = vunpack.c.l.b16 %v9962_v49  ;;  %v9987_v10 = vsel %vm1046_vm2, %v4203_v41, %v4207_v4  ;;  %v4240_v3 = vrot.slane %v4238_v8, 1 }
 0x4d7   :  { %v5055_v55 = vpack.c.b16 %v4791_v22, %v4785_v14  ;;  %v7820_v14 = vld [vmem:[%s10597_s7 + $0x118] sm:$0xff]   ;;  %v4226_v22 = vshll.u32 %v9916_v38, 16 }
 0x4d8   :  { %v5056_v16 = vpack.c.b16 %v4792_v5, %v4786_v2  ;;  %v3910_v2 = vshrl.u32 %v9448_v46, 16  ;;  %v3906_v5 = vsel %vm1046_vm2, %v3901_v58, %v3905_v18  ;;  %v10877_v58 = vcombine.low %v9595_v59, %v9602_v32 }
 0x4d9   :  { %v4228_v1 = vrot.slane %v4226_v22, 1  ;;  %v4536_v24 = vunpack.c.h.b16 %v3906_v5  ;;  %v4450_v32 = vrot.slane %v9919_v40, 1 }
 0x4da   :  { %5765 = vmatprep.mubr.bf16.mxu0 %v5056_v16  ;;  %v3912_v63 = vor.u32 %v3910_v2, %v3905_v18  ;;  %v7821_v16 = vld [vmem:[%s10597_s7 + $0x120] sm:$0xff]   ;;  %v4231_v18 = vshll.u32 %v9928_v23, 16 }
 0x4db   :  { %5766 = vmatmul.mubr.bf16.gmra.mrb[180].mxu0 %v5055_v55  ;;  %v4524_v55 = vunpack.c.h.b16 %v9640_v39  ;;  %v4443_v39 = vrot.slane %v9903_v6, 1 }
 0x4dc   :  { %5806 = vmatprep.mubr.bf16.mxu0 %v9470_v52  ;;  %v7818_v52 = vld [vmem:[%s10597_s7 + $0x108] sm:$0xff]   ;;  %v4233_v2 = vrot.slane %v4231_v18, 1  ;;  %v3907_v18 = vshrl.u32 %v9444_v50, 16 }
 0x4dd   :  { %v10043_v59 = vsel %vm1367_vm4, %v10713_v61, %v4443_v39  ;;  %v4251_v61 = vshll.u32 %v9944_v12, 16 }
 0x4de   :  { %10878 = vst [vmem:[#allocation49_spill] sm:$0xff] %v10043_v59  ;;  %v10904_v59 = vld [vmem:[#allocation39_spill] sm:$0xff] }
 0x4e3   :  { %5807 = vmatmul.mubr.bf16.vlgmr.msra.gmra.mrb[72].mxu0 %v9464_v35  ;;  %v3895_v35 = vshll.u32 %v9444_v50, 16 }
 0x4e4   :  { %6032 = vmatpush1.bf16.msra.mxu0 %v7817_v21  ;;  %5814 = vmatprep.mubr.bf16.mxu0 %v9501_v45  ;;  %v7819_v45 = vld [vmem:[%s10597_s7 + $0x110] sm:$0xff]   ;;  %v4530_v21 = vunpack.c.l.b16 %v3906_v5  ;;  %v4451_v5 = vrot.slane %v9931_v27, 1 }
 0x4e5   :  { %6033 = vmatprep.subr.bf16.mxu0 %v10842_v51  ;;  %v9995_v36 = vrot.slane %v3895_v35, 1  ;;  %v4224_v35 = vshrl.u32 %v9916_v38, 16 }
 0x4e7   :  { %v4229_v22 = vor.u32 %v4228_v1, %v4224_v35  ;;  %v10712_v1 = vrot.slane %v9907_v28, 1  ;;  %v4447_v35 = vrot.slane %v9916_v38, 1 }
 0x4e8   :  { %6034 = vmatpush1.bf16.msra.mxu0 %v7818_v52  ;;  %v4217_v52 = vshrl.u32 %v9903_v6, 16  ;;  %v4236_v6 = vshrl.u32 %v9919_v40, 16  ;;  %v4523_v40 = vunpack.c.h.b16 %v9634_v53 }
 0x4e9   :  { %6035 = vmatprep.subr.bf16.mxu0 %v10842_v51 }
 0x4ea   :  { %v4241_v8 = vor.u32 %v4240_v3, %v4236_v6  ;;  %v7823_v3 = vld [vmem:[%s10597_s7 + $0x130] sm:$0xff]   ;;  %v4926_v6 = vpack.c.b16 %v4530_v21, %v4524_v55  ;;  %v10881_v55 = vcombine.low %v9575_v33, %v9598_v47  ;;  %v4259_v47 = vshll.u32 %v9947_v48, 16 }
 0x4eb   :  { %5815 = vmatmul.mubr.bf16.gmra.mrb[76].mxu0 %v9497_v11  ;;  %v10010_v11 = vsel %vm1046_vm2, %v3893_v31, %v9995_v36  ;;  %v7822_v31 = vld [vmem:[%s10597_s7 + $0x128] sm:$0xff]  }
 0x4ec   :  { %5822 = vmatprep.mubr.bf16.mxu0 %v9540_v56  ;;  %6036 = vmatpush1.bf16.msra.mxu0 %v7819_v45  ;;  %v4213_v56 = vshll.u32 %v9907_v28, 16  ;;  %v4529_v34 = vunpack.c.l.b16 %v10010_v11  ;;  %v4542_v45 = vunpack.c.l.b16 %v3912_v63  ;;  %v10905_v28 = vld [vmem:[#allocation34_spill] sm:$0xff] }
 0x4ed   :  { %6037 = vmatprep.subr.bf16.mxu0 %v10842_v51 }
 0x4ee   :  { %v10021_v41 = vrot.slane %v4213_v56, 1  ;;  %v10086_v21 = vpack.c.b16 %v4542_v45, %v4536_v24  ;;  %v4455_v24 = vrot.slane %v9947_v48, 1 }
 0x4f0   :  { %6038 = vmatpush1.bf16.msra.mxu0 %v7820_v14  ;;  %v10037_v14 = vor.u32 %v4217_v52, %v4207_v4  ;;  %v10048_v56 = vor.u32 %v4220_v54, %v10021_v41  ;;  %v4448_v4 = vrot.slane %v9928_v23, 1  ;;  %v4452_v52 = vsel %vm1367_vm4, %v4450_v32, %v4451_v5 }
 0x4f1   :  { %6039 = vmatprep.subr.bf16.mxu0 %v10842_v51  ;;  %v10072_v53 = vcombine.low %v10712_v1, %v4452_v52  ;;  %v4247_v32 = vshrl.u32 %v9928_v23, 16  ;;  %v4255_v1 = vshrl.u32 %v9931_v27, 16  ;;  %v7824_v23 = vld [vmem:[%s10597_s7 + $0x138] sm:$0xff]  }
 0x4f3   :  { %5823 = vmatmul.mubr.bf16.gmra.mrb[80].mxu0 %v9535_v30  ;;  %v4243_v30 = vshll.u32 %v9931_v27, 16  ;;  %10879 = vst [vmem:[#allocation50_spill] sm:$0xff] %v10072_v53  ;;  %v4249_v33 = vor.u32 %v4247_v32, %v4233_v2  ;;  %v4766_v32 = vunpack.c.h.b16 %v4452_v52  ;;  %v4457_v53 = vrot.slane %v9960_v7, 1 }
 0x4f4   :  { %5830 = vmatprep.mubr.bf16.mxu0 %v10877_v58  ;;  %6040 = vmatpush1.bf16.msra.mxu0 %v7821_v16  ;;  %v10052_v16 = vsel %vm1046_vm2, %v4229_v22, %v4233_v2  ;;  %v10078_v22 = vor.u32 %v3907_v18, %v9995_v36  ;;  %v4456_v18 = vsel %vm1367_vm4, %v4451_v5, %v4455_v24 }
 0x4f5   :  { %6041 = vmatprep.subr.bf16.mxu0 %v10842_v51  ;;  %v4245_v63 = vrot.slane %v4243_v30, 1  ;;  %v10075_v30 = vpack.c.b16 %v4529_v34, %v4523_v40  ;;  %v4453_v34 = vrot.slane %v9944_v12, 1  ;;  %v4763_v45 = vunpack.c.h.b16 %v10052_v16 }
 0x4f7   :  { %v10063_v54 = vsel %vm1046_vm2, %v4241_v8, %v4245_v63  ;;  %v4257_v27 = vor.u32 %v4255_v1, %v4245_v63  ;;  %v4271_v1 = vshrl.u32 %v9947_v48, 16  ;;  %v4267_v48 = vshll.u32 %v9960_v7, 16 }
 0x4f8   :  { %6042 = vmatpush1.bf16.msra.mxu0 %v7822_v31  ;;  %v4449_v31 = vsel %vm1367_vm4, %v4447_v35, %v4448_v4  ;;  %v4261_v35 = vrot.slane %v4259_v47, 1  ;;  %v4764_v40 = vunpack.c.h.b16 %v10063_v54  ;;  %v4263_v47 = vshrl.u32 %v9944_v12, 16 }
 0x4f9   :  { %6043 = vmatprep.subr.bf16.mxu0 %v10842_v51  ;;  %v10081_v8 = vcombine.low %v4443_v39, %v4449_v31  ;;  %v4253_v39 = vrot.slane %v4251_v61, 1  ;;  %v4765_v58 = vunpack.c.h.b16 %v4449_v31  ;;  %v7825_v61 = vld [vmem:[%s10597_s7 + $0x140] sm:$0xff]  }
 0x4fa   :  { %v4262_v63 = vsel %vm1046_vm2, %v4257_v27, %v4261_v35 }
 0x4fb   :  { %10880 = vst [vmem:[#allocation51_spill] sm:$0xff] %v10081_v8  ;;  %5831 = vmatmul.mubr.bf16.gmra.mrb[84].mxu0 %v10881_v55  ;;  %v4254_v2 = vsel %vm1046_vm2, %v4249_v33, %v4253_v39  ;;  %v4772_v55 = vunpack.c.l.b16 %v4456_v18  ;;  %v4770_v5 = vunpack.c.l.b16 %v4262_v63  ;;  %v4273_v33 = vor.u32 %v4271_v1, %v4261_v35  ;;  %v7827_v1 = vld [vmem:[%s10597_s7 + $0x150] sm:$0xff]  }
 0x4fc   :  { %5838 = vmatprep.mubr.bf16.mxu0 %v9656_v57  ;;  %6044 = vmatpush1.bf16.msra.mxu0 %v7823_v3  ;;  %v10101_v57 = vsel %vm1367_vm4, %v4448_v4, %v4453_v34  ;;  %v4769_v4 = vunpack.c.l.b16 %v4254_v2  ;;  %v4265_v36 = vor.u32 %v4263_v47, %v4253_v39  ;;  %v4778_v8 = vunpack.c.h.b16 %v4456_v18 }
 0x4fd   :  { %6045 = vmatprep.subr.bf16.mxu0 %v10842_v51  ;;  %v4771_v3 = vunpack.c.l.b16 %v10101_v57  ;;  %v10114_v38 = vpack.c.b16 %v4772_v55, %v4766_v32  ;;  %v4777_v31 = vunpack.c.h.b16 %v10101_v57  ;;  %v10122_v27 = vpack.c.b16 %v4770_v5, %v4764_v40 }
 0x4fe   :  { %v4775_v12 = vunpack.c.h.b16 %v4254_v2  ;;  %v4776_v57 = vunpack.c.h.b16 %v4262_v63  ;;  %v4279_v39 = vshrl.u32 %v9960_v7, 16  ;;  %v4269_v35 = vrot.slane %v4267_v48, 1 }
 0x4ff   :  { %10882 = vst [vmem:[#allocation52_spill] sm:$0xff] %v10114_v38  ;;  %v10116_v52 = vpack.c.b16 %v4771_v3, %v4765_v58  ;;  %v7826_v58 = vld [vmem:[%s10597_s7 + $0x148] sm:$0xff]   ;;  %v4282_v40 = vshrl.u32 %v9962_v49, 16  ;;  %v4458_v18 = vsel %vm1367_vm4, %v4453_v34, %v4457_v53 }
 0x500   :  { %6046 = vmatpush1.bf16.msra.mxu0 %v7824_v23  ;;  %v10119_v23 = vpack.c.b16 %v4769_v4, %v4763_v45  ;;  %v4275_v45 = vshll.u32 %v9962_v49, 16  ;;  %v4783_v32 = vunpack.c.l.b16 %v4458_v18  ;;  %v4281_v63 = vor.u32 %v4279_v39, %v4269_v35 }
 0x501   :  { %6047 = vmatprep.subr.bf16.mxu0 %v10842_v51  ;;  %10883 = vst [vmem:[#allocation53_spill] sm:$0xff] %v10116_v52 }
 0x502   :  { %v4277_v3 = vrot.slane %v4275_v45, 1  ;;  %v4793_v48 = vunpack.c.l.b16 %v4281_v63 }
 0x503   :  { %5839 = vmatmul.mubr.bf16.gmra.mrb[88].mxu0 %v9646_v44  ;;  %v4459_v44 = vrot.slane %v9962_v49, 1 }
 0x504   :  { %5846 = vmatprep.mubr.bf16.mxu0 %v4926_v6  ;;  %6048 = vmatpush1.bf16.msra.mxu0 %v7825_v61  ;;  %v4795_v6 = vunpack.c.l.b16 %v4457_v53  ;;  %v4270_v61 = vsel %vm1046_vm2, %v4265_v36, %v4269_v35  ;;  %v4278_v49 = vsel %vm1046_vm2, %v4273_v33, %v4277_v3  ;;  %v4284_v34 = vor.u32 %v4282_v40, %v4277_v3 }
 0x505   :  { %6049 = vmatprep.subr.bf16.mxu0 %v10842_v51  ;;  %v4460_v2 = vsel %vm1367_vm4, %v4455_v24, %v4459_v44  ;;  %v4796_v55 = vunpack.c.l.b16 %v4459_v44  ;;  %v4781_v47 = vunpack.c.l.b16 %v4270_v61  ;;  %v4787_v53 = vunpack.c.h.b16 %v4270_v61  ;;  %v7829_v61 = vld [vmem:[%s10597_s7 + $0x160] sm:$0xff]  }
 0x506   :  { %v4784_v4 = vunpack.c.l.b16 %v4460_v2  ;;  %v4790_v7 = vunpack.c.h.b16 %v4460_v2  ;;  %v4782_v24 = vunpack.c.l.b16 %v4278_v49  ;;  %v4788_v5 = vunpack.c.h.b16 %v4278_v49 }
 0x507   :  { %v10144_v36 = vpack.c.b16 %v4781_v47, %v4775_v12  ;;  %v4794_v39 = vunpack.c.l.b16 %v4284_v34  ;;  %v3933_v33 = vshll.u32 %v9512_v20, 16  ;;  %v10154_v40 = vpack.c.b16 %v4793_v48, %v4787_v53 }
 0x508   :  { %6050 = vmatpush1.bf16.msra.mxu0 %v7826_v58  ;;  %v10142_v45 = vpack.c.b16 %v4784_v4, %v4778_v8  ;;  %v10146_v58 = vpack.c.b16 %v4783_v32, %v4777_v31  ;;  %v10148_v44 = vpack.c.b16 %v4796_v55, %v4790_v7  ;;  %v10152_v35 = vpack.c.b16 %v4782_v24, %v4776_v57  ;;  %v7828_v8 = vld [vmem:[%s10597_s7 + $0x158] sm:$0xff]  }
 0x509   :  { %6051 = vmatprep.subr.bf16.mxu0 %v10842_v51  ;;  %v4789_v3 = vunpack.c.h.b16 %v4458_v18  ;;  %v10160_v31 = vpack.c.b16 %v4794_v39, %v4788_v5  ;;  %v4535_v12 = vunpack.c.h.b16 %v10010_v11  ;;  %v10887_v2 = vshll.u32 %v9480_v17, 16 }
 0x50a   :  { %10884 = vst [vmem:[#allocation54_spill] sm:$0xff] %v10142_v45  ;;  %10885 = vst [vmem:[#allocation55_spill] sm:$0xff] %v10146_v58  ;;  %v3935_v18 = vrot.slane %v3933_v33, 1  ;;  %v3916_v55 = vshll.u32 %v9476_v13, 16  ;;  %v3949_v4 = vshll.u32 %v9548_v43, 16  ;;  %v3914_v49 = vshrl.u32 %v9476_v13, 16 }
 0x50b   :  { %10886 = vst [vmem:[#allocation56_spill] sm:$0xff] %v10148_v44  ;;  %5847 = vmatmul.mubr.bf16.gmra.mrb[92].mxu0 %v10075_v30  ;;  %v4541_v30 = vunpack.c.l.b16 %v10078_v22  ;;  %v3930_v57 = vrot.slane %v10887_v2, 1  ;;  %v10167_v32 = vpack.c.b16 %v4795_v6, %v4789_v3  ;;  %v3921_v22 = vshll.u32 %v9507_v60, 16 }
 0x50c   :  { %5854 = vmatprep.mubr.bf16.mxu0 %v10086_v21  ;;  %6052 = vmatpush1.bf16.msra.mxu0 %v7827_v1  ;;  %v3926_v21 = vshrl.u32 %v9480_v17, 16  ;;  %v3918_v7 = vrot.slane %v3916_v55, 1  ;;  %v7830_v1 = vld [vmem:[%s10597_s7 + $0x168] sm:$0xff]   ;;  %v3945_v34 = vshrl.u32 %v9512_v20, 16  ;;  %v3951_v53 = vrot.slane %v3949_v4, 1 }
 0x50d   :  { %6053 = vmatprep.subr.bf16.mxu0 %v10842_v51  ;;  %10888 = vst [vmem:[#allocation57_spill] sm:$0xff] %v10167_v32  ;;  %v4931_v11 = vpack.c.b16 %v4541_v30, %v4535_v12  ;;  %v3923_v47 = vrot.slane %v3921_v22, 1  ;;  %v3941_v39 = vshll.u32 %v9544_v15, 16  ;;  %v3965_v3 = vshll.u32 %v9584_v9, 16 }
 0x50e   :  { %v3931_v63 = vor.u32 %v3930_v57, %v3926_v21  ;;  %v3919_v24 = vor.u32 %v3918_v7, %v3914_v49  ;;  %v3947_v5 = vor.u32 %v3945_v34, %v3935_v18  ;;  %v3937_v12 = vshrl.u32 %v9507_v60, 16  ;;  %v10890_v49 = vld [vmem:[#allocation18_spill] sm:$0xff] }
 0x50f   :  { %v3943_v30 = vrot.slane %v3941_v39, 1  ;;  %v3961_v2 = vshrl.u32 %v9548_v43, 16  ;;  %v3967_v57 = vrot.slane %v3965_v3, 1  ;;  %v3995_v21 = vshll.u32 %v9658_v19, 16  ;;  %v10891_v39 = vld [vmem:[#allocation12_spill] sm:$0xff] }
 0x510   :  { %6054 = vmatpush1.bf16.msra.mxu0 %v7828_v8  ;;  %v3936_v6 = vsel %vm1046_vm2, %v3931_v63, %v3935_v18  ;;  %v3924_v48 = vsel %vm1046_vm2, %v3919_v24, %v3923_v47  ;;  %v3952_v33 = vsel %vm1046_vm2, %v3947_v5, %v3951_v53  ;;  %v3990_v8 = vshll.u32 %v9614_v25, 16 }
 0x511   :  { %6055 = vmatprep.subr.bf16.mxu0 %v10842_v51  ;;  %v3939_v18 = vor.u32 %v3937_v12, %v3923_v47  ;;  %v3963_v55 = vor.u32 %v3961_v2, %v3951_v53  ;;  %v3988_v4 = vshrl.u32 %v9614_v25, 16  ;;  %v3997_v7 = vrot.slane %v3995_v21, 1  ;;  %v7831_v47 = vld [vmem:[%s10597_s7 + $0x170] sm:$0xff]  }
 0x512   :  { %v3992_v63 = vrot.slane %v3990_v8, 1  ;;  %v3978_v34 = vshll.u32 %v10890_v49, 16  ;;  %v3953_v53 = vshrl.u32 %v9544_v15, 16  ;;  %v4007_v12 = vshrl.u32 %v9658_v19, 16 }
 0x513   :  { %5855 = vmatmul.mubr.bf16.gmra.mrb[96].mxu0 %v4931_v11  ;;  %v3944_v22 = vsel %vm1046_vm2, %v3939_v18, %v3943_v30 }
 0x514   :  { %5862 = vmatprep.mubr.bf16.mxu0 %v3936_v6  ;;  %6056 = vmatpush1.bf16.msra.mxu0 %v7829_v61  ;;  %v10889_v61 = vld [vmem:[#allocation10_spill] sm:$0xff]  ;;  %v3968_v6 = vsel %vm1046_vm2, %v3963_v55, %v3967_v57  ;;  %v3993_v5 = vor.u32 %v3992_v63, %v3988_v4  ;;  %v3955_v3 = vor.u32 %v3953_v53, %v3943_v30  ;;  %v3980_v18 = vrot.slane %v3978_v34, 1 }
 0x515   :  { %6057 = vmatprep.subr.bf16.mxu0 %v10842_v51  ;;  %v3957_v11 = vshll.u32 %v10889_v61, 16  ;;  %v3976_v63 = vshrl.u32 %v10890_v49, 16  ;;  %v4003_v4 = vshll.u32 %v9671_v37, 16 }
 0x516   :  { %v3998_v8 = vsel %vm1046_vm2, %v3993_v5, %v3997_v7 }
 0x517   :  { %v3959_v24 = vrot.slane %v3957_v11, 1  ;;  %v4005_v5 = vrot.slane %v4003_v4, 1 }
 0x518   :  { %6058 = vmatpush1.bf16.msra.mxu0 %v7830_v1  ;;  %v4011_v1 = vshll.u32 %v9674_v0, 16 }
 0x519   :  { %6059 = vmatprep.subr.bf16.mxu0 %v10842_v51  ;;  %v3960_v55 = vsel %vm1046_vm2, %v3955_v3, %v3959_v24 }
 0x51a   :  { %v4013_v2 = vrot.slane %v4011_v1, 1  ;;  %v3981_v1 = vor.u32 %v3980_v18, %v3976_v63  ;;  %v10893_v18 = vld [vmem:[#allocation14_spill] sm:$0xff] }
 0x51b   :  { %5863 = vmatmul.mubr.bf16.gmra.mrb[100].mxu0 %v3924_v48  ;;  %v3972_v48 = vshrl.u32 %v9584_v9, 16  ;;  %v4019_v63 = vshll.u32 %v10893_v18, 16  ;;  %v4031_v58 = vshrl.u32 %v10893_v18, 16 }
 0x51c   :  { %5870 = vmatprep.mubr.bf16.mxu0 %v3952_v33  ;;  %v3983_v33 = vshll.u32 %v10891_v39, 16  ;;  %6060 = vmatpush1.bf16.msra.mxu0 %v7831_v47  ;;  %v10892_v47 = vld [vmem:[#allocation23_spill] sm:$0xff] }
 0x51d   :  { %6061 = vmatprep.subr.bf16.mxu0 %v10842_v51  ;;  %v3974_v21 = vor.u32 %v3972_v48, %v3967_v57  ;;  %v4027_v53 = vshll.u32 %v10892_v47, 16  ;;  %v3969_v51 = vshrl.u32 %v10889_v61, 16 }
 0x51f   :  { %v6947_v11 = vcombine.low %v3974_v21, %v3998_v8  ;;  %v3971_v48 = vor.u32 %v3969_v51, %v3959_v24  ;;  %v4029_v3 = vrot.slane %v4027_v53, 1  ;;  %v7832_v24 = vld [vmem:[%s10597_s7 + $0x178] sm:$0xff]  }
 0x520   :  { %6062 = vmatpush1.bf16.msra.mxu0 %v7832_v24 }
 0x523   :  { %5871 = vmatmul.mubr.bf16.gmra.mrb[104].mxu0 %v3944_v22  ;;  %v4009_v22 = vor.u32 %v4007_v12, %v3997_v7  ;;  %v3999_v7 = vshrl.u32 %v10891_v39, 16  ;;  %v4596_v12 = vunpack.c.h.b16 %v3998_v8  ;;  %v4015_v8 = vshrl.u32 %v9671_v37, 16 }
 0x524   :  { %5878 = vmatprep.mubr.bf16.mxu0 %v3968_v6  ;;  %v3985_v6 = vrot.slane %v3983_v33, 1  ;;  %v4023_v33 = vshrl.u32 %v9674_v0, 16 }
 0x525   :  { %v4014_v30 = vsel %vm1046_vm2, %v4009_v22, %v4013_v2 }
 0x526   :  { %v3986_v57 = vsel %vm1046_vm2, %v3981_v1, %v3985_v6  ;;  %v4602_v34 = vunpack.c.l.b16 %v4014_v30  ;;  %v4001_v21 = vor.u32 %v3999_v7, %v3985_v6  ;;  %v4025_v22 = vor.u32 %v4023_v33, %v4013_v2 }
 0x527   :  { %v4021_v6 = vrot.slane %v4019_v63, 1  ;;  %v4595_v2 = vunpack.c.h.b16 %v3986_v57  ;;  %v4608_v53 = vunpack.c.h.b16 %v4014_v30  ;;  %v4034_v7 = vshrl.u32 %v10892_v47, 16 }
 0x528   :  { %v4962_v32 = vpack.c.b16 %v4602_v34, %v4596_v12  ;;  %v4030_v1 = vsel %vm1046_vm2, %v4025_v22, %v4029_v3  ;;  %v4017_v34 = vor.u32 %v4015_v8, %v4005_v5  ;;  %v10895_v8 = vld [vmem:[#allocation25_spill] sm:$0xff] }
 0x529   :  { %v4614_v51 = vunpack.c.l.b16 %v4030_v1  ;;  %v4033_v24 = vor.u32 %v4031_v58, %v4021_v6 }
 0x52a   :  { %v4022_v12 = vsel %vm1046_vm2, %v4017_v34, %v4021_v6  ;;  %v10898_v6 = vld [vmem:[#allocation30_spill] sm:$0xff] }
 0x52b   :  { %5879 = vmatmul.mubr.bf16.gmra.mrb[108].mxu0 %v3960_v55  ;;  %v6946_v55 = vcombine.low %v3971_v48, %v3986_v57  ;;  %v4968_v33 = vpack.c.b16 %v4614_v51, %v4608_v53  ;;  %v10894_v57 = vld [vmem:[#allocation22_spill] sm:$0xff]  ;;  %v4619_v51 = vunpack.c.h.b16 %v4022_v12 }
 0x52c   :  { %5886 = vmatprep.mubr.bf16.mxu0 %v6947_v11  ;;  %v4006_v11 = vsel %vm1046_vm2, %v4001_v21, %v4005_v5  ;;  %v4613_v21 = vunpack.c.l.b16 %v4022_v12  ;;  %v4052_v30 = vshll.u32 %v10894_v57, 16  ;;  %v4050_v53 = vshrl.u32 %v10894_v57, 16 }
 0x52d   :  { %v4601_v4 = vunpack.c.l.b16 %v4006_v11  ;;  %v4607_v44 = vunpack.c.h.b16 %v4006_v11 }
 0x52f   :  { %v4961_v48 = vpack.c.b16 %v4601_v4, %v4595_v2  ;;  %v4967_v63 = vpack.c.b16 %v4613_v21, %v4607_v44  ;;  %v4057_v4 = vshll.u32 %v10895_v8, 16  ;;  %v4625_v2 = vunpack.c.l.b16 %v4033_v24 }
 0x531   :  { %v4059_v34 = vrot.slane %v4057_v4, 1  ;;  %v4973_v11 = vpack.c.b16 %v4625_v2, %v4619_v51  ;;  %v10899_v4 = vld [vmem:[#allocation29_spill] sm:$0xff] }
 0x532   :  { %v4065_v51 = vshll.u32 %v10899_v4, 16  ;;  %v4077_v42 = vshrl.u32 %v10899_v4, 16  ;;  %v4100_v4 = vshrl.u32 %v10905_v28, 16 }
 0x533   :  { %5887 = vmatmul.mubr.bf16.gmra.mrb[112].mxu0 %v6946_v55  ;;  %v4620_v55 = vunpack.c.h.b16 %v4030_v1  ;;  %v10896_v1 = vld [vmem:[#allocation16_spill] sm:$0xff] }
 0x534   :  { %5894 = vmatprep.mubr.bf16.mxu0 %v4962_v32  ;;  %v4036_v32 = vor.u32 %v4034_v7, %v4029_v3  ;;  %v4054_v3 = vrot.slane %v4052_v30, 1  ;;  %v4040_v7 = vshll.u32 %v10896_v1, 16  ;;  %v4038_v12 = vshrl.u32 %v10896_v1, 16 }
 0x536   :  { %v4626_v22 = vunpack.c.l.b16 %v4036_v32  ;;  %v4073_v32 = vshll.u32 %v10898_v6, 16  ;;  %v4042_v21 = vrot.slane %v4040_v7, 1 }
 0x538   :  { %v4974_v5 = vpack.c.b16 %v4626_v22, %v4620_v55  ;;  %v4069_v22 = vshrl.u32 %v10895_v8, 16  ;;  %v4043_v24 = vor.u32 %v4042_v21, %v4038_v12  ;;  %v10902_v21 = vld [vmem:[#allocation37_spill] sm:$0xff] }
 0x53a   :  { %v4071_v30 = vor.u32 %v4069_v22, %v4059_v34 }
 0x53b   :  { %5895 = vmatmul.mubr.bf16.gmra.mrb[116].mxu0 %v4961_v48  ;;  %v4055_v48 = vor.u32 %v4054_v3, %v4050_v53  ;;  %v10900_v3 = vld [vmem:[#allocation33_spill] sm:$0xff] }
 0x53c   :  { %5902 = vmatprep.mubr.bf16.mxu0 %v4968_v33  ;;  %v10897_v33 = vld [vmem:[#allocation17_spill] sm:$0xff]  ;;  %v4089_v53 = vshll.u32 %v10900_v3, 16 }
 0x53d   :  { %v4045_v44 = vshll.u32 %v10897_v33, 16  ;;  %v4060_v58 = vsel %vm1046_vm2, %v4055_v48, %v4059_v34  ;;  %v4061_v48 = vshrl.u32 %v10897_v33, 16  ;;  %v4119_v34 = vshll.u32 %v10902_v21, 16 }
 0x53f   :  { %v4047_v55 = vrot.slane %v4045_v44, 1  ;;  %v4067_v44 = vrot.slane %v4065_v51, 1  ;;  %v4121_v38 = vrot.slane %v4119_v34, 1  ;;  %v4135_v51 = vshll.u32 %v10904_v59, 16 }
 0x541   :  { %v4063_v12 = vor.u32 %v4061_v48, %v4047_v55  ;;  %v4096_v48 = vshrl.u32 %v10900_v3, 16 }
 0x543   :  { %5903 = vmatmul.mubr.bf16.gmra.mrb[120].mxu0 %v4967_v63  ;;  %v4075_v63 = vrot.slane %v4073_v32, 1  ;;  %v4091_v32 = vrot.slane %v4089_v53, 1  ;;  %v4102_v53 = vshll.u32 %v10905_v28, 16 }
 0x544   :  { %5910 = vmatprep.mubr.bf16.mxu0 %v4974_v5  ;;  %v4048_v5 = vsel %vm1046_vm2, %v4043_v24, %v4047_v55  ;;  %v10903_v24 = vld [vmem:[#allocation32_spill] sm:$0xff] }
 0x545   :  { %v4076_v2 = vsel %vm1046_vm2, %v4071_v30, %v4075_v63  ;;  %v4081_v45 = vshll.u32 %v10903_v24, 16  ;;  %v4068_v30 = vsel %vm1046_vm2, %v4063_v12, %v4067_v44  ;;  %v4079_v12 = vor.u32 %v4077_v42, %v4067_v44  ;;  %v10908_v42 = vld [vmem:[#allocation41_spill] sm:$0xff] }
 0x546   :  { %v4098_v34 = vor.u32 %v4096_v48, %v4091_v32  ;;  %v4104_v1 = vrot.slane %v4102_v53, 1  ;;  %v4151_v44 = vshll.u32 %v10908_v42, 16 }
 0x547   :  { %v4083_v55 = vrot.slane %v4081_v45, 1 }
 0x54b   :  { %5911 = vmatmul.mubr.bf16.gmra.mrb[124].mxu0 %v4973_v11  ;;  %v10901_v11 = vld [vmem:[#allocation35_spill] sm:$0xff] }
 0x54c   :  { %5918 = vmatprep.mubr.bf16.mxu0 %v4060_v58  ;;  %v4114_v7 = vshll.u32 %v10901_v11, 16  ;;  %v4085_v58 = vshrl.u32 %v10898_v6, 16  ;;  %v4112_v52 = vshrl.u32 %v10901_v11, 16  ;;  %v4137_v11 = vrot.slane %v4135_v51, 1 }
 0x54d   :  { %v4093_v51 = vshrl.u32 %v10903_v24, 16 }
 0x54e   :  { %v4087_v22 = vor.u32 %v4085_v58, %v4075_v63 }
 0x553   :  { %5919 = vmatmul.mubr.bf16.gmra.mrb[128].mxu0 %v4048_v5  ;;  %v4116_v5 = vrot.slane %v4114_v7, 1  ;;  %v10906_v7 = vld [vmem:[#allocation36_spill] sm:$0xff] }
 0x554   :  { %5926 = vmatprep.mubr.bf16.mxu0 %v4076_v2  ;;  %v4092_v2 = vsel %vm1046_vm2, %v4087_v22, %v4091_v32  ;;  %v4107_v58 = vshll.u32 %v10906_v7, 16  ;;  %v4131_v22 = vshrl.u32 %v10902_v21, 16 }
 0x555   :  { %v4117_v63 = vor.u32 %v4116_v5, %v4112_v52  ;;  %v10907_v52 = vld [vmem:[#allocation38_spill] sm:$0xff] }
 0x556   :  { %v4133_v6 = vor.u32 %v4131_v22, %v4121_v38  ;;  %v4109_v45 = vrot.slane %v4107_v58, 1  ;;  %v4127_v5 = vshll.u32 %v10907_v52, 16  ;;  %v4147_v58 = vshrl.u32 %v10904_v59, 16 }
 0x557   :  { %v4153_v22 = vrot.slane %v4151_v44, 1 }
 0x558   :  { %v4138_v3 = vsel %vm1046_vm2, %v4133_v6, %v4137_v11  ;;  %v4129_v48 = vrot.slane %v4127_v5, 1  ;;  %v4149_v6 = vor.u32 %v4147_v58, %v4137_v11 }
 0x559   :  { %v4686_v53 = vunpack.c.l.b16 %v4138_v3  ;;  %v4692_v44 = vunpack.c.h.b16 %v4138_v3 }
 0x55b   :  { %5927 = vmatmul.mubr.bf16.gmra.mrb[132].mxu0 %v4068_v30  ;;  %v4122_v30 = vsel %vm1046_vm2, %v4117_v63, %v4121_v38  ;;  %v4105_v63 = vor.u32 %v4104_v1, %v4100_v4  ;;  %v4123_v38 = vshrl.u32 %v10906_v7, 16  ;;  %v10909_v1 = vld [vmem:[#allocation40_spill] sm:$0xff] }
 0x55c   :  { %5934 = vmatprep.mubr.bf16.mxu0 %v4092_v2  ;;  %v4084_v2 = vsel %vm1046_vm2, %v4079_v12, %v4083_v55  ;;  %v6953_v33 = vcombine.low %v4098_v34, %v4122_v30  ;;  %v4095_v12 = vor.u32 %v4093_v51, %v4083_v55  ;;  %v4680_v34 = vunpack.c.h.b16 %v4122_v30 }
 0x55d   :  { %v4110_v32 = vsel %vm1046_vm2, %v4105_v63, %v4109_v45  ;;  %v4143_v4 = vshll.u32 %v10909_v1, 16  ;;  %v4154_v63 = vsel %vm1046_vm2, %v4149_v6, %v4153_v22  ;;  %v4139_v55 = vshrl.u32 %v10907_v52, 16 }
 0x55e   :  { %v6952_v28 = vcombine.low %v4095_v12, %v4110_v32  ;;  %v5004_v21 = vpack.c.b16 %v4686_v53, %v4680_v34  ;;  %v4698_v7 = vunpack.c.l.b16 %v4154_v63  ;;  %v4679_v51 = vunpack.c.h.b16 %v4110_v32  ;;  %v10910_v32 = vld [vmem:[#allocation43_spill] sm:$0xff] }
 0x55f   :  { %v4145_v5 = vrot.slane %v4143_v4, 1  ;;  %v4141_v30 = vor.u32 %v4139_v55, %v4129_v48  ;;  %v4704_v58 = vunpack.c.h.b16 %v4154_v63  ;;  %v4176_v3 = vshll.u32 %v10910_v32, 16  ;;  %v10911_v55 = vld [vmem:[#allocation45_spill] sm:$0xff]  ;;  %v10912_v63 = vld [vmem:[#allocation42_spill] sm:$0xff] }
 0x560   :  { %v5010_v53 = vpack.c.b16 %v4698_v7, %v4692_v44  ;;  %v4174_v44 = vshrl.u32 %v10910_v32, 16 }
 0x563   :  { %5935 = vmatmul.mubr.bf16.gmra.mrb[136].mxu0 %v4084_v2  ;;  %v4125_v2 = vor.u32 %v4123_v38, %v4109_v45  ;;  %v4158_v45 = vshrl.u32 %v10908_v42, 16  ;;  %v4146_v38 = vsel %vm1046_vm2, %v4141_v30, %v4145_v5 }
 0x564   :  { %5942 = vmatprep.mubr.bf16.mxu0 %v6953_v33  ;;  %v4703_v7 = vunpack.c.h.b16 %v4146_v38 }
 0x565   :  { %v4130_v33 = vsel %vm1046_vm2, %v4125_v2, %v4129_v48  ;;  %v4160_v12 = vor.u32 %v4158_v45, %v4153_v22  ;;  %v4155_v2 = vshrl.u32 %v10909_v1, 16  ;;  %v4178_v22 = vrot.slane %v4176_v3, 1 }
 0x566   :  { %v4685_v24 = vunpack.c.l.b16 %v4130_v33  ;;  %v4691_v34 = vunpack.c.h.b16 %v4130_v33  ;;  %v4164_v45 = vshll.u32 %v10912_v63, 16 }
 0x567   :  { %v4157_v4 = vor.u32 %v4155_v2, %v4145_v5  ;;  %v4193_v2 = vshrl.u32 %v10911_v55, 16 }
 0x568   :  { %v5003_v11 = vpack.c.b16 %v4685_v24, %v4679_v51  ;;  %v4181_v24 = vshll.u32 %v10911_v55, 16 }
 0x569   :  { %v4709_v51 = vunpack.c.l.b16 %v4157_v4 }
 0x56a   :  { %v4183_v30 = vrot.slane %v4181_v24, 1 }
 0x56b   :  { %5943 = vmatmul.mubr.bf16.gmra.mrb[140].mxu0 %v6952_v28  ;;  %v4697_v28 = vunpack.c.l.b16 %v4146_v38  ;;  %v5015_v33 = vpack.c.b16 %v4709_v51, %v4703_v7  ;;  %v4162_v38 = vshrl.u32 %v10912_v63, 16 }
 0x56c   :  { %5950 = vmatprep.mubr.bf16.mxu0 %v5004_v21  ;;  %v4710_v21 = vunpack.c.l.b16 %v4160_v12  ;;  %v4195_v3 = vor.u32 %v4193_v2, %v4183_v30  ;;  %v10929_v2 = vld [vmem:[#allocation31_spill] sm:$0xff] }
 0x56d   :  { %v5009_v6 = vpack.c.b16 %v4697_v28, %v4691_v34  ;;  %v10914_v28 = vld [vmem:[#allocation47_spill] sm:$0xff] }
 0x56e   :  { %v5016_v48 = vpack.c.b16 %v4710_v21, %v4704_v58  ;;  %v4197_v58 = vshll.u32 %v10914_v28, 16  ;;  %v4166_v21 = vrot.slane %v4164_v45, 1  ;;  %v4209_v51 = vshrl.u32 %v10914_v28, 16 }
 0x570   :  { %v4167_v4 = vor.u32 %v4166_v21, %v4162_v38  ;;  %v10928_v38 = vrot.slane %v9422_v26, 1  ;;  %v4380_v26 = vrot.slane %v9480_v17, 1  ;;  %v4389_v17 = vrot.slane %v9584_v9, 1 }
 0x571   :  { %v4392_v9 = vrot.slane %v10891_v39, 1 }
 0x573   :  { %5951 = vmatmul.mubr.bf16.gmra.mrb[144].mxu0 %v5003_v11  ;;  %v4179_v11 = vor.u32 %v4178_v22, %v4174_v44 }
 0x574   :  { %5958 = vmatprep.mubr.bf16.mxu0 %v5010_v53  ;;  %v10913_v53 = vld [vmem:[#allocation44_spill] sm:$0xff] }
 0x575   :  { %v4169_v12 = vshll.u32 %v10913_v53, 16  ;;  %v4184_v5 = vsel %vm1046_vm2, %v4179_v11, %v4183_v30  ;;  %v4185_v7 = vshrl.u32 %v10913_v53, 16  ;;  %v10915_v30 = vcombine.low %v10048_v56, %v10063_v54  ;;  %v10921_v56 = vld [vmem:[#allocation11_spill] sm:$0xff]  ;;  %v10923_v54 = vld [vmem:[#allocation13_spill] sm:$0xff] }
 0x576   :  { %v10916_v11 = vcombine.low %v10037_v14, %v10052_v16  ;;  %v10920_v14 = vld [vmem:[#allocation19_spill] sm:$0xff]  ;;  %v10922_v16 = vld [vmem:[#allocation21_spill] sm:$0xff] }
 0x577   :  { %v4171_v34 = vrot.slane %v4169_v12, 1  ;;  %v4373_v12 = vrot.slane %v9444_v50, 1 }
 0x579   :  { %v4187_v22 = vor.u32 %v4185_v7, %v4171_v34  ;;  %v4543_v7 = vunpack.c.l.b16 %v4373_v12 }
 0x57b   :  { %5959 = vmatmul.mubr.bf16.gmra.mrb[148].mxu0 %v5009_v6  ;;  %v4199_v6 = vrot.slane %v4197_v58, 1  ;;  %v4192_v45 = vsel %vm1046_vm2, %v4187_v22, %v9973_v29  ;;  %v10917_v29 = vld [vmem:[#allocation15_spill] sm:$0xff] }
 0x57c   :  { %5966 = vmatprep.mubr.bf16.mxu0 %v5016_v48  ;;  %v4172_v48 = vsel %vm1046_vm2, %v4167_v4, %v4171_v34  ;;  %v4374_v34 = vsel %vm1367_vm4, %v10928_v38, %v4373_v12  ;;  %v10930_v4 = vld [vmem:[#allocation28_spill] sm:$0xff] }
 0x57d   :  { %v4200_v24 = vsel %vm1046_vm2, %v4195_v3, %v4199_v6  ;;  %v4211_v44 = vor.u32 %v4209_v51, %v4199_v6  ;;  %v4525_v3 = vunpack.c.h.b16 %v10930_v4  ;;  %v4537_v50 = vunpack.c.h.b16 %v4374_v34 }
 0x57e   :  { %v4381_v51 = vrot.slane %v9512_v20, 1  ;;  %v4383_v20 = vrot.slane %v9544_v15, 1 }
 0x57f   :  { %v4933_v22 = vpack.c.b16 %v4543_v7, %v4537_v50  ;;  %v10931_v7 = vld [vmem:[#allocation17_spill] sm:$0xff] }
 0x583   :  { %5967 = vmatmul.mubr.bf16.gmra.mrb[152].mxu0 %v5015_v33  ;;  %v4216_v33 = vsel %vm1046_vm2, %v4211_v44, %v10021_v41  ;;  %v10919_v41 = vld [vmem:[#allocation9_spill] sm:$0xff]  ;;  %v4382_v44 = vsel %vm1367_vm4, %v4380_v26, %v4381_v51 }
 0x584   :  { %5974 = vmatprep.mubr.bf16.mxu0 %v4184_v5  ;;  %v10927_v5 = vld [vmem:[#allocation26_spill] sm:$0xff] }
 0x585   :  { %v4526_v58 = vunpack.c.h.b16 %v10927_v5 }
 0x58b   :  { %5975 = vmatmul.mubr.bf16.gmra.mrb[156].mxu0 %v4172_v48 }
 0x58c   :  { %5982 = vmatprep.mubr.bf16.mxu0 %v4200_v24 }
 0x593   :  { %5983 = vmatmul.mubr.bf16.gmra.mrb[160].mxu0 %v4192_v45  ;;  %v4378_v45 = vrot.slane %v9507_v60, 1  ;;  %v4395_v60 = vrot.slane %v9658_v19, 1  ;;  %v4391_v19 = vrot.slane %v10890_v49, 1  ;;  %v4401_v49 = vrot.slane %v10893_v18, 1 }
 0x594   :  { %5990 = vmatprep.mubr.bf16.mxu0 %v4216_v33  ;;  %v4385_v33 = vrot.slane %v9548_v43, 1  ;;  %v4387_v43 = vrot.slane %v10889_v61, 1  ;;  %v4397_v61 = vrot.slane %v9671_v37, 1  ;;  %v4409_v18 = vrot.slane %v10895_v8, 1  ;;  %v10934_v8 = vld [vmem:[#allocation29_spill] sm:$0xff] }
 0x596   :  { %v4388_v15 = vsel %vm1367_vm4, %v4383_v20, %v4387_v43  ;;  %v4402_v37 = vsel %vm1367_vm4, %v4397_v61, %v4401_v49 }
 0x597   :  { %v4621_v4 = vunpack.c.h.b16 %v4402_v37 }
 0x59b   :  { %5991 = vmatmul.mubr.bf16.gmra.mrb[164].mxu0 %v9987_v10  ;;  %v10918_v10 = vld [vmem:[#allocation20_spill] sm:$0xff] }
 0x59c   :  { %5998 = vmatprep.mubr.bf16.mxu0 %v10915_v30  ;;  %v4377_v30 = vrot.slane %v9476_v13, 1  ;;  %v4394_v13 = vrot.slane %v9614_v25, 1 }
 0x5a3   :  { %5999 = vmatmul.mubr.bf16.gmra.mrb[168].mxu0 %v10916_v11  ;;  %v4379_v11 = vsel %vm1367_vm4, %v4377_v30, %v4378_v45 }
 0x5a4   :  { %6006 = vmatprep.mubr.bf16.mxu0 %v10122_v27  ;;  %v10924_v27 = vld [vmem:[#allocation24_spill] sm:$0xff] }
 0x5ab   :  { %6007 = vmatmul.mubr.bf16.gmra.mrb[172].mxu0 %v10119_v23  ;;  %v4375_v23 = vrot.slane %v9448_v46, 1  ;;  %v4531_v46 = vunpack.c.l.b16 %v4374_v34 }
 0x5ac   :  { %6014 = vmatprep.mubr.bf16.mxu0 %v10152_v35 }
 0x5ad   :  { %v4927_v48 = vpack.c.b16 %v4531_v46, %v4525_v3  ;;  %v4627_v3 = vunpack.c.l.b16 %v4401_v49 }
 0x5b3   :  { %6015 = vmatmul.mubr.bf16.gmra.mrb[176].mxu0 %v10144_v36  ;;  %v10925_v36 = vrot.slane %v9425_v62, 1  ;;  %v4544_v62 = vunpack.c.l.b16 %v4375_v23 }
 0x5b4   :  { %6022 = vmatprep.mubr.bf16.mxu0 %v10160_v31 }
 0x5b5   :  { %v4376_v35 = vsel %vm1367_vm4, %v10925_v36, %v4375_v23  ;;  %v4393_v23 = vsel %vm1367_vm4, %v4391_v19, %v4392_v9 }
 0x5b6   :  { %v4532_v31 = vunpack.c.l.b16 %v4376_v35  ;;  %v4538_v6 = vunpack.c.h.b16 %v4376_v35  ;;  %v4597_v5 = vunpack.c.h.b16 %v4393_v23 }
 0x5b8   :  { %v4928_v21 = vpack.c.b16 %v4532_v31, %v4526_v58  ;;  %v4934_v24 = vpack.c.b16 %v4544_v62, %v4538_v6 }
 0x5bb   :  { %6023 = vmatmul.mubr.bf16.gmra.mrb[180].mxu0 %v10154_v40  ;;  %v10926_v40 = vld [vmem:[#allocation27_spill] sm:$0xff] }
 0x5bc   :  { %6063 = vmatprep.mubr.bf16.mxu0 %v10917_v29  ;;  %v4386_v29 = vsel %vm1367_vm4, %v4381_v51, %v4385_v33  ;;  %v4406_v51 = vrot.slane %v10931_v7, 1 }
 0x5c3   :  { %6064 = vmatmul.mubr.bf16.vlgmr.msra.gmra.mrb[72].mxu0 %v10918_v10  ;;  %v4384_v10 = vsel %vm1367_vm4, %v4378_v45, %v4383_v20 }
 0x5c4   :  { %6071 = vmatprep.mubr.bf16.mxu0 %v10919_v41  ;;  %v4390_v41 = vsel %vm1367_vm4, %v4385_v33, %v4389_v17 }
 0x5cb   :  { %6072 = vmatmul.mubr.bf16.gmra.mrb[76].mxu0 %v10920_v14  ;;  %v4396_v14 = vsel %vm1367_vm4, %v4394_v13, %v4395_v60 }
 0x5cc   :  { %6079 = vmatprep.mubr.bf16.mxu0 %v10921_v56  ;;  %v4399_v56 = vrot.slane %v9674_v0, 1  ;;  %v4598_v36 = vunpack.c.h.b16 %v4396_v14  ;;  %v6948_v0 = vcombine.low %v4387_v43, %v4393_v23  ;;  %v10938_v43 = vld [vmem:[#allocation32_spill] sm:$0xff] }
 0x5d3   :  { %6080 = vmatmul.mubr.bf16.gmra.mrb[80].mxu0 %v10922_v16  ;;  %v6949_v16 = vcombine.low %v4389_v17, %v4396_v14  ;;  %v4415_v14 = vrot.slane %v10938_v43, 1 }
 0x5d4   :  { %6087 = vmatprep.mubr.bf16.mxu0 %v10923_v54  ;;  %v4400_v54 = vsel %vm1367_vm4, %v4395_v60, %v4399_v56  ;;  %v10937_v60 = vld [vmem:[#allocation35_spill] sm:$0xff] }
 0x5d5   :  { %v4604_v25 = vunpack.c.l.b16 %v4400_v54  ;;  %v4610_v58 = vunpack.c.h.b16 %v4400_v54  ;;  %v4422_v13 = vrot.slane %v10937_v60, 1  ;;  %v10939_v54 = vld [vmem:[#allocation36_spill] sm:$0xff] }
 0x5d6   :  { %v4420_v19 = vrot.slane %v10939_v54, 1  ;;  %v10952_v60 = vld [vmem:[#allocation56_spill] sm:$0xff] }
 0x5d7   :  { %v4964_v35 = vpack.c.b16 %v4604_v25, %v4598_v36  ;;  %v10940_v25 = vld [vmem:[#allocation34_spill] sm:$0xff] }
 0x5db   :  { %6088 = vmatmul.mubr.bf16.gmra.mrb[84].mxu0 %v10924_v27  ;;  %v4403_v27 = vrot.slane %v10892_v47, 1  ;;  %v4615_v47 = vunpack.c.l.b16 %v4402_v37 }
 0x5dc   :  { %6095 = vmatprep.mubr.bf16.mxu0 %v10926_v40  ;;  %v4398_v40 = vsel %vm1367_vm4, %v4392_v9, %v4397_v61  ;;  %v4419_v61 = vrot.slane %v10940_v25, 1  ;;  %v10953_v25 = vld [vmem:[#allocation57_spill] sm:$0xff] }
 0x5dd   :  { %v4404_v39 = vsel %vm1367_vm4, %v4399_v56, %v4403_v27  ;;  %v4603_v31 = vunpack.c.l.b16 %v4398_v40  ;;  %v4609_v46 = vunpack.c.h.b16 %v4398_v40 }
 0x5de   :  { %v4616_v12 = vunpack.c.l.b16 %v4404_v39  ;;  %v4622_v34 = vunpack.c.h.b16 %v4404_v39 }
 0x5df   :  { %v4969_v6 = vpack.c.b16 %v4615_v47, %v4609_v46 }
 0x5e0   :  { %v4970_v38 = vpack.c.b16 %v4616_v12, %v4610_v58  ;;  %v4429_v58 = vrot.slane %v10909_v1, 1  ;;  %v4437_v1 = vrot.slane %v10911_v55, 1  ;;  %v4433_v55 = vrot.slane %v10912_v63, 1  ;;  %v7835_v63 = vld [vmem:[%s10600_s10 + $0x10] sm:$0xff]  }
 0x5e3   :  { %6096 = vmatmul.mubr.bf16.gmra.mrb[88].mxu0 %v10929_v2  ;;  %v4628_v2 = vunpack.c.l.b16 %v4403_v27  ;;  %v4421_v27 = vsel %vm1367_vm4, %v4419_v61, %v4420_v19  ;;  %v7836_v61 = vld [vmem:[%s10600_s10 + $0x18] sm:$0xff]  }
 0x5e4   :  { %6103 = vmatprep.mubr.bf16.mxu0 %v4928_v21  ;;  %v4963_v21 = vpack.c.b16 %v4603_v31, %v4597_v5  ;;  %v6954_v39 = vcombine.low %v4415_v14, %v4421_v27  ;;  %v7895_v31 = vmov 0.0  }
 0x5e5   :  { %v4976_v62 = vpack.c.b16 %v4628_v2, %v4622_v34  ;;  %7157 = vmatprep.subr.bf16.mxu0 %v7895_v31 }
 0x5eb   :  { %6104 = vmatmul.mubr.bf16.gmra.mrb[92].mxu0 %v4927_v48  ;;  %v4975_v48 = vpack.c.b16 %v4627_v3, %v4621_v4 }
 0x5ec   :  { %6111 = vmatprep.mubr.bf16.mxu0 %v4934_v24  ;;  %v4408_v24 = vrot.slane %v10894_v57, 1 }
 0x5ee   :  { %v4410_v50 = vsel %vm1367_vm4, %v4408_v24, %v4409_v18 }
 0x5f3   :  { %6112 = vmatmul.mubr.bf16.gmra.mrb[96].mxu0 %v4933_v22  ;;  %v10932_v22 = vld [vmem:[#allocation30_spill] sm:$0xff] }
 0x5f4   :  { %6119 = vmatprep.mubr.bf16.mxu0 %v4382_v44  ;;  %v4413_v26 = vrot.slane %v10932_v22, 1  ;;  %v10933_v44 = vld [vmem:[#allocation16_spill] sm:$0xff]  ;;  %v4434_v22 = vrot.slane %v10913_v53, 1 }
 0x5f5   :  { %v4405_v45 = vrot.slane %v10933_v44, 1 }
 0x5f6   :  { %v4414_v30 = vsel %vm1367_vm4, %v4409_v18, %v4413_v26  ;;  %v4435_v44 = vsel %vm1367_vm4, %v4433_v55, %v4434_v22 }
 0x5f7   :  { %v4407_v33 = vsel %vm1367_vm4, %v4405_v45, %v4406_v51  ;;  %v10941_v45 = vld [vmem:[#allocation46_spill] sm:$0xff] }
 0x5fb   :  { %6120 = vmatmul.mubr.bf16.gmra.mrb[100].mxu0 %v4379_v11  ;;  %v4411_v11 = vrot.slane %v10934_v8, 1  ;;  %v10943_v8 = vld [vmem:[#allocation48_spill] sm:$0xff] }
 0x5fc   :  { %6127 = vmatprep.mubr.bf16.mxu0 %v4386_v29  ;;  %v10935_v29 = vld [vmem:[#allocation33_spill] sm:$0xff]  ;;  %v10944_v53 = vrot.slane %v10943_v8, 1 }
 0x5fd   :  { %v4417_v57 = vrot.slane %v10935_v29, 1  ;;  %v4412_v20 = vsel %vm1367_vm4, %v4406_v51, %v4411_v11  ;;  %v7834_v51 = vld [vmem:[%s10600_s10 + $0x8] sm:$0xff]   ;;  %v10946_v29 = vld [vmem:[#allocation50_spill] sm:$0xff] }
 0x5ff   :  { %v4418_v17 = vsel %vm1367_vm4, %v4413_v26, %v4417_v57  ;;  %v4441_v26 = vrot.slane %v10914_v28, 1  ;;  %v10945_v28 = vld [vmem:[#allocation49_spill] sm:$0xff] }
 0x603   :  { %6128 = vmatmul.mubr.bf16.gmra.mrb[104].mxu0 %v4384_v10  ;;  %v10936_v10 = vld [vmem:[#allocation37_spill] sm:$0xff] }
 0x604   :  { %6135 = vmatprep.mubr.bf16.mxu0 %v4390_v41  ;;  %v4423_v41 = vrot.slane %v10936_v10, 1  ;;  %v10950_v10 = vld [vmem:[#allocation54_spill] sm:$0xff] }
 0x606   :  { %v4424_v56 = vsel %vm1367_vm4, %v4422_v13, %v4423_v41  ;;  %v10415_v13 = vld [vmem:[%s10598_s8] ss:$0 sm:$0xff] }
 0x607   :  { %v6955_v9 = vcombine.low %v4417_v57, %v4424_v56  ;;  %v4682_v40 = vunpack.c.h.b16 %v4424_v56  ;;  %v10947_v57 = vld [vmem:[#allocation51_spill] sm:$0xff] }
 0x60b   :  { %6136 = vmatmul.mubr.bf16.gmra.mrb[108].mxu0 %v4388_v15  ;;  %v4427_v15 = vrot.slane %v10904_v59, 1  ;;  %v7833_v59 = vld [vmem:[%s10600_s10] sm:$0xff]  }
 0x60c   :  { %6143 = vmatprep.mubr.bf16.mxu0 %v6949_v16  ;;  %v4416_v16 = vsel %vm1367_vm4, %v4411_v11, %v4415_v14  ;;  %7158 = vmatpush3.bf16.msra.mxu0 %v7833_v59  ;;  %v4446_v11 = vsel %vm1367_vm4, %v4441_v26, %v10944_v53  ;;  %v10420_v14 = vld [vmem:[%s10599_s9] ss:$0 sm:$0xff] }
 0x60d   :  { %v4428_v23 = vsel %vm1367_vm4, %v4423_v41, %v4427_v15  ;;  %7159 = vmatprep.subr.bf16.mxu0 %v7895_v31  ;;  %v10951_v41 = vld [vmem:[#allocation55_spill] sm:$0xff] }
 0x60e   :  { %v4688_v36 = vunpack.c.l.b16 %v4428_v23 }
 0x610   :  { %v5006_v12 = vpack.c.b16 %v4688_v36, %v4682_v40  ;;  %7160 = vmatpush3.bf16.msra.mxu0 %v7834_v51 }
 0x611   :  { %7161 = vmatprep.subr.bf16.mxu0 %v7895_v31 }
 0x613   :  { %6144 = vmatmul.mubr.bf16.gmra.mrb[112].mxu0 %v6948_v0  ;;  %v4425_v0 = vrot.slane %v10907_v52, 1 }
 0x614   :  { %6151 = vmatprep.mubr.bf16.mxu0 %v4964_v35  ;;  %v4431_v35 = vrot.slane %v10908_v42, 1  ;;  %7162 = vmatpush3.bf16.msra.mxu0 %v7835_v63 }
 0x615   :  { %v4426_v49 = vsel %vm1367_vm4, %v4420_v19, %v4425_v0  ;;  %v4430_v34 = vsel %vm1367_vm4, %v4425_v0, %v4429_v58  ;;  %7163 = vmatprep.subr.bf16.mxu0 %v7895_v31 }
 0x616   :  { %v4432_v5 = vsel %vm1367_vm4, %v4427_v15, %v4431_v35  ;;  %v4687_v52 = vunpack.c.l.b16 %v4426_v49  ;;  %v4699_v2 = vunpack.c.l.b16 %v4430_v34  ;;  %v4705_v18 = vunpack.c.h.b16 %v4430_v34 }
 0x617   :  { %v4700_v42 = vunpack.c.l.b16 %v4432_v5  ;;  %v4706_v46 = vunpack.c.h.b16 %v4432_v5 }
 0x618   :  { %7164 = vmatpush3.bf16.msra.mxu0 %v7836_v61 }
 0x619   :  { %7165 = vmatprep.subr.bf16.mxu0 %v7895_v31 }
 0x61b   :  { %6152 = vmatmul.mubr.bf16.gmra.mrb[116].mxu0 %v4963_v21  ;;  %v4681_v21 = vunpack.c.h.b16 %v4421_v27 }
 0x61c   :  { %6159 = vmatprep.mubr.bf16.mxu0 %v4970_v38  ;;  %v4694_v38 = vunpack.c.h.b16 %v4428_v23 }
 0x61d   :  { %v5005_v37 = vpack.c.b16 %v4687_v52, %v4681_v21 }
 0x61e   :  { %v5012_v47 = vpack.c.b16 %v4700_v42, %v4694_v38 }
 0x623   :  { %6160 = vmatmul.mubr.bf16.gmra.mrb[120].mxu0 %v4969_v6  ;;  %v4712_v6 = vunpack.c.l.b16 %v4431_v35 }
 0x624   :  { %6167 = vmatprep.mubr.bf16.mxu0 %v4976_v62  ;;  %v4693_v62 = vunpack.c.h.b16 %v4426_v49 }
 0x625   :  { %v5018_v3 = vpack.c.b16 %v4712_v6, %v4706_v46 }
 0x626   :  { %v5011_v4 = vpack.c.b16 %v4699_v2, %v4693_v62 }
 0x62b   :  { %6168 = vmatmul.mubr.bf16.gmra.mrb[124].mxu0 %v4975_v48  ;;  %v4711_v48 = vunpack.c.l.b16 %v4429_v58 }
 0x62c   :  { %6175 = vmatprep.mubr.bf16.mxu0 %v4410_v50  ;;  %v4436_v50 = vrot.slane %v10910_v32, 1  ;;  %v4442_v32 = vsel %vm1367_vm4, %v4437_v1, %v4441_v26 }
 0x62d   :  { %v5017_v24 = vpack.c.b16 %v4711_v48, %v4705_v18 }
 0x62e   :  { %v4438_v7 = vsel %vm1367_vm4, %v4436_v50, %v4437_v1 }
 0x633   :  { %6176 = vmatmul.mubr.bf16.gmra.mrb[128].mxu0 %v4407_v33  ;;  %v10942_v33 = vrot.slane %v10941_v45, 1 }
 0x634   :  { %6183 = vmatprep.mubr.bf16.mxu0 %v4414_v30 }
 0x635   :  { %v4440_v30 = vsel %vm1367_vm4, %v4434_v22, %v10942_v33 }
 0x63b   :  { %6184 = vmatmul.mubr.bf16.gmra.mrb[132].mxu0 %v4412_v20  ;;  %v10948_v20 = vld [vmem:[#allocation52_spill] sm:$0xff] }
 0x63c   :  { %6191 = vmatprep.mubr.bf16.mxu0 %v4418_v17  ;;  %v10949_v17 = vld [vmem:[#allocation53_spill] sm:$0xff] }
 0x643   :  { %6192 = vmatmul.mubr.bf16.gmra.mrb[136].mxu0 %v4416_v16 }
 0x644   :  { %6199 = vmatprep.mubr.bf16.mxu0 %v6955_v9 }
 0x64b   :  { %6200 = vmatmul.mubr.bf16.gmra.mrb[140].mxu0 %v6954_v39 }
 0x64c   :  { %6207 = vmatprep.mubr.bf16.mxu0 %v5006_v12 }
 0x653   :  { %6208 = vmatmul.mubr.bf16.gmra.mrb[144].mxu0 %v5005_v37 }
 0x654   :  { %6215 = vmatprep.mubr.bf16.mxu0 %v5012_v47 }
 0x65b   :  { %6216 = vmatmul.mubr.bf16.gmra.mrb[148].mxu0 %v5011_v4 }
 0x65c   :  { %6223 = vmatprep.mubr.bf16.mxu0 %v5018_v3 }
 0x663   :  { %6224 = vmatmul.mubr.bf16.gmra.mrb[152].mxu0 %v5017_v24  ;;  %v10954_v24 = vld [vmem:[#allocation8_spill] sm:$0xff] }
 0x664   :  { %6231 = vmatprep.mubr.bf16.mxu0 %v4438_v7  ;;  %v10440_v50 = vadd.s32 48, %v10954_v24 }
 0x666   :  { %vm6484_vm6 = vcmp.lt.s32.totalorder %v10440_v50, 51 }
 0x66b   :  { %6232 = vmatmul.mubr.bf16.gmra.mrb[156].mxu0 %v4435_v44 }
 0x66c   :  { %6239 = vmatprep.mubr.bf16.mxu0 %v4442_v32 }
 0x673   :  { %6240 = vmatmul.mubr.bf16.gmra.mrb[160].mxu0 %v4440_v30 }
 0x674   :  { %6247 = vmatprep.mubr.bf16.mxu0 %v4446_v11 }
 0x67b   :  { %6248 = vmatmul.mubr.bf16.gmra.mrb[164].mxu0 %v10945_v28 }
 0x67c   :  { %6255 = vmatprep.mubr.bf16.mxu0 %v10946_v29 }
 0x683   :  { %6256 = vmatmul.mubr.bf16.gmra.mrb[168].mxu0 %v10947_v57 }
 0x684   :  { %6263 = vmatprep.mubr.bf16.mxu0 %v10948_v20 }
 0x68b   :  { %6264 = vmatmul.mubr.bf16.gmra.mrb[172].mxu0 %v10949_v17  ;;  %v7837_v17 = vld [vmem:[%s10600_s10 + $0x20] sm:$0xff]  }
 0x68c   :  { %6271 = vmatprep.mubr.bf16.mxu0 %v10950_v10  ;;  %7166 = vmatpush3.bf16.msra.mxu0 %v7837_v17 }
 0x68d   :  { %7167 = vmatprep.subr.bf16.mxu0 %v7895_v31 }
 0x693   :  { %6272 = vmatmul.mubr.bf16.gmra.mrb[176].mxu0 %v10951_v41 }
 0x694   :  { %6279 = vmatprep.mubr.bf16.mxu0 %v10952_v60 }
 0x696   :  { %v6065_v43 = vpop.f32.mrb[72].mxu0 }
 0x697   :  { %v6295_v56 = vmul.f32 %v10415_v13, %v6065_v43  ;;  %v6067_v15 = vpop.f32.mrb[73].mxu0 }
 0x698   :  { %v6068_v16 = vpop.f32.mrb[74].mxu0 }
 0x699   :  { %v6358_v9 = vadd.f32 %v10420_v14, %v6295_v56  ;;  %v6296_v54 = vmul.f32 %v10415_v13, %v6068_v16  ;;  %v6070_v19 = vpop.f32.mrb[75].mxu0 }
 0x69b   :  { %v6359_v23 = vadd.f32 %v10420_v14, %v6296_v54  ;;  %6280 = vmatmul.mubr.bf16.gmra.mrb[180].mxu0 %v10953_v25  ;;  %v6414_v27 = vmax.f32 %v6358_v9, 0.0 }
 0x69c   :  { %7173 = vmatprep.mubr.msk.bf16.mxu0 %vm7896_vm9, %v7895_v31 }
 0x69d   :  { %v6415_v36 = vmax.f32 %v6359_v23, 0.0 }
 0x69e   :  { %v6073_v0 = vpop.f32.mrb[76].mxu0 }
 0x69f   :  { %v6541_v35 = vadd.f32 %v6415_v36, %v6414_v27  ;;  %v6297_v40 = vmul.f32 %v10415_v13, %v6073_v0  ;;  %v6075_v59 = vpop.f32.mrb[77].mxu0 }
 0x6a0   :  { %v6076_v39 = vpop.f32.mrb[78].mxu0 }
 0x6a1   :  { %v6360_v12 = vadd.f32 %v10420_v14, %v6297_v40  ;;  %v6298_v49 = vmul.f32 %v10415_v13, %v6076_v39  ;;  %v6078_v5 = vpop.f32.mrb[79].mxu0 }
 0x6a3   :  { %v6416_v52 = vmax.f32 %v6360_v12, 0.0  ;;  %v6361_v42 = vadd.f32 %v10420_v14, %v6298_v49 }
 0x6a5   :  { %v6542_v58 = vadd.f32 %v6541_v35, %v6416_v52  ;;  %v6417_v21 = vmax.f32 %v6361_v42, 0.0 }
 0x6a6   :  { %v6081_v38 = vpop.f32.mrb[80].mxu0 }
 0x6a7   :  { %v6543_v37 = vadd.f32 %v6542_v58, %v6417_v21  ;;  %v6299_v47 = vmul.f32 %v10415_v13, %v6081_v38  ;;  %v6083_v34 = vpop.f32.mrb[81].mxu0 }
 0x6a8   :  { %v6084_v2 = vpop.f32.mrb[82].mxu0 }
 0x6a9   :  { %v6362_v46 = vadd.f32 %v10420_v14, %v6299_v47  ;;  %v6300_v6 = vmul.f32 %v10415_v13, %v6084_v2  ;;  %v6086_v62 = vpop.f32.mrb[83].mxu0 }
 0x6ab   :  { %v6418_v4 = vmax.f32 %v6362_v46, 0.0  ;;  %v6363_v3 = vadd.f32 %v10420_v14, %v6300_v6 }
 0x6ad   :  { %v6544_v18 = vadd.f32 %v6543_v37, %v6418_v4  ;;  %v6419_v48 = vmax.f32 %v6363_v3, 0.0 }
 0x6ae   :  { %v6089_v1 = vpop.f32.mrb[84].mxu0 }
 0x6af   :  { %v6545_v7 = vadd.f32 %v6544_v18, %v6419_v48  ;;  %v6301_v51 = vmul.f32 %v10415_v13, %v6089_v1  ;;  %v6091_v22 = vpop.f32.mrb[85].mxu0 }
 0x6b0   :  { %v6092_v26 = vpop.f32.mrb[86].mxu0 }
 0x6b1   :  { %v6364_v55 = vadd.f32 %v10420_v14, %v6301_v51  ;;  %v6094_v44 = vpop.f32.mrb[87].mxu0  ;;  %v6302_v45 = vmul.f32 %v10415_v13, %v6092_v26  ;;  %v7838_v26 = vld [vmem:[%s10600_s10 + $0x28] sm:$0xff]  }
 0x6b2   :  { %7168 = vmatpush3.bf16.msra.mxu0 %v7838_v26 }
 0x6b3   :  { %v6420_v32 = vmax.f32 %v6364_v55, 0.0  ;;  %v6365_v53 = vadd.f32 %v10420_v14, %v6302_v45  ;;  %7169 = vmatprep.subr.bf16.mxu0 %v7895_v31 }
 0x6b5   :  { %v6491_v33 = vsel %vm6484_vm6, %v6420_v32, 0.0  ;;  %v6421_v10 = vmax.f32 %v6365_v53, 0.0 }
 0x6b6   :  { %v6546_v30 = vadd.f32 %v6545_v7, %v6491_v33  ;;  %v6097_v8 = vpop.f32.mrb[88].mxu0 }
 0x6b7   :  { %v6303_v11 = vmul.f32 %v10415_v13, %v6097_v8  ;;  %v6099_v28 = vpop.f32.mrb[89].mxu0 }
 0x6b8   :  { %v6100_v29 = vpop.f32.mrb[90].mxu0  ;;  %v6547_v27 = vrot.slane %v6546_v30, 4 }
 0x6b9   :  { %v6366_v63 = vadd.f32 %v10420_v14, %v6303_v11  ;;  %v6304_v57 = vmul.f32 %v10415_v13, %v6100_v29  ;;  %v6102_v20 = vpop.f32.mrb[91].mxu0 }
 0x6ba   :  { %v6548_v59 = vadd.f32 %v6547_v27, %v6546_v30 }
 0x6bb   :  { %v6422_v41 = vmax.f32 %v6366_v63, 0.0  ;;  %v6367_v60 = vadd.f32 %v10420_v14, %v6304_v57 }
 0x6bc   :  { %v6549_v38 = vrot.slane %v6548_v59, 2 }
 0x6bd   :  { %v6553_v43 = vadd.f32 %v6422_v41, %v6421_v10  ;;  %v6423_v56 = vmax.f32 %v6367_v60, 0.0 }
 0x6be   :  { %v6105_v15 = vpop.f32.mrb[92].mxu0  ;;  %v6550_v46 = vadd.f32 %v6549_v38, %v6548_v59 }
 0x6bf   :  { %v6554_v16 = vadd.f32 %v6553_v43, %v6423_v56  ;;  %v6305_v9 = vmul.f32 %v10415_v13, %v6105_v15  ;;  %v6107_v54 = vpop.f32.mrb[93].mxu0 }
 0x6c0   :  { %v6108_v19 = vpop.f32.mrb[94].mxu0  ;;  %v6551_v51 = vrot.slane %v6550_v46, 1 }
 0x6c1   :  { %v6368_v23 = vadd.f32 %v10420_v14, %v6305_v9  ;;  %v6306_v25 = vmul.f32 %v10415_v13, %v6108_v19  ;;  %v6110_v61 = vpop.f32.mrb[95].mxu0 }
 0x6c2   :  { %v6552_v33 = vadd.f32 %v6551_v51, %v6550_v46  ;;  %v7839_v51 = vld [vmem:[%s10600_s10 + $0x30] sm:$0xff]  }
 0x6c3   :  { %v6424_v36 = vmax.f32 %v6368_v23, 0.0  ;;  %v6369_v0 = vadd.f32 %v10420_v14, %v6306_v25  ;;  %7170 = vmatpush3.bf16.msra.mxu0 %v7839_v51 }
 0x6c4   :  { %v6637_v10 = vmul.f32 0.019607844, %v6552_v33  ;;  %7171 = vmatprep.subr.bf16.mxu0 %v7895_v31 }
 0x6c5   :  { %v6555_v35 = vadd.f32 %v6554_v16, %v6424_v36  ;;  %v6425_v40 = vmax.f32 %v6369_v0, 0.0 }
 0x6c6   :  { %v6113_v39 = vpop.f32.mrb[96].mxu0  ;;  %v6645_v9 = vpack.c.bf16 %v6637_v10, %v6637_v10 }
 0x6c7   :  { %v6556_v12 = vadd.f32 %v6555_v35, %v6425_v40  ;;  %v6307_v49 = vmul.f32 %v10415_v13, %v6113_v39  ;;  %v6115_v5 = vpop.f32.mrb[97].mxu0 }
 0x6c8   :  { %v6116_v52 = vpop.f32.mrb[98].mxu0  ;;  %v6684_v59 = vunpack.c.l.b16 %v6645_v9 }
 0x6c9   :  { %v6370_v42 = vadd.f32 %v10420_v14, %v6307_v49  ;;  %v6308_v58 = vmul.f32 %v10415_v13, %v6116_v52  ;;  %v6118_v21 = vpop.f32.mrb[99].mxu0 }
 0x6cb   :  { %v6426_v37 = vmax.f32 %v6370_v42, 0.0  ;;  %v6371_v47 = vadd.f32 %v10420_v14, %v6308_v58 }
 0x6cd   :  { %v6557_v34 = vadd.f32 %v6556_v12, %v6426_v37  ;;  %v6427_v2 = vmax.f32 %v6371_v47, 0.0 }
 0x6ce   :  { %v6121_v6 = vpop.f32.mrb[100].mxu0 }
 0x6cf   :  { %v6498_v62 = vsel %vm6484_vm6, %v6427_v2, 0.0  ;;  %v6309_v4 = vmul.f32 %v10415_v13, %v6121_v6  ;;  %v6123_v3 = vpop.f32.mrb[101].mxu0 }
 0x6d0   :  { %v6558_v18 = vadd.f32 %v6557_v34, %v6498_v62  ;;  %v6124_v48 = vpop.f32.mrb[102].mxu0 }
 0x6d1   :  { %v6372_v1 = vadd.f32 %v10420_v14, %v6309_v4  ;;  %v6310_v24 = vmul.f32 %v10415_v13, %v6124_v48  ;;  %v6126_v7 = vpop.f32.mrb[103].mxu0 }
 0x6d2   :  { %v6559_v22 = vrot.slane %v6558_v18, 4 }
 0x6d3   :  { %v6373_v55 = vadd.f32 %v10420_v14, %v6310_v24  ;;  %v6428_v32 = vmax.f32 %v6372_v1, 0.0 }
 0x6d4   :  { %v6560_v44 = vadd.f32 %v6559_v22, %v6558_v18 }
 0x6d5   :  { %v6429_v45 = vmax.f32 %v6373_v55, 0.0 }
 0x6d6   :  { %v6561_v30 = vrot.slane %v6560_v44, 2  ;;  %v6129_v8 = vpop.f32.mrb[104].mxu0 }
 0x6d7   :  { %v6565_v53 = vadd.f32 %v6429_v45, %v6428_v32  ;;  %v6311_v11 = vmul.f32 %v10415_v13, %v6129_v8  ;;  %v6131_v28 = vpop.f32.mrb[105].mxu0 }
 0x6d8   :  { %v6562_v29 = vadd.f32 %v6561_v30, %v6560_v44  ;;  %v6132_v63 = vpop.f32.mrb[106].mxu0 }
 0x6d9   :  { %v6374_v57 = vadd.f32 %v10420_v14, %v6311_v11  ;;  %v6312_v20 = vmul.f32 %v10415_v13, %v6132_v63  ;;  %v6134_v17 = vpop.f32.mrb[107].mxu0 }
 0x6da   :  { %v6563_v41 = vrot.slane %v6562_v29, 1 }
 0x6db   :  { %v6430_v60 = vmax.f32 %v6374_v57, 0.0  ;;  %v6375_v43 = vadd.f32 %v10420_v14, %v6312_v20 }
 0x6dc   :  { %v6564_v56 = vadd.f32 %v6563_v41, %v6562_v29 }
 0x6dd   :  { %v6566_v15 = vadd.f32 %v6565_v53, %v6430_v60  ;;  %v6431_v16 = vmax.f32 %v6375_v43, 0.0 }
 0x6de   :  { %v6638_v54 = vmul.f32 0.019607844, %v6564_v56  ;;  %v6137_v19 = vpop.f32.mrb[108].mxu0 }
 0x6df   :  { %v6567_v23 = vadd.f32 %v6566_v15, %v6431_v16  ;;  %v6313_v25 = vmul.f32 %v10415_v13, %v6137_v19  ;;  %v6139_v61 = vpop.f32.mrb[109].mxu0 }
 0x6e0   :  { %v6646_v27 = vpack.c.bf16 %v6638_v54, %v6638_v54  ;;  %v6140_v36 = vpop.f32.mrb[110].mxu0 }
 0x6e1   :  { %v6376_v0 = vadd.f32 %v10420_v14, %v6313_v25  ;;  %v6314_v35 = vmul.f32 %v10415_v13, %v6140_v36  ;;  %v6142_v40 = vpop.f32.mrb[111].mxu0 }
 0x6e2   :  { %v6685_v39 = vunpack.c.l.b16 %v6646_v27 }
 0x6e3   :  { %v6432_v12 = vmax.f32 %v6376_v0, 0.0  ;;  %v6377_v49 = vadd.f32 %v10420_v14, %v6314_v35 }
 0x6e4   :  { %v6693_v5 = vsel %vm6692_vm7, %v6685_v39, %v6684_v59 }
 0x6e5   :  { %v6568_v52 = vadd.f32 %v6567_v23, %v6432_v12  ;;  %v6433_v42 = vmax.f32 %v6377_v49, 0.0 }
 0x6e6   :  { %v6145_v58 = vpop.f32.mrb[112].mxu0 }
 0x6e7   :  { %v6569_v21 = vadd.f32 %v6568_v52, %v6433_v42  ;;  %v6315_v38 = vmul.f32 %v10415_v13, %v6145_v58  ;;  %v6147_v37 = vpop.f32.mrb[113].mxu0 }
 0x6e8   :  { %v6148_v47 = vpop.f32.mrb[114].mxu0 }
 0x6e9   :  { %v6378_v34 = vadd.f32 %v10420_v14, %v6315_v38  ;;  %v6150_v2 = vpop.f32.mrb[115].mxu0  ;;  %v6316_v6 = vmul.f32 %v10415_v13, %v6148_v47 }
 0x6eb   :  { %v6434_v46 = vmax.f32 %v6378_v34, 0.0  ;;  %v6379_v18 = vadd.f32 %v10420_v14, %v6316_v6 }
 0x6ed   :  { %v6505_v62 = vsel %vm6484_vm6, %v6434_v46, 0.0  ;;  %v6435_v32 = vmax.f32 %v6379_v18, 0.0 }
 0x6ee   :  { %v6570_v4 = vadd.f32 %v6569_v21, %v6505_v62  ;;  %v6153_v3 = vpop.f32.mrb[116].mxu0  ;;  %v7840_v62 = vld [vmem:[%s10600_s10 + $0x38] sm:$0xff]  }
 0x6ef   :  { %v6317_v48 = vmul.f32 %v10415_v13, %v6153_v3  ;;  %v6155_v1 = vpop.f32.mrb[117].mxu0  ;;  %7172 = vmatpush3.bf16.msra.mxu0 %v7840_v62 }
 0x6f0   :  { %v6571_v24 = vrot.slane %v6570_v4, 4  ;;  %v6156_v7 = vpop.f32.mrb[118].mxu0 }
 0x6f1   :  { %v6380_v22 = vadd.f32 %v10420_v14, %v6317_v48  ;;  %v6318_v26 = vmul.f32 %v10415_v13, %v6156_v7  ;;  %v6158_v55 = vpop.f32.mrb[119].mxu0 }
 0x6f2   :  { %v6572_v44 = vadd.f32 %v6571_v24, %v6570_v4 }
 0x6f3   :  { %v6436_v45 = vmax.f32 %v6380_v22, 0.0  ;;  %v6381_v33 = vadd.f32 %v10420_v14, %v6318_v26 }
 0x6f4   :  { %v6573_v30 = vrot.slane %v6572_v44, 2 }
 0x6f5   :  { %v6577_v8 = vadd.f32 %v6436_v45, %v6435_v32  ;;  %v6437_v53 = vmax.f32 %v6381_v33, 0.0 }
 0x6f6   :  { %v6574_v11 = vadd.f32 %v6573_v30, %v6572_v44  ;;  %v6161_v28 = vpop.f32.mrb[120].mxu0 }
 0x6f7   :  { %v6578_v29 = vadd.f32 %v6577_v8, %v6437_v53  ;;  %v6319_v63 = vmul.f32 %v10415_v13, %v6161_v28  ;;  %v6163_v57 = vpop.f32.mrb[121].mxu0 }
 0x6f8   :  { %v6575_v20 = vrot.slane %v6574_v11, 1  ;;  %v6164_v17 = vpop.f32.mrb[122].mxu0 }
 0x6f9   :  { %v6382_v10 = vadd.f32 %v10420_v14, %v6319_v63  ;;  %v6320_v41 = vmul.f32 %v10415_v13, %v6164_v17  ;;  %v6166_v60 = vpop.f32.mrb[123].mxu0 }
 0x6fa   :  { %v6576_v43 = vadd.f32 %v6575_v20, %v6574_v11 }
 0x6fb   :  { %v6438_v56 = vmax.f32 %v6382_v10, 0.0  ;;  %v6383_v15 = vadd.f32 %v10420_v14, %v6320_v41 }
 0x6fc   :  { %v6639_v16 = vmul.f32 0.019607844, %v6576_v43 }
 0x6fd   :  { %v6579_v9 = vadd.f32 %v6578_v29, %v6438_v56  ;;  %v6439_v54 = vmax.f32 %v6383_v15, 0.0 }
 0x6fe   :  { %v6647_v19 = vpack.c.bf16 %v6639_v16, %v6639_v16  ;;  %v6169_v23 = vpop.f32.mrb[124].mxu0 }
 0x6ff   :  { %v6580_v25 = vadd.f32 %v6579_v9, %v6439_v54  ;;  %v6321_v61 = vmul.f32 %v10415_v13, %v6169_v23  ;;  %v6171_v27 = vpop.f32.mrb[125].mxu0 }
 0x700   :  { %v6686_v36 = vunpack.c.l.b16 %v6647_v19  ;;  %v6172_v0 = vpop.f32.mrb[126].mxu0 }
 0x701   :  { %v6384_v35 = vadd.f32 %v10420_v14, %v6321_v61  ;;  %v6322_v40 = vmul.f32 %v10415_v13, %v6172_v0  ;;  %v6174_v59 = vpop.f32.mrb[127].mxu0 }
 0x702   :  { %v6695_v39 = vsel %vm6694_vm8, %v6686_v36, %v6693_v5 }
 0x703   :  { %v6440_v12 = vmax.f32 %v6384_v35, 0.0  ;;  %v6385_v49 = vadd.f32 %v10420_v14, %v6322_v40 }
 0x705   :  { %v6581_v52 = vadd.f32 %v6580_v25, %v6440_v12  ;;  %v6441_v42 = vmax.f32 %v6385_v49, 0.0 }
 0x706   :  { %v6177_v58 = vpop.f32.mrb[128].mxu0 }
 0x707   :  { %v6512_v21 = vsel %vm6484_vm6, %v6441_v42, 0.0  ;;  %v6323_v38 = vmul.f32 %v10415_v13, %v6177_v58  ;;  %v6179_v37 = vpop.f32.mrb[129].mxu0 }
 0x708   :  { %v6582_v47 = vadd.f32 %v6581_v52, %v6512_v21  ;;  %v6180_v34 = vpop.f32.mrb[130].mxu0 }
 0x709   :  { %v6386_v2 = vadd.f32 %v10420_v14, %v6323_v38  ;;  %v6324_v46 = vmul.f32 %v10415_v13, %v6180_v34  ;;  %v6182_v6 = vpop.f32.mrb[131].mxu0 }
 0x70a   :  { %v6583_v5 = vrot.slane %v6582_v47, 4 }
 0x70b   :  { %v6387_v4 = vadd.f32 %v10420_v14, %v6324_v46  ;;  %v6442_v18 = vmax.f32 %v6386_v2, 0.0 }
 0x70c   :  { %v6584_v3 = vadd.f32 %v6583_v5, %v6582_v47 }
 0x70d   :  { %v6443_v48 = vmax.f32 %v6387_v4, 0.0 }
 0x70e   :  { %v6585_v1 = vrot.slane %v6584_v3, 2  ;;  %v6185_v24 = vpop.f32.mrb[132].mxu0 }
 0x70f   :  { %v6589_v7 = vadd.f32 %v6443_v48, %v6442_v18  ;;  %v6325_v51 = vmul.f32 %v10415_v13, %v6185_v24  ;;  %v6187_v22 = vpop.f32.mrb[133].mxu0 }
 0x710   :  { %v6586_v26 = vadd.f32 %v6585_v1, %v6584_v3  ;;  %v6188_v55 = vpop.f32.mrb[134].mxu0 }
 0x711   :  { %v6388_v44 = vadd.f32 %v10420_v14, %v6325_v51  ;;  %v6326_v32 = vmul.f32 %v10415_v13, %v6188_v55  ;;  %v6190_v45 = vpop.f32.mrb[135].mxu0 }
 0x712   :  { %v6587_v33 = vrot.slane %v6586_v26, 1 }
 0x713   :  { %v6444_v30 = vmax.f32 %v6388_v44, 0.0  ;;  %v6389_v31 = vadd.f32 %v10420_v14, %v6326_v32 }
 0x714   :  { %v6588_v8 = vadd.f32 %v6587_v33, %v6586_v26 }
 0x715   :  { %v6590_v53 = vadd.f32 %v6589_v7, %v6444_v30  ;;  %v6445_v11 = vmax.f32 %v6389_v31, 0.0 }
 0x716   :  { %v6640_v28 = vmul.f32 0.019607844, %v6588_v8  ;;  %v6193_v29 = vpop.f32.mrb[136].mxu0 }
 0x717   :  { %v6591_v63 = vadd.f32 %v6590_v53, %v6445_v11  ;;  %v6327_v57 = vmul.f32 %v10415_v13, %v6193_v29  ;;  %v6195_v20 = vpop.f32.mrb[137].mxu0 }
 0x718   :  { %v6648_v17 = vpack.c.bf16 %v6640_v28, %v6640_v28  ;;  %v6196_v10 = vpop.f32.mrb[138].mxu0 }
 0x719   :  { %v6390_v41 = vadd.f32 %v10420_v14, %v6327_v57  ;;  %v6328_v60 = vmul.f32 %v10415_v13, %v6196_v10  ;;  %v6198_v43 = vpop.f32.mrb[139].mxu0 }
 0x71a   :  { %v6687_v56 = vunpack.c.l.b16 %v6648_v17 }
 0x71b   :  { %v6446_v15 = vmax.f32 %v6390_v41, 0.0  ;;  %v6391_v16 = vadd.f32 %v10420_v14, %v6328_v60 }
 0x71c   :  { %v6697_v9 = vsel %vm6696_vm10, %v6687_v56, %v6695_v39 }
 0x71d   :  { %v6592_v54 = vadd.f32 %v6591_v63, %v6446_v15  ;;  %v6447_v19 = vmax.f32 %v6391_v16, 0.0 }
 0x71e   :  { %v6201_v23 = vpop.f32.mrb[140].mxu0 }
 0x71f   :  { %v6593_v25 = vadd.f32 %v6592_v54, %v6447_v19  ;;  %v6329_v61 = vmul.f32 %v10415_v13, %v6201_v23  ;;  %v6203_v27 = vpop.f32.mrb[141].mxu0 }
 0x720   :  { %v6204_v36 = vpop.f32.mrb[142].mxu0 }
 0x721   :  { %v6392_v0 = vadd.f32 %v10420_v14, %v6329_v61  ;;  %v6206_v35 = vpop.f32.mrb[143].mxu0  ;;  %v6330_v59 = vmul.f32 %v10415_v13, %v6204_v36 }
 0x723   :  { %v6448_v40 = vmax.f32 %v6392_v0, 0.0  ;;  %v6393_v39 = vadd.f32 %v10420_v14, %v6330_v59 }
 0x725   :  { %v6519_v12 = vsel %vm6484_vm6, %v6448_v40, 0.0  ;;  %v6449_v46 = vmax.f32 %v6393_v39, 0.0 }
 0x726   :  { %v6594_v49 = vadd.f32 %v6593_v25, %v6519_v12  ;;  %v6209_v52 = vpop.f32.mrb[144].mxu0 }
 0x727   :  { %v6331_v42 = vmul.f32 %v10415_v13, %v6209_v52  ;;  %v6211_v58 = vpop.f32.mrb[145].mxu0 }
 0x728   :  { %v6595_v21 = vrot.slane %v6594_v49, 4  ;;  %v6212_v38 = vpop.f32.mrb[146].mxu0 }
 0x729   :  { %v6394_v37 = vadd.f32 %v10420_v14, %v6331_v42  ;;  %v6332_v47 = vmul.f32 %v10415_v13, %v6212_v38  ;;  %v6214_v34 = vpop.f32.mrb[147].mxu0 }
 0x72a   :  { %v6596_v2 = vadd.f32 %v6595_v21, %v6594_v49 }
 0x72b   :  { %v6450_v6 = vmax.f32 %v6394_v37, 0.0  ;;  %v6395_v5 = vadd.f32 %v10420_v14, %v6332_v47 }
 0x72c   :  { %v6597_v62 = vrot.slane %v6596_v2, 2 }
 0x72d   :  { %v6601_v4 = vadd.f32 %v6450_v6, %v6449_v46  ;;  %v6451_v3 = vmax.f32 %v6395_v5, 0.0 }
 0x72e   :  { %v6598_v18 = vadd.f32 %v6597_v62, %v6596_v2  ;;  %v6217_v48 = vpop.f32.mrb[148].mxu0 }
 0x72f   :  { %v6602_v1 = vadd.f32 %v6601_v4, %v6451_v3  ;;  %v6333_v24 = vmul.f32 %v10415_v13, %v6217_v48  ;;  %v6219_v7 = vpop.f32.mrb[149].mxu0 }
 0x730   :  { %v6599_v51 = vrot.slane %v6598_v18, 1  ;;  %v6220_v22 = vpop.f32.mrb[150].mxu0 }
 0x731   :  { %v6396_v26 = vadd.f32 %v10420_v14, %v6333_v24  ;;  %v6334_v55 = vmul.f32 %v10415_v13, %v6220_v22  ;;  %v6222_v44 = vpop.f32.mrb[151].mxu0 }
 0x732   :  { %v6600_v32 = vadd.f32 %v6599_v51, %v6598_v18 }
 0x733   :  { %v6452_v45 = vmax.f32 %v6396_v26, 0.0  ;;  %v6397_v33 = vadd.f32 %v10420_v14, %v6334_v55 }
 0x734   :  { %v6641_v30 = vmul.f32 0.019607844, %v6600_v32 }
 0x735   :  { %v6603_v31 = vadd.f32 %v6602_v1, %v6452_v45  ;;  %v6453_v8 = vmax.f32 %v6397_v33, 0.0 }
 0x736   :  { %v6649_v53 = vpack.c.bf16 %v6641_v30, %v6641_v30  ;;  %v6225_v11 = vpop.f32.mrb[152].mxu0 }
 0x737   :  { %v6604_v28 = vadd.f32 %v6603_v31, %v6453_v8  ;;  %v6335_v29 = vmul.f32 %v10415_v13, %v6225_v11  ;;  %v6227_v63 = vpop.f32.mrb[153].mxu0 }
 0x738   :  { %v6688_v57 = vunpack.c.l.b16 %v6649_v53  ;;  %v6228_v20 = vpop.f32.mrb[154].mxu0 }
 0x739   :  { %v6398_v17 = vadd.f32 %v10420_v14, %v6335_v29  ;;  %v6336_v10 = vmul.f32 %v10415_v13, %v6228_v20  ;;  %v6230_v41 = vpop.f32.mrb[155].mxu0 }
 0x73a   :  { %v6699_v60 = vsel %vm6698_vm11, %v6688_v57, %v6697_v9 }
 0x73b   :  { %v6454_v43 = vmax.f32 %v6398_v17, 0.0  ;;  %v6399_v56 = vadd.f32 %v10420_v14, %v6336_v10 }
 0x73d   :  { %v6605_v15 = vadd.f32 %v6604_v28, %v6454_v43  ;;  %v6455_v16 = vmax.f32 %v6399_v56, 0.0 }
 0x73e   :  { %v6233_v54 = vpop.f32.mrb[156].mxu0 }
 0x73f   :  { %v6526_v19 = vsel %vm6484_vm6, %v6455_v16, 0.0  ;;  %v6337_v23 = vmul.f32 %v10415_v13, %v6233_v54  ;;  %v6235_v25 = vpop.f32.mrb[157].mxu0 }
 0x740   :  { %v6606_v61 = vadd.f32 %v6605_v15, %v6526_v19  ;;  %v6236_v27 = vpop.f32.mrb[158].mxu0 }
 0x741   :  { %v6400_v36 = vadd.f32 %v10420_v14, %v6337_v23  ;;  %v6338_v0 = vmul.f32 %v10415_v13, %v6236_v27  ;;  %v6238_v35 = vpop.f32.mrb[159].mxu0 }
 0x742   :  { %v6607_v9 = vrot.slane %v6606_v61, 4 }
 0x743   :  { %v6401_v40 = vadd.f32 %v10420_v14, %v6338_v0  ;;  %v6456_v12 = vmax.f32 %v6400_v36, 0.0 }
 0x744   :  { %v6608_v59 = vadd.f32 %v6607_v9, %v6606_v61 }
 0x745   :  { %v6457_v49 = vmax.f32 %v6401_v40, 0.0 }
 0x746   :  { %v6609_v52 = vrot.slane %v6608_v59, 2  ;;  %v6241_v39 = vpop.f32.mrb[160].mxu0 }
 0x747   :  { %v6613_v42 = vadd.f32 %v6457_v49, %v6456_v12  ;;  %v6339_v58 = vmul.f32 %v10415_v13, %v6241_v39  ;;  %v6243_v21 = vpop.f32.mrb[161].mxu0 }
 0x748   :  { %v6610_v38 = vadd.f32 %v6609_v52, %v6608_v59  ;;  %v6244_v37 = vpop.f32.mrb[162].mxu0 }
 0x749   :  { %v6402_v47 = vadd.f32 %v10420_v14, %v6339_v58  ;;  %v6340_v34 = vmul.f32 %v10415_v13, %v6244_v37  ;;  %v6246_v2 = vpop.f32.mrb[163].mxu0 }
 0x74a   :  { %v6611_v46 = vrot.slane %v6610_v38, 1 }
 0x74b   :  { %v6458_v6 = vmax.f32 %v6402_v47, 0.0  ;;  %v6403_v5 = vadd.f32 %v10420_v14, %v6340_v34 }
 0x74c   :  { %v6612_v62 = vadd.f32 %v6611_v46, %v6610_v38 }
 0x74d   :  { %v6614_v4 = vadd.f32 %v6613_v42, %v6458_v6  ;;  %v6459_v3 = vmax.f32 %v6403_v5, 0.0 }
 0x74e   :  { %v6642_v18 = vmul.f32 0.019607844, %v6612_v62  ;;  %v6249_v48 = vpop.f32.mrb[164].mxu0 }
 0x74f   :  { %v6615_v1 = vadd.f32 %v6614_v4, %v6459_v3  ;;  %v6341_v24 = vmul.f32 %v10415_v13, %v6249_v48  ;;  %v6251_v7 = vpop.f32.mrb[165].mxu0 }
 0x750   :  { %v6650_v51 = vpack.c.bf16 %v6642_v18, %v6642_v18  ;;  %v6252_v22 = vpop.f32.mrb[166].mxu0 }
 0x751   :  { %v6404_v26 = vadd.f32 %v10420_v14, %v6341_v24  ;;  %v6342_v55 = vmul.f32 %v10415_v13, %v6252_v22  ;;  %v6254_v44 = vpop.f32.mrb[167].mxu0 }
 0x752   :  { %v6689_v32 = vunpack.c.l.b16 %v6650_v51 }
 0x753   :  { %v6460_v45 = vmax.f32 %v6404_v26, 0.0  ;;  %v6405_v33 = vadd.f32 %v10420_v14, %v6342_v55 }
 0x754   :  { %v6701_v30 = vsel %vm6700_vm12, %v6689_v32, %v6699_v60 }
 0x755   :  { %v6616_v31 = vadd.f32 %v6615_v1, %v6460_v45  ;;  %v6461_v8 = vmax.f32 %v6405_v33, 0.0 }
 0x756   :  { %v6257_v53 = vpop.f32.mrb[168].mxu0 }
 0x757   :  { %v6617_v11 = vadd.f32 %v6616_v31, %v6461_v8  ;;  %v6343_v28 = vmul.f32 %v10415_v13, %v6257_v53  ;;  %v6259_v29 = vpop.f32.mrb[169].mxu0 }
 0x758   :  { %v6260_v63 = vpop.f32.mrb[170].mxu0 }
 0x759   :  { %v6406_v57 = vadd.f32 %v10420_v14, %v6343_v28  ;;  %v6262_v20 = vpop.f32.mrb[171].mxu0  ;;  %v6344_v10 = vmul.f32 %v10415_v13, %v6260_v63 }
 0x75b   :  { %v6462_v17 = vmax.f32 %v6406_v57, 0.0  ;;  %v6407_v60 = vadd.f32 %v10420_v14, %v6344_v10 }
 0x75d   :  { %v6533_v41 = vsel %vm6484_vm6, %v6462_v17, 0.0  ;;  %v6463_v36 = vmax.f32 %v6407_v60, 0.0 }
 0x75e   :  { %v6618_v43 = vadd.f32 %v6617_v11, %v6533_v41  ;;  %v6265_v56 = vpop.f32.mrb[172].mxu0 }
 0x75f   :  { %v6345_v15 = vmul.f32 %v10415_v13, %v6265_v56  ;;  %v6267_v16 = vpop.f32.mrb[173].mxu0 }
 0x760   :  { %v6619_v54 = vrot.slane %v6618_v43, 4  ;;  %v6268_v19 = vpop.f32.mrb[174].mxu0 }
 0x761   :  { %v6408_v23 = vadd.f32 %v10420_v14, %v6345_v15  ;;  %v6346_v25 = vmul.f32 %v10415_v13, %v6268_v19  ;;  %v6270_v61 = vpop.f32.mrb[175].mxu0 }
 0x762   :  { %v6620_v27 = vadd.f32 %v6619_v54, %v6618_v43 }
 0x763   :  { %v6464_v0 = vmax.f32 %v6408_v23, 0.0  ;;  %v6409_v35 = vadd.f32 %v10420_v14, %v6346_v25 }
 0x764   :  { %v6621_v9 = vrot.slane %v6620_v27, 2 }
 0x765   :  { %v6625_v40 = vadd.f32 %v6464_v0, %v6463_v36  ;;  %v6465_v59 = vmax.f32 %v6409_v35, 0.0 }
 0x766   :  { %v6622_v12 = vadd.f32 %v6621_v9, %v6620_v27  ;;  %v6273_v49 = vpop.f32.mrb[176].mxu0 }
 0x767   :  { %v6626_v52 = vadd.f32 %v6625_v40, %v6465_v59  ;;  %v6347_v39 = vmul.f32 %v10415_v13, %v6273_v49  ;;  %v6275_v42 = vpop.f32.mrb[177].mxu0 }
 0x768   :  { %v6623_v58 = vrot.slane %v6622_v12, 1  ;;  %v6276_v21 = vpop.f32.mrb[178].mxu0 }
 0x769   :  { %v6410_v38 = vadd.f32 %v10420_v14, %v6347_v39  ;;  %v6348_v37 = vmul.f32 %v10415_v13, %v6276_v21  ;;  %v6278_v47 = vpop.f32.mrb[179].mxu0 }
 0x76a   :  { %v6624_v34 = vadd.f32 %v6623_v58, %v6622_v12 }
 0x76b   :  { %v6466_v2 = vmax.f32 %v6410_v38, 0.0  ;;  %v6411_v46 = vadd.f32 %v10420_v14, %v6348_v37 }
 0x76c   :  { %v6643_v6 = vmul.f32 0.019607844, %v6624_v34 }
 0x76d   :  { %v6627_v5 = vadd.f32 %v6626_v52, %v6466_v2  ;;  %v6467_v62 = vmax.f32 %v6411_v46, 0.0 }
 0x76e   :  { %v6651_v4 = vpack.c.bf16 %v6643_v6, %v6643_v6  ;;  %v6281_v3 = vpop.f32.mrb[180].mxu0 }
 0x76f   :  { %v6628_v18 = vadd.f32 %v6627_v5, %v6467_v62  ;;  %v6349_v48 = vmul.f32 %v10415_v13, %v6281_v3  ;;  %v6283_v1 = vpop.f32.mrb[181].mxu0 }
 0x770   :  { %v6690_v24 = vunpack.c.l.b16 %v6651_v4  ;;  %v6284_v7 = vpop.f32.mrb[182].mxu0 }
 0x771   :  { %v6412_v51 = vadd.f32 %v10420_v14, %v6349_v48  ;;  %v6350_v22 = vmul.f32 %v10415_v13, %v6284_v7  ;;  %v6286_v26 = vpop.f32.mrb[183].mxu0 }
 0x772   :  { %v6703_v55 = vsel %vm6702_vm13, %v6690_v24, %v6701_v30 }
 0x773   :  { %v6468_v44 = vmax.f32 %v6412_v51, 0.0  ;;  %v6413_v32 = vadd.f32 %v10420_v14, %v6350_v22  ;;  %v7012_v14 = vld [vmem:[%s10601_s11] ss:$0 sm:$0xff] }
 0x775   :  { %v6629_v45 = vadd.f32 %v6628_v18, %v6468_v44  ;;  %v6469_v33 = vmax.f32 %v6413_v32, 0.0 }
 0x777   :  { %v6540_v31 = vsel %vm6484_vm6, %v6469_v33, 0.0 }
 0x778   :  { %v6630_v8 = vadd.f32 %v6629_v45, %v6540_v31 }
 0x77a   :  { %v6631_v53 = vrot.slane %v6630_v8, 4 }
 0x77c   :  { %v6632_v11 = vadd.f32 %v6631_v53, %v6630_v8 }
 0x77e   :  { %v6633_v28 = vrot.slane %v6632_v11, 2 }
 0x780   :  { %v6634_v29 = vadd.f32 %v6633_v28, %v6632_v11 }
 0x782   :  { %v6635_v63 = vrot.slane %v6634_v29, 1 }
 0x784   :  { %v6636_v57 = vadd.f32 %v6635_v63, %v6634_v29 }
 0x786   :  { %v6644_v20 = vmul.f32 0.019607844, %v6636_v57 }
 0x788   :  { %v6652_v17 = vpack.c.bf16 %v6644_v20, %v6644_v20 }
 0x78a   :  { %v6691_v13 = vunpack.c.l.b16 %v6652_v17 }
 0x78c   :  { %v6705_v30 = vsel %vm6704_vm14, %v6691_v13, %v6703_v55 }
 0x78d   :  { %v6706_v10 = vpack.c.b16 %v6705_v30, %v6705_v30 }
 0x78f   :  { %7174 = vmatmul.mubr.bf16.vlgmr.msra.gmra.mrb[184].mxu0 %v6706_v10 }
 0x862   :  { %v6790_v50 = vpop.f32.mrb[184].mxu0 }
 0x863   :  { %v6791_v41 = vadd.f32 %v7012_v14, %v6790_v50  ;;  %v7175_v43 = vpop.f32.mrb[185].mxu0 }
 0x864   :  { %v6793_v56 = vpop.f32.mrb[186].mxu0 }
 0x865   :  { %6796 = vst [vmem:[#allocation5] sm:$0xff] %v6791_v41  ;;  %v7176_v60 = vpop.f32.mrb[187].mxu0 }
 0x866   :  { %7876 = shalt.err (!%p7873_p12)
}
 0x867   :  { %s7877_s11 = scalar_lea.hbm %s10602_s12, 128 }
 0x868   :  { %p7878_p13 = scmp.ne.s32.totalorder %s10602_s12, %s7877_s11  ;;  %p7881_p0 = scmp.lt.u32.totalorder %s7877_s11, %s10602_s12 }
 0x86a   :  { %p7883_p1 = pnand %p7881_p0, %p7878_p13 }
 0x86c   :  { %7886 = shalt.err (!%p7883_p1)
}
 0x86d   :  { %6806 = dma.vmem_to_hbm [thread:$0]  %s6804_s0, 128, %s10602_s12, [#allocation4]  }
 0x86e   :  { %7889 = dma.done.wait [#allocation4], 128  }
 0x86f   :  { %7890 = vsyncadd [#allocation4], 4294967168 }
 0x870   :  { %6810 = vsyncpa [#allocation3], 1 }
 0x871   :  { %6811 = vsyncpa [#allocation4], 1 }

</bundles_post_ra>
